<compile_context>
chip_gen: v7x
topology: tpu7x:2x2x1
jax: 0.10.0
libtpu: 0.0.40
codegen_flags: <defaults>
</compile_context>

<pallas_src>
import functools

import jax
import jax.numpy as jnp
from jax.experimental import pallas as pl
from jax.experimental.pallas import tpu as pltpu


# ----------------------------------------------------------------------------------
# helpers
# ----------------------------------------------------------------------------------
def _round_up(x, m):
    return ((x + m - 1) // m) * m


def _pad_to(x, shape):
    return jnp.pad(x, [(0, s - d) for d, s in zip(x.shape, shape)])


def _default_elementwise_dtype():
    """bf16 tanh/score math on v6e & v7x (bf16 VPU/EUP); f32 elsewhere (e.g. v5e)."""
    try:
        kind = jax.devices()[0].device_kind.lower()
    except Exception:
        return jnp.float32
    if any(tag in kind for tag in ("v6", "v7", "7x")):
        return jnp.bfloat16
    return jnp.float32


def _const_spec(shape):
    """Weight BlockSpec: constant index_map; single-buffered to halve its VMEM."""
    nd = len(shape)
    idx = lambda b, t, nd=nd: (0,) * nd
    if hasattr(pl, "Buffered"):
        try:
            return pl.BlockSpec(tuple(shape), idx, pipeline_mode=pl.Buffered(1))
        except TypeError:       # older jax without pipeline_mode kwarg
            pass
    return pl.BlockSpec(tuple(shape), idx)


# ----------------------------------------------------------------------------------
# Kernel: grid = (batch_tiles, seq_tiles); T axis is an "arbitrary" reduction.
# ----------------------------------------------------------------------------------
def _bahdanau_kernel(
    t_valid, ew_dtype,                                      # static
    inputs_ref, h0_ref, c0_ref, enc_ref,                    # activations
    wh_ref, we_ref, v_ref, wgs_ref, wgc_ref, bg_ref, wp_ref, bp_ref,   # weights
    out_ref, attn_ref,                                      # outputs
    projh_sc, gates_sc, m_sc, l_sc, ctx_sc,                 # VMEM scratch
):
    f32, bf16 = jnp.float32, jnp.bfloat16
    TB, OP = inputs_ref.shape
    HP = h0_ref.shape[-1]
    TK = enc_ref.shape[1]

    t = pl.program_id(1)
    nt = pl.num_programs(1)

    # ---- first T tile: state-dependent precompute (stays resident across T) ------
    @pl.when(t == 0)
    def _init():
        h0 = h0_ref[...]
        # attention query projection h0 @ Wh
        projh_sc[...] = jnp.dot(h0.astype(bf16), wh_ref[...],
                                preferred_element_type=f32)
        # state-dependent 2/3 of the LSTM gate matmul, issued before the attention
        # chain so the MXU overlaps the VPU/EUP attention work
        lhs = jnp.concatenate([inputs_ref[...], h0], axis=-1).astype(bf16)
        gates_sc[...] = jnp.dot(lhs, wgs_ref[...], preferred_element_type=f32)
        # online-softmax accumulators
        m_sc[...] = jnp.full_like(m_sc, -jnp.inf)
        l_sc[...] = jnp.zeros_like(l_sc)
        ctx_sc[...] = jnp.zeros_like(ctx_sc)

    # ---- Bahdanau scores for this T tile: v . tanh(Wh h0 + We enc) ---------------
    enc = enc_ref[...]                                          # (TB, TK, HP) bf16
    proj_e = jax.lax.dot_general(
        enc, we_ref[...], dimension_numbers=(((2,), (0,)), ((), ())),
        preferred_element_type=f32)                             # (TB, TK, HP) f32
    x = jnp.tanh((projh_sc[...][:, None, :] + proj_e).astype(ew_dtype))
    v_row = v_ref[...].astype(ew_dtype).reshape(1, 1, HP)
    scores = jnp.sum((x * v_row).astype(f32), axis=-1)          # (TB, TK) f32

    # mask positions beyond the real sequence length
    pos = t * TK + jax.lax.broadcasted_iota(jnp.int32, (TB, TK), 1)
    scores = jnp.where(pos < t_valid, scores, -1e30)

    # stash raw scores in the resident attention-output block (normalized at the end)
    off = pl.multiple_of(t * TK, 128)
    attn_ref[:, pl.ds(off, TK)] = scores

    # ---- online softmax accumulation of the context vector -----------------------
    m_old = m_sc[...]
    m_new = jnp.maximum(m_old, jnp.max(scores, axis=-1, keepdims=True))
    alpha = jnp.exp(m_old - m_new)
    p = jnp.exp(scores - m_new)                                 # (TB, TK)
    l_sc[...] = alpha * l_sc[...] + jnp.sum(p, axis=-1, keepdims=True)
    ctx_tile = jnp.einsum("bqt,bth->bqh", p.astype(bf16)[:, None, :], enc,
                          preferred_element_type=f32)[:, 0, :]  # (TB, HP)
    ctx_sc[...] = alpha * ctx_sc[...] + ctx_tile
    m_sc[...] = m_new

    # ---- last T tile: normalize softmax, LSTM cell, prediction, fused slab -------
    @pl.when(t == nt - 1)
    def _finalize():
        inv_l = 1.0 / l_sc[...]           # exact divide on (TB,1): negligible cost
        attn_ref[...] = jnp.exp(attn_ref[...] - m_sc[...]) * inv_l
        ctx = ctx_sc[...] * inv_l                                   # (TB, HP)

        gates = (gates_sc[...]
                 + jnp.dot(ctx.astype(bf16), wgc_ref[...], preferred_element_type=f32)
                 + bg_ref[...])                                     # (TB, 4*HP)
        i_g = jax.nn.sigmoid(gates[:, 0 * HP:1 * HP])
        f_g = jax.nn.sigmoid(gates[:, 1 * HP:2 * HP])
        g_g = jnp.tanh(gates[:, 2 * HP:3 * HP])
        o_g = jax.nn.sigmoid(gates[:, 3 * HP:4 * HP])
        c1 = f_g * c0_ref[...] + i_g * g_g
        h1 = o_g * jnp.tanh(c1)

        pred = (jnp.dot(h1.astype(bf16), wp_ref[...], preferred_element_type=f32)
                + bp_ref[...])                                      # (TB, OP)
        out_ref[:, 0:OP] = pred
        out_ref[:, OP:OP + HP] = h1
        out_ref[:, OP + HP:OP + 2 * HP] = c1


# ----------------------------------------------------------------------------------
# One-time preparation (cache these across decode steps)
# ----------------------------------------------------------------------------------
def prepare_params(params):
    """Pack/pad all weights into MXU-aligned bf16 tiles once."""
    f32, bf16 = jnp.float32, jnp.bfloat16
    H = params["fc_hidden_w"].shape[0]
    O = params["fc_pred_w"].shape[0]
    HP, OP = _round_up(H, 128), _round_up(O, 128)

    wh = jnp.zeros((HP, HP), f32).at[:H, :H].set(params["fc_hidden_w"].T).astype(bf16)
    we = jnp.zeros((HP, HP), f32).at[:H, :H].set(params["fc_encoder_w"].T).astype(bf16)
    v = jnp.zeros((1, HP), f32).at[:, :H].set(params["attn_v"])

    # LSTM gate weights split so the state-dependent part ([inputs | h0]) is issued
    # before the attention chain and the context part accumulated afterwards.
    w_ih, w_hh = params["lstm_w_ih"], params["lstm_w_hh"]
    b_sum = params["lstm_b_ih"] + params["lstm_b_hh"]
    wg_sh = jnp.zeros((OP + HP, 4 * HP), f32)     # rows: [inputs | h0]
    wg_ctx = jnp.zeros((HP, 4 * HP), f32)         # rows: [context]
    bg = jnp.zeros((1, 4 * HP), f32)
    for g in range(4):                            # PyTorch gate order: i, f, g, o
        rows = slice(g * H, (g + 1) * H)
        cols = slice(g * HP, g * HP + H)
        wg_sh = wg_sh.at[0:O, cols].set(w_ih[rows, :O].T)         # inputs part
        wg_sh = wg_sh.at[OP:OP + H, cols].set(w_hh[rows, :].T)    # h0 part
        wg_ctx = wg_ctx.at[0:H, cols].set(w_ih[rows, O:].T)       # context part
        bg = bg.at[0, cols].set(b_sum[rows])
    wg_sh, wg_ctx = wg_sh.astype(bf16), wg_ctx.astype(bf16)

    wp = jnp.zeros((HP, OP), f32).at[:H, :O].set(params["fc_pred_w"].T).astype(bf16)
    bp = jnp.zeros((1, OP), f32).at[:, :O].set(params["fc_pred_b"])

    return dict(H=H, O=O, HP=HP, OP=OP, wh=wh, we=we, v=v,
                wg_sh=wg_sh, wg_ctx=wg_ctx, bg=bg, wp=wp, bp=bp)


def prepare_encoder(encoder_outputs):
    """Pad + bf16-cast encoder outputs once per sequence."""
    B, T, H = encoder_outputs.shape
    BP, TP, HP = _round_up(B, 8), _round_up(T, 128), _round_up(H, 128)
    enc_p = _pad_to(encoder_outputs, (BP, TP, HP)).astype(jnp.bfloat16)
    return enc_p, T


# ----------------------------------------------------------------------------------
# Single decode step
# ----------------------------------------------------------------------------------
def bahdanau_decoder_step(inputs, hidden, enc_prepared, t_valid, prepped,
                          *, max_batch_tile=64, elementwise_dtype=None):
    """One decode step. `enc_prepared`/`prepped` come from the prepare_* helpers."""
    f32 = jnp.float32
    assert t_valid >= 1, "need at least one valid encoder position"
    h0, c0 = hidden[0][0], hidden[1][0]
    B, O = inputs.shape
    H, HP, OP = prepped["H"], prepped["HP"], prepped["OP"]
    BP, TP, HPe = enc_prepared.shape
    assert HPe == HP and O == prepped["O"] and h0.shape == (B, H)
    assert BP == _round_up(B, 8)

    if elementwise_dtype is None:
        elementwise_dtype = _default_elementwise_dtype()

    # ---- tile selection ------------------------------------------------------------
    # batch tile: largest multiple of 8 dividing BP, capped (raises MXU M-utilization)
    TB, cand = 8, 8
    while cand <= min(BP, max_batch_tile):
        if BP % cand == 0:
            TB = cand
        cand += 8
    # sequence tile: multiple of 128 dividing TP, sized so the bf16 enc block stays
    # ~<= 4 MiB (VMEM-safe even double-buffered on v7x's 64 MiB)
    tk_cap = max(128, ((4 * 1024 * 1024) // (TB * HP * 2)) // 128 * 128)
    TK, cand = 128, 128
    while cand <= min(TP, tk_cap):
        if TP % cand == 0:
            TK = cand
        cand += 128

    # ---- pad activations to aligned tiles (cheap, (B, O/H)-sized) -------------------
    inputs_p = _pad_to(inputs.astype(f32), (BP, OP))
    h0_p = _pad_to(h0.astype(f32), (BP, HP))
    c0_p = _pad_to(c0.astype(f32), (BP, HP))

    args = (inputs_p, h0_p, c0_p, enc_prepared,
            prepped["wh"], prepped["we"], prepped["v"], prepped["wg_sh"],
            prepped["wg_ctx"], prepped["bg"], prepped["wp"], prepped["bp"])

    def act_spec(shape):
        nd = len(shape)
        return pl.BlockSpec((TB,) + tuple(shape[1:]),
                            lambda b, t, nd=nd: (b,) + (0,) * (nd - 1))

    in_specs = [act_spec(inputs_p.shape), act_spec(h0_p.shape), act_spec(c0_p.shape),
                pl.BlockSpec((TB, TK, HP), lambda b, t: (b, t, 0))]
    in_specs += [_const_spec(w.shape) for w in args[4:]]

    out_shapes = (jax.ShapeDtypeStruct((BP, OP + 2 * HP), f32),   # [pred | h1 | c1]
                  jax.ShapeDtypeStruct((BP, TP), f32))            # attention weights
    out_specs = (pl.BlockSpec((TB, OP + 2 * HP), lambda b, t: (b, 0)),
                 pl.BlockSpec((TB, TP), lambda b, t: (b, 0)))

    scratch_shapes = [pltpu.VMEM((TB, HP), f32),       # proj_h
                      pltpu.VMEM((TB, 4 * HP), f32),   # gates (state-dependent part)
                      pltpu.VMEM((TB, 1), f32),        # running max
                      pltpu.VMEM((TB, 1), f32),        # running sum-exp
                      pltpu.VMEM((TB, HP), f32)]       # context accumulator

    # ---- explicit VMEM budget + advisory cost estimate ------------------------------
    weight_bytes = sum(int(a.size) * a.dtype.itemsize for a in args[4:])
    vmem_est = (2 * TB * TK * HP * 2                     # enc block (double-buffered)
                + 2 * TB * (OP + 2 * HP) * 4             # inputs / h0 / c0 blocks
                + weight_bytes                           # single-buffered weights
                + 2 * TB * (OP + 2 * HP) * 4             # slab output
                + 2 * TB * TP * 4                        # attention output
                + TB * (6 * HP + 2) * 4)                 # scratch
    vmem_limit = int(min(64 * 2**20, max(32 * 2**20, int(vmem_est * 1.5))))

    flops = (2 * BP * HP * HP + 2 * BP * TP * HP * HP + 4 * BP * TP * HP
             + 2 * BP * (OP + 2 * HP) * 4 * HP + 2 * BP * HP * OP)
    transcendentals = BP * TP * HP + 2 * BP * TP + 6 * BP * HP
    bytes_accessed = (sum(int(a.size) * a.dtype.itemsize for a in args)
                      + 4 * BP * (OP + 2 * HP) + 4 * BP * TP)
    cost = pl.CostEstimate(flops=int(flops), transcendentals=int(transcendentals),
                           bytes_accessed=int(bytes_accessed))

    slab, attn_p = pl.pallas_call(
        functools.partial(_bahdanau_kernel, int(t_valid), elementwise_dtype),
        grid=(BP // TB, TP // TK),
        in_specs=in_specs,
        out_specs=out_specs,
        out_shape=out_shapes,
        scratch_shapes=scratch_shapes,
        compiler_params=pltpu.CompilerParams(
            dimension_semantics=("parallel", "arbitrary"),
            vmem_limit_bytes=vmem_limit),
        cost_estimate=cost,
    )(*args)

    pred = slab[:B, :O]
    h1 = slab[:B, OP:OP + H]
    c1 = slab[:B, OP + HP:OP + HP + H]
    attn = attn_p[:B, :t_valid]

    # PyTorch returns output of shape (B, 1, O) (the final squeeze(2) is a no-op when O > 1)
    output = pred[:, None, :]
    new_hidden = (h1[None, :, :], c1[None, :, :])        # each (1, B, H), like nn.LSTM
    return output, new_hidden, attn


def bahdanau_decoder_forward(inputs, hidden, encoder_outputs, params, **kwargs):
    """Convenience single-shot API. For decode loops call prepare_* once and reuse."""
    prepped = prepare_params(params)
    enc_p, T = prepare_encoder(encoder_outputs)
    return bahdanau_decoder_step(inputs, hidden, enc_p, T, prepped, **kwargs)


# ---------------- parameters (deterministic, synthetic) ----------------
def init_params(key, hidden_size, output_size):
    H, O = hidden_size, output_size
    ks = jax.random.split(key, 9)

    def u(k, shape, scale=0.1):
        return jax.random.uniform(k, shape, jnp.float32, -scale, scale)

    return dict(
        fc_hidden_w=u(ks[0], (H, H)),        # nn.Linear(H, H, bias=False)
        fc_encoder_w=u(ks[1], (H, H)),       # nn.Linear(H, H, bias=False)
        attn_v=u(ks[2], (1, H)),             # self.weight
        lstm_w_ih=u(ks[3], (4 * H, H + O)),  # nn.LSTM weight_ih_l0 (input = O + H)
        lstm_w_hh=u(ks[4], (4 * H, H)),      # nn.LSTM weight_hh_l0
        lstm_b_ih=u(ks[5], (4 * H,)),
        lstm_b_hh=u(ks[6], (4 * H,)),
        fc_pred_w=u(ks[7], (O, H)),          # nn.Linear(H, O)
        fc_pred_b=u(ks[8], (O,)),
    )


# ---------------- pure-JAX reference (mirrors the kernel's bf16/f32 math) -----------
def reference_forward(inputs, hidden, enc, params, elementwise_dtype=jnp.float32):
    f32, bf16 = jnp.float32, jnp.bfloat16
    H = params["fc_hidden_w"].shape[0]
    O = params["fc_pred_w"].shape[0]
    h0, c0 = hidden[0][0], hidden[1][0]
    enc_bf = enc.astype(bf16)

    proj_h = jnp.dot(h0.astype(bf16), params["fc_hidden_w"].T.astype(bf16),
                     preferred_element_type=f32)
    proj_e = jnp.einsum("bth,hk->btk", enc_bf, params["fc_encoder_w"].T.astype(bf16),
                        preferred_element_type=f32)
    x = jnp.tanh((proj_h[:, None, :] + proj_e).astype(elementwise_dtype))
    v = params["attn_v"][0].astype(elementwise_dtype)
    scores = jnp.sum((x * v).astype(f32), axis=-1)
    attn = jax.nn.softmax(scores, axis=1)
    context = jnp.einsum("bt,bth->bh", attn.astype(bf16), enc_bf,
                         preferred_element_type=f32)

    lstm_in = jnp.concatenate([inputs, context, h0], axis=1).astype(bf16)
    w_big = jnp.concatenate([params["lstm_w_ih"][:, :O],
                             params["lstm_w_ih"][:, O:],
                             params["lstm_w_hh"]], axis=1).T.astype(bf16)
    gates = (jnp.dot(lstm_in, w_big, preferred_element_type=f32)
             + params["lstm_b_ih"] + params["lstm_b_hh"])
    i_g = jax.nn.sigmoid(gates[:, :H])
    f_g = jax.nn.sigmoid(gates[:, H:2 * H])
    g_g = jnp.tanh(gates[:, 2 * H:3 * H])
    o_g = jax.nn.sigmoid(gates[:, 3 * H:])
    c1 = f_g * c0 + i_g * g_g
    h1 = o_g * jnp.tanh(c1)
    pred = jnp.dot(h1.astype(bf16), params["fc_pred_w"].T.astype(bf16),
                   preferred_element_type=f32) + params["fc_pred_b"]
    return pred[:, None, :], (h1[None], c1[None]), attn


if __name__ == "__main__":
    B, T, H, O = 2, 8, 32, 8
    key = jax.random.PRNGKey(0)
    kp, ki, kh, kc, ke = jax.random.split(key, 5)

    params = init_params(kp, H, O)
    inputs = jax.random.normal(ki, (B, O), jnp.float32)
    h0 = jax.random.normal(kh, (1, B, H), jnp.float32)
    c0 = jax.random.normal(kc, (1, B, H), jnp.float32)
    encoder_outputs = jax.random.normal(ke, (B, T, H), jnp.float32)

    ew = _default_elementwise_dtype()

    # One-time prep (cached across decode steps): weight packing + enc pad/cast.
    prepped = prepare_params(params)
    enc_p, t_valid = prepare_encoder(encoder_outputs)

    out, (h1, c1), attn = bahdanau_decoder_step(
        inputs, (h0, c0), enc_p, t_valid, prepped, elementwise_dtype=ew)
    jax.block_until_ready((out, h1, c1, attn))

    # verify against a plain-JAX reference of the same (bf16-on-MXU) math
    r_out, (r_h1, r_c1), r_attn = reference_forward(
        inputs, (h0, c0), encoder_outputs, params, elementwise_dtype=ew)
    assert out.shape == (B, 1, O) and h1.shape == (1, B, H) and c1.shape == (1, B, H)
    assert attn.shape == (B, T)
    assert jnp.allclose(out, r_out, atol=2e-2), "prediction mismatch"
    assert jnp.allclose(h1, r_h1, atol=2e-2), "h mismatch"
    assert jnp.allclose(c1, r_c1, atol=2e-2), "c mismatch"
    assert jnp.allclose(attn, r_attn, atol=2e-2), "attn mismatch"
    assert jnp.allclose(jnp.sum(attn, axis=1), 1.0, atol=1e-3), "attn not normalized"

    # second decode step reusing the cached prep (intended decode-loop usage)
    out2, hidden2, attn2 = bahdanau_decoder_step(
        out[:, 0, :], (h1, c1), enc_p, t_valid, prepped, elementwise_dtype=ew)
    jax.block_until_ready((out2, attn2))

    print("KERNEL_OK")
</pallas_src>

<mosaic_0001>
module attributes {stable_mosaic.version = 11 : i64} {
  func.func @_bahdanau_kernel(%arg0: i32, %arg1: i32, %arg2: memref<8x128xf32, #tpu.memory_space<vmem>>, %arg3: memref<8x128xf32, #tpu.memory_space<vmem>>, %arg4: memref<8x128xf32, #tpu.memory_space<vmem>>, %arg5: memref<8x128x128xbf16, #tpu.memory_space<vmem>>, %arg6: memref<128x128xbf16, #tpu.memory_space<vmem>>, %arg7: memref<128x128xbf16, #tpu.memory_space<vmem>>, %arg8: memref<1x128xf32, #tpu.memory_space<vmem>>, %arg9: memref<256x512xbf16, #tpu.memory_space<vmem>>, %arg10: memref<128x512xbf16, #tpu.memory_space<vmem>>, %arg11: memref<1x512xf32, #tpu.memory_space<vmem>>, %arg12: memref<128x128xbf16, #tpu.memory_space<vmem>>, %arg13: memref<1x128xf32, #tpu.memory_space<vmem>>, %arg14: memref<8x384xf32, #tpu.memory_space<vmem>>, %arg15: memref<8x128xf32, #tpu.memory_space<vmem>>, %arg16: memref<8x128xf32, #tpu.memory_space<vmem>>, %arg17: memref<8x512xf32, #tpu.memory_space<vmem>>, %arg18: memref<8x1xf32, #tpu.memory_space<vmem>>, %arg19: memref<8x1xf32, #tpu.memory_space<vmem>>, %arg20: memref<8x128xf32, #tpu.memory_space<vmem>>) attributes {dimension_semantics = [#tpu.dimension_semantics<parallel>, #tpu.dimension_semantics<arbitrary>], iteration_bounds = array<i64: 1, 1>, scalar_prefetch = 0 : i64, scratch_operands = 5 : i64, tpu.core_type = #tpu.core_type<tc>, window_params = [{transform_indices = @transform_0, window_bounds = array<i64: 8, 128>}, {transform_indices = @transform_1, window_bounds = array<i64: 8, 128>}, {transform_indices = @transform_2, window_bounds = array<i64: 8, 128>}, {transform_indices = @transform_3, window_bounds = array<i64: 8, 128, 128>}, {pipeline_mode = #tpu.pipeline_mode<synchronous>, transform_indices = @transform_4, window_bounds = array<i64: 128, 128>}, {pipeline_mode = #tpu.pipeline_mode<synchronous>, transform_indices = @transform_5, window_bounds = array<i64: 128, 128>}, {pipeline_mode = #tpu.pipeline_mode<synchronous>, transform_indices = @transform_6, window_bounds = array<i64: 1, 128>}, {pipeline_mode = #tpu.pipeline_mode<synchronous>, transform_indices = @transform_7, window_bounds = array<i64: 256, 512>}, {pipeline_mode = #tpu.pipeline_mode<synchronous>, transform_indices = @transform_8, window_bounds = array<i64: 128, 512>}, {pipeline_mode = #tpu.pipeline_mode<synchronous>, transform_indices = @transform_9, window_bounds = array<i64: 1, 512>}, {pipeline_mode = #tpu.pipeline_mode<synchronous>, transform_indices = @transform_10, window_bounds = array<i64: 128, 128>}, {pipeline_mode = #tpu.pipeline_mode<synchronous>, transform_indices = @transform_11, window_bounds = array<i64: 1, 128>}, {transform_indices = @transform_12, window_bounds = array<i64: 8, 384>}, {transform_indices = @transform_13, window_bounds = array<i64: 8, 128>}]} {
    %c0_i32 = arith.constant 0 : i32
    %0 = arith.cmpi eq, %arg1, %c0_i32 : i32
    %1 = arith.extui %0 : i1 to i32
    %c0_i32_0 = arith.constant 0 : i32
    %2 = arith.cmpi ne, %1, %c0_i32_0 : i32
    scf.if %2 {
      %c0_30 = arith.constant 0 : index
      %c0_31 = arith.constant 0 : index
      %56 = vector.load %arg3[%c0_30, %c0_31] : memref<8x128xf32, #tpu.memory_space<vmem>>, vector<8x128xf32>
      %57 = arith.truncf %56 : vector<8x128xf32> to vector<8x128xbf16>
      %c0_32 = arith.constant 0 : index
      %c0_33 = arith.constant 0 : index
      %58 = vector.load %arg6[%c0_32, %c0_33] : memref<128x128xbf16, #tpu.memory_space<vmem>>, vector<128x128xbf16>
      %cst_34 = arith.constant dense<0.000000e+00> : vector<8x128xf32>
      %59 = tpu.matmul %57, %58, %cst_34 {dimension_numbers = #tpu.dot_dimension_numbers<[1], [0], [0], [1], [0, 0, 1, 1], [], []>} : vector<8x128xbf16>, vector<128x128xbf16>, vector<8x128xf32> -> vector<8x128xf32>
      %c0_35 = arith.constant 0 : index
      %c0_36 = arith.constant 0 : index
      %60 = vector.load %arg16[%c0_35, %c0_36] : memref<8x128xf32, #tpu.memory_space<vmem>>, vector<8x128xf32>
      tpu.vector_store %arg16[%c0_35, %c0_36], %59 {strides = array<i32>} : memref<8x128xf32, #tpu.memory_space<vmem>>, vector<8x128xf32>,
      %c0_37 = arith.constant 0 : index
      %c0_38 = arith.constant 0 : index
      %61 = vector.load %arg2[%c0_37, %c0_38] : memref<8x128xf32, #tpu.memory_space<vmem>>, vector<8x128xf32>
      %62 = tpu.concatenate %61, %56 in 1 : vector<8x128xf32>, vector<8x128xf32> -> vector<8x256xf32>
      %63 = arith.truncf %62 : vector<8x256xf32> to vector<8x256xbf16>
      %c0_39 = arith.constant 0 : index
      %c0_40 = arith.constant 0 : index
      %64 = vector.load %arg9[%c0_39, %c0_40] : memref<256x512xbf16, #tpu.memory_space<vmem>>, vector<256x512xbf16>
      %cst_41 = arith.constant dense<0.000000e+00> : vector<8x512xf32>
      %65 = tpu.matmul %63, %64, %cst_41 {dimension_numbers = #tpu.dot_dimension_numbers<[1], [0], [0], [1], [0, 0, 1, 1], [], []>} : vector<8x256xbf16>, vector<256x512xbf16>, vector<8x512xf32> -> vector<8x512xf32>
      %c0_42 = arith.constant 0 : index
      %c0_43 = arith.constant 0 : index
      %66 = vector.load %arg17[%c0_42, %c0_43] : memref<8x512xf32, #tpu.memory_space<vmem>>, vector<8x512xf32>
      tpu.vector_store %arg17[%c0_42, %c0_43], %65 {strides = array<i32>} : memref<8x512xf32, #tpu.memory_space<vmem>>, vector<8x512xf32>,
      %cst_44 = arith.constant 0xFF800000 : f32
      %67 = vector.broadcast %cst_44 : f32 to vector<8x1xf32>
      %c0_45 = arith.constant 0 : index
      %c0_46 = arith.constant 0 : index
      %68 = vector.load %arg18[%c0_45, %c0_46] : memref<8x1xf32, #tpu.memory_space<vmem>>, vector<8x1xf32>
      tpu.vector_store %arg18[%c0_45, %c0_46], %67 {strides = array<i32>} : memref<8x1xf32, #tpu.memory_space<vmem>>, vector<8x1xf32>,
      %cst_47 = arith.constant 0.000000e+00 : f32
      %69 = vector.broadcast %cst_47 : f32 to vector<8x1xf32>
      %c0_48 = arith.constant 0 : index
      %c0_49 = arith.constant 0 : index
      %70 = vector.load %arg19[%c0_48, %c0_49] : memref<8x1xf32, #tpu.memory_space<vmem>>, vector<8x1xf32>
      tpu.vector_store %arg19[%c0_48, %c0_49], %69 {strides = array<i32>} : memref<8x1xf32, #tpu.memory_space<vmem>>, vector<8x1xf32>,
      %cst_50 = arith.constant 0.000000e+00 : f32
      %71 = vector.broadcast %cst_50 : f32 to vector<8x128xf32>
      %c0_51 = arith.constant 0 : index
      %c0_52 = arith.constant 0 : index
      %72 = vector.load %arg20[%c0_51, %c0_52] : memref<8x128xf32, #tpu.memory_space<vmem>>, vector<8x128xf32>
      tpu.vector_store %arg20[%c0_51, %c0_52], %71 {strides = array<i32>} : memref<8x128xf32, #tpu.memory_space<vmem>>, vector<8x128xf32>,
    } else {
    }
    %c0 = arith.constant 0 : index
    %c0_1 = arith.constant 0 : index
    %c0_2 = arith.constant 0 : index
    %3 = vector.load %arg5[%c0, %c0_1, %c0_2] : memref<8x128x128xbf16, #tpu.memory_space<vmem>>, vector<8x128x128xbf16>
    %c0_3 = arith.constant 0 : index
    %c0_4 = arith.constant 0 : index
    %4 = vector.load %arg7[%c0_3, %c0_4] : memref<128x128xbf16, #tpu.memory_space<vmem>>, vector<128x128xbf16>
    %cst = arith.constant dense<0.000000e+00> : vector<8x128x128xf32>
    %5 = tpu.matmul %3, %4, %cst {dimension_numbers = #tpu.dot_dimension_numbers<[2], [0], [0, 1], [1], [0, 0, 0, 1, 1, 1], [], []>} : vector<8x128x128xbf16>, vector<128x128xbf16>, vector<8x128x128xf32> -> vector<8x128x128xf32>
    %c0_5 = arith.constant 0 : index
    %c0_6 = arith.constant 0 : index
    %6 = vector.load %arg16[%c0_5, %c0_6] : memref<8x128xf32, #tpu.memory_space<vmem>>, vector<8x128xf32>
    %7 = vector.shape_cast %6 : vector<8x128xf32> to vector<8x1x128xf32>
    %8 = vector.broadcast %7 : vector<8x1x128xf32> to vector<8x128x128xf32>
    %9 = arith.addf %8, %5 : vector<8x128x128xf32>
    %10 = math.tanh %9 : vector<8x128x128xf32>
    %c0_7 = arith.constant 0 : index
    %c0_8 = arith.constant 0 : index
    %11 = vector.load %arg8[%c0_7, %c0_8] : memref<1x128xf32, #tpu.memory_space<vmem>>, vector<1x128xf32>
    %12 = vector.shape_cast %11 : vector<1x128xf32> to vector<1x1x128xf32>
    %13 = vector.broadcast %12 : vector<1x1x128xf32> to vector<8x128x128xf32>
    %14 = arith.mulf %10, %13 : vector<8x128x128xf32>
    %cst_9 = arith.constant dense<0.000000e+00> : vector<8x128xf32>
    %15 = vector.multi_reduction <add>, %14, %cst_9 [2] : vector<8x128x128xf32> to vector<8x128xf32>
    %c128_i32 = arith.constant 128 : i32
    %16 = arith.muli %arg1, %c128_i32 : i32
    %17 = tpu.iota {dimensions = array<i32: 1>} : vector<8x128xi32>
    %18 = vector.broadcast %16 : i32 to vector<8x128xi32>
    %19 = arith.addi %18, %17 : vector<8x128xi32>
    %c8_i32 = arith.constant 8 : i32
    %20 = vector.broadcast %c8_i32 : i32 to vector<8x128xi32>
    %21 = arith.cmpi slt, %19, %20 : vector<8x128xi32>
    %cst_10 = arith.constant -1.000000e+30 : f32
    %22 = vector.broadcast %cst_10 : f32 to vector<8x128xf32>
    %23 = arith.select %21, %15, %22 : vector<8x128xi1>, vector<8x128xf32>
    %c128_i32_11 = arith.constant 128 : i32
    %24 = arith.muli %arg1, %c128_i32_11 : i32
    %25 = tpu.assume_multiple %24, 128 : i32
    %c0_12 = arith.constant 0 : index
    %26 = arith.index_cast %25 : i32 to index
    %27 = vector.load %arg15[%c0_12, %26] : memref<8x128xf32, #tpu.memory_space<vmem>>, vector<8x128xf32>
    tpu.vector_store %arg15[%c0_12, %26], %23 {strides = array<i32>} : memref<8x128xf32, #tpu.memory_space<vmem>>, vector<8x128xf32>,
    %c0_13 = arith.constant 0 : index
    %c0_14 = arith.constant 0 : index
    %28 = vector.load %arg18[%c0_13, %c0_14] : memref<8x1xf32, #tpu.memory_space<vmem>>, vector<8x1xf32>
    %cst_15 = arith.constant dense<0xFF800000> : vector<8xf32>
    %29 = vector.multi_reduction <maximumf>, %23, %cst_15 [1] : vector<8x128xf32> to vector<8xf32>
    %30 = vector.shape_cast %29 : vector<8xf32> to vector<8x1xf32>
    %31 = arith.maximumf %28, %30 : vector<8x1xf32>
    %32 = arith.subf %28, %31 : vector<8x1xf32>
    %33 = math.exp %32 : vector<8x1xf32>
    %34 = vector.broadcast %31 : vector<8x1xf32> to vector<8x128xf32>
    %35 = arith.subf %23, %34 : vector<8x128xf32>
    %36 = math.exp %35 : vector<8x128xf32>
    %c0_16 = arith.constant 0 : index
    %c0_17 = arith.constant 0 : index
    %37 = vector.load %arg19[%c0_16, %c0_17] : memref<8x1xf32, #tpu.memory_space<vmem>>, vector<8x1xf32>
    %38 = arith.mulf %33, %37 : vector<8x1xf32>
    %cst_18 = arith.constant dense<0.000000e+00> : vector<8xf32>
    %39 = vector.multi_reduction <add>, %36, %cst_18 [1] : vector<8x128xf32> to vector<8xf32>
    %40 = vector.shape_cast %39 : vector<8xf32> to vector<8x1xf32>
    %41 = arith.addf %38, %40 : vector<8x1xf32>
    %c0_19 = arith.constant 0 : index
    %c0_20 = arith.constant 0 : index
    %42 = vector.load %arg19[%c0_19, %c0_20] : memref<8x1xf32, #tpu.memory_space<vmem>>, vector<8x1xf32>
    tpu.vector_store %arg19[%c0_19, %c0_20], %41 {strides = array<i32>} : memref<8x1xf32, #tpu.memory_space<vmem>>, vector<8x1xf32>,
    %43 = arith.truncf %36 : vector<8x128xf32> to vector<8x128xbf16>
    %44 = vector.shape_cast %43 : vector<8x128xbf16> to vector<8x1x128xbf16>
    "tpu.trace_start"() <{level = 10 : i32, message = "bqt,bth->bqh"}> : () -> ()
    %cst_21 = arith.constant dense<0.000000e+00> : vector<8x1x128xf32>
    %45 = tpu.matmul %44, %3, %cst_21 {dimension_numbers = #tpu.dot_dimension_numbers<[2], [1], [1], [2], [0, 0, 0, 1, 1, 2], [0], [0]>} : vector<8x1x128xbf16>, vector<8x128x128xbf16>, vector<8x1x128xf32> -> vector<8x1x128xf32>
    "tpu.trace_stop"() : () -> ()
    %46 = vector.shape_cast %45 : vector<8x1x128xf32> to vector<8x128xf32>
    %c0_22 = arith.constant 0 : index
    %c0_23 = arith.constant 0 : index
    %47 = vector.load %arg20[%c0_22, %c0_23] : memref<8x128xf32, #tpu.memory_space<vmem>>, vector<8x128xf32>
    %48 = vector.broadcast %33 : vector<8x1xf32> to vector<8x128xf32>
    %49 = arith.mulf %48, %47 : vector<8x128xf32>
    %50 = arith.addf %49, %46 : vector<8x128xf32>
    %c0_24 = arith.constant 0 : index
    %c0_25 = arith.constant 0 : index
    %51 = vector.load %arg20[%c0_24, %c0_25] : memref<8x128xf32, #tpu.memory_space<vmem>>, vector<8x128xf32>
    tpu.vector_store %arg20[%c0_24, %c0_25], %50 {strides = array<i32>} : memref<8x128xf32, #tpu.memory_space<vmem>>, vector<8x128xf32>,
    %c0_26 = arith.constant 0 : index
    %c0_27 = arith.constant 0 : index
    %52 = vector.load %arg18[%c0_26, %c0_27] : memref<8x1xf32, #tpu.memory_space<vmem>>, vector<8x1xf32>
    tpu.vector_store %arg18[%c0_26, %c0_27], %31 {strides = array<i32>} : memref<8x1xf32, #tpu.memory_space<vmem>>, vector<8x1xf32>,
    %c0_i32_28 = arith.constant 0 : i32
    %53 = arith.cmpi eq, %arg1, %c0_i32_28 : i32
    %54 = arith.extui %53 : i1 to i32
    %c0_i32_29 = arith.constant 0 : i32
    %55 = arith.cmpi ne, %54, %c0_i32_29 : i32
    scf.if %55 {
      %c0_30 = arith.constant 0 : index
      %c0_31 = arith.constant 0 : index
      %56 = vector.load %arg19[%c0_30, %c0_31] : memref<8x1xf32, #tpu.memory_space<vmem>>, vector<8x1xf32>
      %cst_32 = arith.constant 1.000000e+00 : f32
      %57 = vector.broadcast %cst_32 : f32 to vector<8x1xf32>
      %58 = arith.divf %57, %56 : vector<8x1xf32>
      %c0_33 = arith.constant 0 : index
      %c0_34 = arith.constant 0 : index
      %59 = vector.load %arg15[%c0_33, %c0_34] : memref<8x128xf32, #tpu.memory_space<vmem>>, vector<8x128xf32>
      %c0_35 = arith.constant 0 : index
      %c0_36 = arith.constant 0 : index
      %60 = vector.load %arg18[%c0_35, %c0_36] : memref<8x1xf32, #tpu.memory_space<vmem>>, vector<8x1xf32>
      %61 = vector.broadcast %60 : vector<8x1xf32> to vector<8x128xf32>
      %62 = arith.subf %59, %61 : vector<8x128xf32>
      %63 = math.exp %62 : vector<8x128xf32>
      %64 = vector.broadcast %58 : vector<8x1xf32> to vector<8x128xf32>
      %65 = arith.mulf %63, %64 : vector<8x128xf32>
      %c0_37 = arith.constant 0 : index
      %c0_38 = arith.constant 0 : index
      %66 = vector.load %arg15[%c0_37, %c0_38] : memref<8x128xf32, #tpu.memory_space<vmem>>, vector<8x128xf32>
      tpu.vector_store %arg15[%c0_37, %c0_38], %65 {strides = array<i32>} : memref<8x128xf32, #tpu.memory_space<vmem>>, vector<8x128xf32>,
      %c0_39 = arith.constant 0 : index
      %c0_40 = arith.constant 0 : index
      %67 = vector.load %arg20[%c0_39, %c0_40] : memref<8x128xf32, #tpu.memory_space<vmem>>, vector<8x128xf32>
      %68 = vector.broadcast %58 : vector<8x1xf32> to vector<8x128xf32>
      %69 = arith.mulf %67, %68 : vector<8x128xf32>
      %c0_41 = arith.constant 0 : index
      %c0_42 = arith.constant 0 : index
      %70 = vector.load %arg17[%c0_41, %c0_42] : memref<8x512xf32, #tpu.memory_space<vmem>>, vector<8x512xf32>
      %71 = arith.truncf %69 : vector<8x128xf32> to vector<8x128xbf16>
      %c0_43 = arith.constant 0 : index
      %c0_44 = arith.constant 0 : index
      %72 = vector.load %arg10[%c0_43, %c0_44] : memref<128x512xbf16, #tpu.memory_space<vmem>>, vector<128x512xbf16>
      %cst_45 = arith.constant dense<0.000000e+00> : vector<8x512xf32>
      %73 = tpu.matmul %71, %72, %cst_45 {dimension_numbers = #tpu.dot_dimension_numbers<[1], [0], [0], [1], [0, 0, 1, 1], [], []>} : vector<8x128xbf16>, vector<128x512xbf16>, vector<8x512xf32> -> vector<8x512xf32>
      %74 = arith.addf %70, %73 : vector<8x512xf32>
      %c0_46 = arith.constant 0 : index
      %c0_47 = arith.constant 0 : index
      %75 = vector.load %arg11[%c0_46, %c0_47] : memref<1x512xf32, #tpu.memory_space<vmem>>, vector<1x512xf32>
      %76 = vector.broadcast %75 : vector<1x512xf32> to vector<8x512xf32>
      %77 = arith.addf %74, %76 : vector<8x512xf32>
      %78 = vector.extract_strided_slice %77 {offsets = [0, 0], sizes = [8, 128], strides = [1, 1]} : vector<8x512xf32> to vector<8x128xf32>
      %79 = arith.negf %78 : vector<8x128xf32>
      %80 = math.exp %79 : vector<8x128xf32>
      %cst_48 = arith.constant 1.000000e+00 : f32
      %81 = vector.broadcast %cst_48 : f32 to vector<8x128xf32>
      %82 = arith.addf %81, %80 : vector<8x128xf32>
      %83 = arith.divf %81, %82 : vector<8x128xf32>
      %84 = vector.extract_strided_slice %77 {offsets = [0, 128], sizes = [8, 128], strides = [1, 1]} : vector<8x512xf32> to vector<8x128xf32>
      %85 = arith.negf %84 : vector<8x128xf32>
      %86 = math.exp %85 : vector<8x128xf32>
      %cst_49 = arith.constant 1.000000e+00 : f32
      %87 = vector.broadcast %cst_49 : f32 to vector<8x128xf32>
      %88 = arith.addf %87, %86 : vector<8x128xf32>
      %89 = arith.divf %87, %88 : vector<8x128xf32>
      %90 = vector.extract_strided_slice %77 {offsets = [0, 256], sizes = [8, 128], strides = [1, 1]} : vector<8x512xf32> to vector<8x128xf32>
      %91 = math.tanh %90 : vector<8x128xf32>
      %92 = vector.extract_strided_slice %77 {offsets = [0, 384], sizes = [8, 128], strides = [1, 1]} : vector<8x512xf32> to vector<8x128xf32>
      %93 = arith.negf %92 : vector<8x128xf32>
      %94 = math.exp %93 : vector<8x128xf32>
      %cst_50 = arith.constant 1.000000e+00 : f32
      %95 = vector.broadcast %cst_50 : f32 to vector<8x128xf32>
      %96 = arith.addf %95, %94 : vector<8x128xf32>
      %97 = arith.divf %95, %96 : vector<8x128xf32>
      %c0_51 = arith.constant 0 : index
      %c0_52 = arith.constant 0 : index
      %98 = vector.load %arg4[%c0_51, %c0_52] : memref<8x128xf32, #tpu.memory_space<vmem>>, vector<8x128xf32>
      %99 = arith.mulf %89, %98 : vector<8x128xf32>
      %100 = arith.mulf %83, %91 : vector<8x128xf32>
      %101 = arith.addf %99, %100 : vector<8x128xf32>
      %102 = math.tanh %101 : vector<8x128xf32>
      %103 = arith.mulf %97, %102 : vector<8x128xf32>
      %104 = arith.truncf %103 : vector<8x128xf32> to vector<8x128xbf16>
      %c0_53 = arith.constant 0 : index
      %c0_54 = arith.constant 0 : index
      %105 = vector.load %arg12[%c0_53, %c0_54] : memref<128x128xbf16, #tpu.memory_space<vmem>>, vector<128x128xbf16>
      %cst_55 = arith.constant dense<0.000000e+00> : vector<8x128xf32>
      %106 = tpu.matmul %104, %105, %cst_55 {dimension_numbers = #tpu.dot_dimension_numbers<[1], [0], [0], [1], [0, 0, 1, 1], [], []>} : vector<8x128xbf16>, vector<128x128xbf16>, vector<8x128xf32> -> vector<8x128xf32>
      %c0_56 = arith.constant 0 : index
      %c0_57 = arith.constant 0 : index
      %107 = vector.load %arg13[%c0_56, %c0_57] : memref<1x128xf32, #tpu.memory_space<vmem>>, vector<1x128xf32>
      %108 = vector.broadcast %107 : vector<1x128xf32> to vector<8x128xf32>
      %109 = arith.addf %106, %108 : vector<8x128xf32>
      %c0_58 = arith.constant 0 : index
      %c0_59 = arith.constant 0 : index
      %110 = vector.load %arg14[%c0_58, %c0_59] : memref<8x384xf32, #tpu.memory_space<vmem>>, vector<8x128xf32>
      tpu.vector_store %arg14[%c0_58, %c0_59], %109 {strides = array<i32>} : memref<8x384xf32, #tpu.memory_space<vmem>>, vector<8x128xf32>,
      %c0_60 = arith.constant 0 : index
      %c128 = arith.constant 128 : index
      %111 = vector.load %arg14[%c0_60, %c128] : memref<8x384xf32, #tpu.memory_space<vmem>>, vector<8x128xf32>
      tpu.vector_store %arg14[%c0_60, %c128], %103 {strides = array<i32>} : memref<8x384xf32, #tpu.memory_space<vmem>>, vector<8x128xf32>,
      %c0_61 = arith.constant 0 : index
      %c256 = arith.constant 256 : index
      %112 = vector.load %arg14[%c0_61, %c256] : memref<8x384xf32, #tpu.memory_space<vmem>>, vector<8x128xf32>
      tpu.vector_store %arg14[%c0_61, %c256], %101 {strides = array<i32>} : memref<8x384xf32, #tpu.memory_space<vmem>>, vector<8x128xf32>,
    } else {
    }
    return
  }
  func.func @transform_0(%arg0: i32, %arg1: i32) -> (i32, i32) {
    %c0_i32 = arith.constant 0 : i32
    %c0_i32_0 = arith.constant 0 : i32
    return %arg0, %c0_i32 : i32, i32
  }
  func.func @transform_1(%arg0: i32, %arg1: i32) -> (i32, i32) {
    %c0_i32 = arith.constant 0 : i32
    %c0_i32_0 = arith.constant 0 : i32
    return %arg0, %c0_i32 : i32, i32
  }
  func.func @transform_2(%arg0: i32, %arg1: i32) -> (i32, i32) {
    %c0_i32 = arith.constant 0 : i32
    %c0_i32_0 = arith.constant 0 : i32
    return %arg0, %c0_i32 : i32, i32
  }
  func.func @transform_3(%arg0: i32, %arg1: i32) -> (i32, i32, i32) {
    %c0_i32 = arith.constant 0 : i32
    %c0_i32_0 = arith.constant 0 : i32
    return %arg0, %arg1, %c0_i32 : i32, i32, i32
  }
  func.func @transform_4(%arg0: i32, %arg1: i32) -> (i32, i32) {
    %c0_i32 = arith.constant 0 : i32
    %c0_i32_0 = arith.constant 0 : i32
    %c0_i32_1 = arith.constant 0 : i32
    return %c0_i32, %c0_i32_0 : i32, i32
  }
  func.func @transform_5(%arg0: i32, %arg1: i32) -> (i32, i32) {
    %c0_i32 = arith.constant 0 : i32
    %c0_i32_0 = arith.constant 0 : i32
    %c0_i32_1 = arith.constant 0 : i32
    return %c0_i32, %c0_i32_0 : i32, i32
  }
  func.func @transform_6(%arg0: i32, %arg1: i32) -> (i32, i32) {
    %c0_i32 = arith.constant 0 : i32
    %c0_i32_0 = arith.constant 0 : i32
    %c0_i32_1 = arith.constant 0 : i32
    return %c0_i32, %c0_i32_0 : i32, i32
  }
  func.func @transform_7(%arg0: i32, %arg1: i32) -> (i32, i32) {
    %c0_i32 = arith.constant 0 : i32
    %c0_i32_0 = arith.constant 0 : i32
    %c0_i32_1 = arith.constant 0 : i32
    return %c0_i32, %c0_i32_0 : i32, i32
  }
  func.func @transform_8(%arg0: i32, %arg1: i32) -> (i32, i32) {
    %c0_i32 = arith.constant 0 : i32
    %c0_i32_0 = arith.constant 0 : i32
    %c0_i32_1 = arith.constant 0 : i32
    return %c0_i32, %c0_i32_0 : i32, i32
  }
  func.func @transform_9(%arg0: i32, %arg1: i32) -> (i32, i32) {
    %c0_i32 = arith.constant 0 : i32
    %c0_i32_0 = arith.constant 0 : i32
    %c0_i32_1 = arith.constant 0 : i32
    return %c0_i32, %c0_i32_0 : i32, i32
  }
  func.func @transform_10(%arg0: i32, %arg1: i32) -> (i32, i32) {
    %c0_i32 = arith.constant 0 : i32
    %c0_i32_0 = arith.constant 0 : i32
    %c0_i32_1 = arith.constant 0 : i32
    return %c0_i32, %c0_i32_0 : i32, i32
  }
  func.func @transform_11(%arg0: i32, %arg1: i32) -> (i32, i32) {
    %c0_i32 = arith.constant 0 : i32
    %c0_i32_0 = arith.constant 0 : i32
    %c0_i32_1 = arith.constant 0 : i32
    return %c0_i32, %c0_i32_0 : i32, i32
  }
  func.func @transform_12(%arg0: i32, %arg1: i32) -> (i32, i32) {
    %c0_i32 = arith.constant 0 : i32
    %c0_i32_0 = arith.constant 0 : i32
    return %arg0, %c0_i32 : i32, i32
  }
  func.func @transform_13(%arg0: i32, %arg1: i32) -> (i32, i32) {
    %c0_i32 = arith.constant 0 : i32
    %c0_i32_0 = arith.constant 0 : i32
    return %arg0, %c0_i32 : i32, i32
  }
}

</mosaic_0001>

<bundles_post_ra>
// kernel: tpu_custom_call.1
= control target key start
LH: loop header
LB: loop body
LE: loop exit
PB: predicated region body
PF: predicated region fallthrough
CT: control target
= control target key end

     0   :  { %19 = vsyncpa [#allocation8], 0  ;;  %s7191_s0 = inlined_call_operand.hbm [shape: f32[8,128], index: 0, kind: input, shape index: {}]   ;;  %s7192_s1 = inlined_call_operand.hbm [shape: f32[8,128], index: 1, kind: input, shape index: {}]   ;;  %s7193_s2 = inlined_call_operand.hbm [shape: f32[8,128], index: 2, kind: input, shape index: {}]   ;;  %s7194_s3 = inlined_call_operand.hbm [shape: bf16[8,128,128], index: 3, kind: input, shape index: {}]   ;;  %s7195_s4 = inlined_call_operand.hbm [shape: bf16[128,128], index: 4, kind: input, shape index: {}]   ;;  %s7196_s5 = inlined_call_operand.hbm [shape: bf16[128,128], index: 5, kind: input, shape index: {}]   ;;  %s7197_s6 = inlined_call_operand.vmem [shape: f32[1,128], index: 6, kind: input, shape index: {}]   ;;  %s7198_s7 = inlined_call_operand.hbm [shape: bf16[256,512], index: 7, kind: input, shape index: {}]   ;;  %s7199_s8 = inlined_call_operand.hbm [shape: bf16[128,512], index: 8, kind: input, shape index: {}]   ;;  %s7200_s9 = inlined_call_operand.vmem [shape: f32[1,512], index: 9, kind: input, shape index: {}]   ;;  %s7201_s10 = inlined_call_operand.hbm [shape: bf16[128,128], index: 10, kind: input, shape index: {}]   ;;  %s7202_s11 = inlined_call_operand.vmem [shape: f32[1,128], index: 11, kind: input, shape index: {}]   ;;  %s7203_s12 = inlined_call_operand.hbm [shape: f32[8,384], index: 12, kind: output, shape index: {0}]   ;;  %s7204_s13 = inlined_call_operand.hbm [shape: f32[8,128], index: 13, kind: output, shape index: {1}]  }
   0x1   :  { %20 = vsyncpa [#allocation11], 0 }
   0x2   :  { %21 = vsyncpa [#allocation14], 0 }
   0x3   :  { %22 = vsyncpa [#allocation17], 0 }
   0x4   :  { %23 = vsyncpa [#allocation20], 0 }
   0x5   :  { %24 = vsyncpa [#allocation9], 0 }
   0x6   :  { %25 = vsyncpa [#allocation24], 0  ;;  %s5943_s25 = smov [#allocation10]   ;;  %s5944_s27 = smov [#allocation13]  }
   0x7   :  { %s42_s26 = sshll.u32 %s5943_s25, 4  ;;  %s61_s28 = sshll.u32 %s5944_s27, 4  ;;  %s43_s26 = int_to_ptr.vmem [resolvable:$true] %s42_s26  ;;  %s6033_s28 = int_to_ptr.vmem [resolvable:$true] %s61_s28 }
   0x8   :  { %s5687_s14 = scalar_lea.hbm %s7192_s1, 128 }
   0x9   :  { %p5688_p0 = scmp.ne.s32.totalorder %s7192_s1, %s5687_s14  ;;  %p5691_p1 = scmp.lt.u32.totalorder %s5687_s14, %s7192_s1 }
   0xb   :  { %p5693_p2 = pnand %p5691_p1, %p5688_p0 }
   0xd   :  { %5696 = shalt.err (!%p5693_p2)
}
   0xe   :  { %s5697_s19 = scalar_lea.vmem %s43_s26, 128  ;;  %p5702_p4 = scmp.lt.s32.totalorder %s43_s26, %s43_s26 }
   0xf   :  { %p5698_p3 = scmp.ne.s32.totalorder %s43_s26, %s5697_s19  ;;  %p5703_p5 = scmp.lt.s32.totalorder %s5697_s19, %s5697_s19 }
  0x11   :  { %p5704_p6 = por %p5703_p5, %p5702_p4 }
  0x13   :  { %p5705_p7 = pnand %p5704_p6, %p5698_p3 }
  0x15   :  { %5708 = shalt.err (!%p5705_p7)
}
  0x16   :  { %45 = dma.hbm_to_vmem [thread:$0]  %s7192_s1, 128, %s43_s26, [#allocation11]  }
  0x17   :  { %s5709_s24 = scalar_lea.hbm %s7194_s3, 8192 }
  0x18   :  { %p5710_p8 = scmp.ne.s32.totalorder %s7194_s3, %s5709_s24  ;;  %p5713_p9 = scmp.lt.u32.totalorder %s5709_s24, %s7194_s3 }
  0x1a   :  { %p5715_p10 = pnand %p5713_p9, %p5710_p8 }
  0x1c   :  { %5718 = shalt.err (!%p5715_p10)
}
  0x1d   :  { %s5719_s14 = scalar_lea.vmem %s6033_s28, 8192  ;;  %p5724_p12 = scmp.lt.s32.totalorder %s6033_s28, %s6033_s28 }
  0x1e   :  { %p5720_p11 = scmp.ne.s32.totalorder %s6033_s28, %s5719_s14  ;;  %p5725_p13 = scmp.lt.s32.totalorder %s5719_s14, %s5719_s14 }
  0x20   :  { %p5726_p0 = por %p5725_p13, %p5724_p12 }
  0x22   :  { %p5727_p1 = pnand %p5726_p0, %p5720_p11 }
  0x24   :  { %5730 = shalt.err (!%p5727_p1)
}
  0x25   :  { %s5945_s1 = smov 64   ;;  %s5946_s26 = smov 4  }
  0x26   :  { %67 = dma.hbm_to_vmem [thread:$0]  %s7194_s3, 8192, %s6033_s28, [#allocation14], %s5945_s1, %s5945_s1, %s5946_s26  }
  0x27   :  { %s5947_s17 = smov [#allocation16]   ;;  %s5731_s21 = scalar_lea.hbm %s7196_s5, 1024 }
  0x28   :  { %s85_s18 = sshll.u32 %s5947_s17, 4  ;;  %p5732_p2 = scmp.ne.s32.totalorder %s7196_s5, %s5731_s21  ;;  %s86_s18 = int_to_ptr.vmem [resolvable:$true] %s85_s18 }
  0x29   :  { %p5735_p3 = scmp.lt.u32.totalorder %s5731_s21, %s7196_s5 }
  0x2b   :  { %p5737_p4 = pnand %p5735_p3, %p5732_p2 }
  0x2d   :  { %5740 = shalt.err (!%p5737_p4)
}
  0x2e   :  { %s5741_s27 = scalar_lea.vmem %s86_s18, 1024  ;;  %p5746_p6 = scmp.lt.s32.totalorder %s86_s18, %s86_s18 }
  0x2f   :  { %p5742_p5 = scmp.ne.s32.totalorder %s86_s18, %s5741_s27  ;;  %p5747_p7 = scmp.lt.s32.totalorder %s5741_s27, %s5741_s27 }
  0x31   :  { %p5748_p8 = por %p5747_p7, %p5746_p6 }
  0x33   :  { %p5749_p9 = pnand %p5748_p8, %p5742_p5 }
  0x35   :  { %5752 = shalt.err (!%p5749_p9)
}
  0x36   :  { %91 = dma.hbm_to_vmem [thread:$0]  %s7196_s5, 1024, %s86_s18, [#allocation17], %s5945_s1, %s5945_s1, %s5946_s26  }
  0x37   :  { %s5948_s29 = smov [#allocation19]   ;;  %s5949_s14 = smov [#allocation7]  }
  0x38   :  { %s111_s30 = sshll.u32 %s5948_s29, 4  ;;  %s32_s15 = sshll.u32 %s5949_s14, 4  ;;  %s112_s30 = int_to_ptr.vmem [resolvable:$true] %s111_s30  ;;  %s33_s15 = int_to_ptr.vmem [resolvable:$true] %s32_s15 }
  0x39   :  { %s5753_s19 = scalar_lea.hbm %s7199_s8, 4096 }
  0x3a   :  { %p5754_p10 = scmp.ne.s32.totalorder %s7199_s8, %s5753_s19  ;;  %p5757_p11 = scmp.lt.u32.totalorder %s5753_s19, %s7199_s8 }
  0x3c   :  { %p5759_p12 = pnand %p5757_p11, %p5754_p10 }
  0x3e   :  { %5762 = shalt.err (!%p5759_p12)
}
  0x3f   :  { %s5763_s5 = scalar_lea.vmem %s112_s30, 4096  ;;  %p5768_p0 = scmp.lt.s32.totalorder %s112_s30, %s112_s30 }
  0x40   :  { %p5764_p13 = scmp.ne.s32.totalorder %s112_s30, %s5763_s5  ;;  %p5769_p1 = scmp.lt.s32.totalorder %s5763_s5, %s5763_s5 }
  0x42   :  { %p5770_p2 = por %p5769_p1, %p5768_p0 }
  0x44   :  { %p5771_p3 = pnand %p5770_p2, %p5764_p13 }
  0x46   :  { %5774 = shalt.err (!%p5771_p3)
}
  0x47   :  { %s5950_s18 = smov 256   ;;  %s5951_s24 = smov 16  }
  0x48   :  { %117 = dma.hbm_to_vmem [thread:$0]  %s7199_s8, 4096, %s112_s30, [#allocation20], %s5950_s18, %s5950_s18, %s5951_s24  }
  0x49   :  { %s5775_s29 = scalar_lea.hbm %s7191_s0, 128 }
  0x4a   :  { %p5776_p4 = scmp.ne.s32.totalorder %s7191_s0, %s5775_s29  ;;  %p5779_p5 = scmp.lt.u32.totalorder %s5775_s29, %s7191_s0 }
  0x4c   :  { %p5781_p6 = pnand %p5779_p5, %p5776_p4 }
  0x4e   :  { %5784 = shalt.err (!%p5781_p6)
}
  0x4f   :  { %s5785_s20 = scalar_lea.vmem %s33_s15, 128  ;;  %p5790_p8 = scmp.lt.s32.totalorder %s33_s15, %s33_s15 }
  0x50   :  { %p5786_p7 = scmp.ne.s32.totalorder %s33_s15, %s5785_s20  ;;  %p5791_p9 = scmp.lt.s32.totalorder %s5785_s20, %s5785_s20 }
  0x52   :  { %p5792_p10 = por %p5791_p9, %p5790_p8 }
  0x54   :  { %p5793_p11 = pnand %p5792_p10, %p5786_p7 }
  0x56   :  { %5796 = shalt.err (!%p5793_p11)
}
  0x57   :  { %35 = dma.hbm_to_vmem [thread:$0]  %s7191_s0, 128, %s33_s15, [#allocation8]  }
  0x58   :  { %s5952_s21 = smov [#allocation12]   ;;  %s5953_s23 = smov [#allocation15]  }
  0x59   :  { %s52_s22 = sshll.u32 %s5952_s21, 4  ;;  %s73_s5 = sshll.u32 %s5953_s23, 4  ;;  %s53_s22 = int_to_ptr.vmem [resolvable:$true] %s52_s22  ;;  %s74_s5 = int_to_ptr.vmem [resolvable:$true] %s73_s5 }
  0x5a   :  { %s5797_s3 = scalar_lea.hbm %s7193_s2, 128 }
  0x5b   :  { %p5798_p12 = scmp.ne.s32.totalorder %s7193_s2, %s5797_s3  ;;  %p5801_p13 = scmp.lt.u32.totalorder %s5797_s3, %s7193_s2 }
  0x5d   :  { %p5803_p0 = pnand %p5801_p13, %p5798_p12 }
  0x5f   :  { %5806 = shalt.err (!%p5803_p0)
}
  0x60   :  { %s5807_s0 = scalar_lea.vmem %s53_s22, 128  ;;  %p5812_p2 = scmp.lt.s32.totalorder %s53_s22, %s53_s22 }
  0x61   :  { %p5808_p1 = scmp.ne.s32.totalorder %s53_s22, %s5807_s0  ;;  %p5813_p3 = scmp.lt.s32.totalorder %s5807_s0, %s5807_s0 }
  0x63   :  { %p5814_p4 = por %p5813_p3, %p5812_p2 }
  0x65   :  { %p5815_p5 = pnand %p5814_p4, %p5808_p1 }
  0x67   :  { %5818 = shalt.err (!%p5815_p5)
}
  0x68   :  { %55 = dma.hbm_to_vmem [thread:$0]  %s7193_s2, 128, %s53_s22, [#allocation11]  }
  0x69   :  { %s5819_s8 = scalar_lea.hbm %s7195_s4, 1024 }
  0x6a   :  { %p5820_p6 = scmp.ne.s32.totalorder %s7195_s4, %s5819_s8  ;;  %p5823_p7 = scmp.lt.u32.totalorder %s5819_s8, %s7195_s4 }
  0x6c   :  { %p5825_p8 = pnand %p5823_p7, %p5820_p6 }
  0x6e   :  { %5828 = shalt.err (!%p5825_p8)
}
  0x6f   :  { %s5829_s27 = scalar_lea.vmem %s74_s5, 1024  ;;  %p5834_p10 = scmp.lt.s32.totalorder %s74_s5, %s74_s5 }
  0x70   :  { %p5830_p9 = scmp.ne.s32.totalorder %s74_s5, %s5829_s27  ;;  %p5835_p11 = scmp.lt.s32.totalorder %s5829_s27, %s5829_s27 }
  0x72   :  { %p5836_p12 = por %p5835_p11, %p5834_p10 }
  0x74   :  { %p5837_p13 = pnand %p5836_p12, %p5830_p9 }
  0x76   :  { %5840 = shalt.err (!%p5837_p13)
}
  0x77   :  { %79 = dma.hbm_to_vmem [thread:$0]  %s7195_s4, 1024, %s74_s5, [#allocation14], %s5945_s1, %s5945_s1, %s5946_s26  }
  0x78   :  { %s5954_s3 = smov [#allocation18]   ;;  %s5955_s29 = smov [#allocation21]  }
  0x79   :  { %s99_s28 = sshll.u32 %s5954_s3, 4  ;;  %s125_s14 = sshll.u32 %s5955_s29, 4  ;;  %s100_s28 = int_to_ptr.vmem [resolvable:$true] %s99_s28  ;;  %s126_s14 = int_to_ptr.vmem [resolvable:$true] %s125_s14 }
  0x7a   :  { %s5841_s15 = scalar_lea.hbm %s7198_s7, 8192 }
  0x7b   :  { %p5842_p0 = scmp.ne.s32.totalorder %s7198_s7, %s5841_s15  ;;  %p5845_p1 = scmp.lt.u32.totalorder %s5841_s15, %s7198_s7 }
  0x7d   :  { %p5847_p2 = pnand %p5845_p1, %p5842_p0 }
  0x7f   :  { %5850 = shalt.err (!%p5847_p2)
}
  0x80   :  { %s5851_s4 = scalar_lea.vmem %s100_s28, 8192  ;;  %p5856_p4 = scmp.lt.s32.totalorder %s100_s28, %s100_s28 }
  0x81   :  { %p5852_p3 = scmp.ne.s32.totalorder %s100_s28, %s5851_s4  ;;  %p5857_p5 = scmp.lt.s32.totalorder %s5851_s4, %s5851_s4 }
  0x83   :  { %p5858_p6 = por %p5857_p5, %p5856_p4 }
  0x85   :  { %p5859_p7 = pnand %p5858_p6, %p5852_p3 }
  0x87   :  { %5862 = shalt.err (!%p5859_p7)
}
  0x88   :  { %105 = dma.hbm_to_vmem [thread:$0]  %s7198_s7, 8192, %s100_s28, [#allocation17], %s5950_s18, %s5950_s18, %s5951_s24  }
  0x89   :  { %s5863_s25 = scalar_lea.hbm %s7201_s10, 1024 }
  0x8a   :  { %p5864_p8 = scmp.ne.s32.totalorder %s7201_s10, %s5863_s25  ;;  %p5867_p9 = scmp.lt.u32.totalorder %s5863_s25, %s7201_s10 }
  0x8c   :  { %p5869_p10 = pnand %p5867_p9, %p5864_p8 }
  0x8e   :  { %5872 = shalt.err (!%p5869_p10)
}
  0x8f   :  { %s5873_s29 = scalar_lea.vmem %s126_s14, 1024  ;;  %p5878_p12 = scmp.lt.s32.totalorder %s126_s14, %s126_s14 }
  0x90   :  { %p5874_p11 = scmp.ne.s32.totalorder %s126_s14, %s5873_s29  ;;  %p5879_p13 = scmp.lt.s32.totalorder %s5873_s29, %s5873_s29 }
  0x92   :  { %p5880_p0 = por %p5879_p13, %p5878_p12 }
  0x94   :  { %p5881_p1 = pnand %p5880_p0, %p5874_p11 }
  0x96   :  { %5884 = shalt.err (!%p5881_p1)
}
  0x97   :  { %131 = dma.hbm_to_vmem [thread:$0]  %s7201_s10, 1024, %s126_s14, [#allocation20], %s5945_s1, %s5945_s1, %s5946_s26  }
  0x98   :  { %5929 = dma.done.wait [#allocation8], 128  }
  0x99   :  { %5930 = vsyncadd [#allocation8], 4294967168 }
  0x9a   :  { %5931 = dma.done.wait [#allocation11], 256  }
  0x9b   :  { %5932 = vsyncadd [#allocation11], 4294967040 }
  0x9c   :  { %5933 = dma.done.wait [#allocation14], 9216  }
  0x9d   :  { %5934 = vsyncadd [#allocation14], 4294958080 }
  0x9e   :  { %5935 = dma.done.wait [#allocation17], 9216  }
  0x9f   :  { %5936 = vsyncadd [#allocation17], 4294958080 }
  0xa0   :  { %5937 = dma.done.wait [#allocation20], 5120  }
  0xa1   :  { %5938 = vsyncadd [#allocation20], 4294962176  ;;  %v5956_v0 = vmov 0.0   ;;  %vm7205_vm0 = vmmov 0   ;;  %v5110_v1 = vld [vmem:[#allocation18 + $0x4] ss:$16 sps:$4 sm:$0xff]  }
  0xa2   :  { %4744 = vmatprep.subr.bf16.mxu0 %v5956_v0  ;;  %4760 = vmatprep.mubr.msk.bf16.mxu0 %vm7205_vm0, %v5956_v0  ;;  %v5112_v2 = vld [vmem:[#allocation18] ss:$16 sps:$4 sm:$0xff]   ;;  %v5113_v3 = vld [vmem:[#allocation18 + $0x24] ss:$16 sps:$4 sm:$0xff]   ;;  %v5159_v16 = vld [vmem:[#allocation15 + $0x8] sm:$0xff]   ;;  %vm2751_vm1 = vcmask 130112  }
  0xa3   :  { %659 = vmatprep.subr.bf16.mxu1 %v5110_v1  ;;  %v5115_v4 = vld [vmem:[#allocation18 + $0x20] ss:$16 sps:$4 sm:$0xff]   ;;  %v5116_v5 = vld [vmem:[#allocation18 + $0x44] ss:$16 sps:$4 sm:$0xff]   ;;  %v5163_v23 = vld [vmem:[#allocation15 + $0x18] sm:$0xff]   ;;  %vm2758_vm2 = vcmask 195712  }
  0xa4   :  { %660 = vmatpush1.bf16.msra.mxu1 %v5112_v2  ;;  %v5118_v6 = vld [vmem:[#allocation18 + $0x40] ss:$16 sps:$4 sm:$0xff]   ;;  %v5119_v7 = vld [vmem:[#allocation18 + $0x64] ss:$16 sps:$4 sm:$0xff]   ;;  %v5167_v29 = vld [vmem:[#allocation15 + $0x28] sm:$0xff]   ;;  %vm2765_vm3 = vcmask 261312  }
  0xa5   :  { %661 = vmatprep.subr.bf16.mxu1 %v5113_v3  ;;  %v5121_v8 = vld [vmem:[#allocation18 + $0x60] ss:$16 sps:$4 sm:$0xff]   ;;  %v5122_v9 = vld [vmem:[#allocation18 + $0x84] ss:$16 sps:$4 sm:$0xff]   ;;  %v5171_v35 = vld [vmem:[#allocation15 + $0x38] sm:$0xff]   ;;  %vm2772_vm4 = vcmask 326912  }
  0xa6   :  { %v5124_v10 = vld [vmem:[#allocation18 + $0x80] ss:$16 sps:$4 sm:$0xff]   ;;  %v5125_v11 = vld [vmem:[#allocation18 + $0xa4] ss:$16 sps:$4 sm:$0xff]   ;;  %v273_v43 = vld [vmem:[#allocation7] sm:$0xff]  ;;  %vm2779_vm5 = vcmask 392512  }
  0xa7   :  { %v5127_v12 = vld [vmem:[#allocation18 + $0xa0] ss:$16 sps:$4 sm:$0xff]   ;;  %v5128_v13 = vld [vmem:[#allocation18 + $0xc4] ss:$16 sps:$4 sm:$0xff]   ;;  %v6176_v45 = vpack.c.bf16 %v273_v43, %v273_v43  ;;  %v5162_v46 = vld [vmem:[#allocation16 + $0x8] sm:$0xff]   ;;  %vm2786_vm6 = vcmask 458112  }
  0xa8   :  { %662 = vmatpush1.bf16.msra.mxu1 %v5115_v4  ;;  %v5155_v14 = vld [vmem:[#allocation15] sm:$0xff]   ;;  %v166_v17 = vld [vmem:[#allocation10] sm:$0xff]  ;;  %v5166_v49 = vld [vmem:[#allocation16 + $0x18] sm:$0xff]   ;;  %vm2793_vm7 = vcmask 523712   ;;  %vm2800_vm8 = vcmask 589312   ;;  %vm2807_vm9 = vcmask 654912  }
  0xa9   :  { %663 = vmatprep.subr.bf16.mxu1 %v5116_v5  ;;  %4745 = vmatpush3.bf16.msra.mxu0 %v5155_v14  ;;  %v5130_v15 = vld [vmem:[#allocation18 + $0xc0] ss:$16 sps:$4 sm:$0xff]   ;;  %v5131_v18 = vld [vmem:[#allocation18 + $0xe4] ss:$16 sps:$4 sm:$0xff]   ;;  %v167_v19 = vpack.c.bf16 %v166_v17, %v166_v17  ;;  %v5170_v51 = vld [vmem:[#allocation16 + $0x28] sm:$0xff]   ;;  %vm2814_vm10 = vcmask 720512  }
  0xaa   :  { %4746 = vmatprep.subr.bf16.mxu0 %v5956_v0  ;;  %v5161_v20 = vld [vmem:[#allocation15 + $0x10] sm:$0xff]   ;;  %v5165_v26 = vld [vmem:[#allocation15 + $0x20] sm:$0xff]   ;;  %v5173_v53 = vld [vmem:[#allocation16 + $0x38] sm:$0xff]   ;;  %vm2821_vm11 = vcmask 786112   ;;  %vm7209_vm12 = vcmask 851712   ;;  %vm2835_vm13 = vcmask 917312  }
  0xab   :  { %691 = vmatprep.mubr.bf16.mxu1 %v167_v19  ;;  %v5133_v21 = vld [vmem:[#allocation18 + $0xe0] ss:$16 sps:$4 sm:$0xff]   ;;  %v5134_v22 = vld [vmem:[#allocation18 + $0x104] ss:$16 sps:$4 sm:$0xff]   ;;  %v5175_v54 = vld [vmem:[#allocation13 + $0x8] sm:$0xff]   ;;  %vm2842_vm14 = vcmask 982912  }
  0xac   :  { %664 = vmatpush1.bf16.msra.mxu1 %v5118_v6  ;;  %v5136_v24 = vld [vmem:[#allocation18 + $0x100] ss:$16 sps:$4 sm:$0xff]   ;;  %v5137_v25 = vld [vmem:[#allocation18 + $0x124] ss:$16 sps:$4 sm:$0xff]   ;;  %v5177_v56 = vld [vmem:[#allocation13 + $0x18] sm:$0xff]   ;;  %vm2849_vm15 = vcmask 1048512  }
  0xad   :  { %665 = vmatprep.subr.bf16.mxu1 %v5119_v7  ;;  %4747 = vmatpush3.bf16.msra.mxu0 %v5159_v16  ;;  %v5139_v27 = vld [vmem:[#allocation18 + $0x120] ss:$16 sps:$4 sm:$0xff]   ;;  %v5140_v28 = vld [vmem:[#allocation18 + $0x144] ss:$16 sps:$4 sm:$0xff]   ;;  %v5179_v58 = vld [vmem:[#allocation13 + $0x28] sm:$0xff]   ;;  %vm7207_vm0 = vcmask 1041409  }
  0xae   :  { %4748 = vmatprep.subr.bf16.mxu0 %v5956_v0  ;;  %v5142_v30 = vld [vmem:[#allocation18 + $0x140] ss:$16 sps:$4 sm:$0xff]   ;;  %v5143_v31 = vld [vmem:[#allocation18 + $0x164] ss:$16 sps:$4 sm:$0xff]   ;;  %v5181_v60 = vld [vmem:[#allocation13 + $0x38] sm:$0xff]  }
  0xaf   :  { %v5169_v32 = vld [vmem:[#allocation15 + $0x30] sm:$0xff]   ;;  %v5160_v44 = vld [vmem:[#allocation16] sm:$0xff]   ;;  %v5183_v62 = vld [vmem:[#allocation13 + $0x48] sm:$0xff]  }
  0xb0   :  { %666 = vmatpush1.bf16.msra.mxu1 %v5121_v8  ;;  %v5145_v33 = vld [vmem:[#allocation18 + $0x160] ss:$16 sps:$4 sm:$0xff]   ;;  %v5146_v34 = vld [vmem:[#allocation18 + $0x184] ss:$16 sps:$4 sm:$0xff]   ;;  %v5185_v1 = vld [vmem:[#allocation13 + $0x58] sm:$0xff]  }
  0xb1   :  { %667 = vmatprep.subr.bf16.mxu1 %v5122_v9  ;;  %4749 = vmatpush3.bf16.msra.mxu0 %v5161_v20  ;;  %v5148_v36 = vld [vmem:[#allocation18 + $0x180] ss:$16 sps:$4 sm:$0xff]   ;;  %v5149_v37 = vld [vmem:[#allocation18 + $0x1a4] ss:$16 sps:$4 sm:$0xff]   ;;  %v5187_v3 = vld [vmem:[#allocation13 + $0x68] sm:$0xff]  }
  0xb2   :  { %4750 = vmatprep.subr.bf16.mxu0 %v5956_v0  ;;  %v5151_v38 = vld [vmem:[#allocation18 + $0x1a0] ss:$16 sps:$4 sm:$0xff]   ;;  %v5152_v39 = vld [vmem:[#allocation18 + $0x1c4] ss:$16 sps:$4 sm:$0xff]   ;;  %v5189_v5 = vld [vmem:[#allocation13 + $0x78] sm:$0xff]  }
  0xb3   :  { %v5154_v40 = vld [vmem:[#allocation18 + $0x1c0] ss:$16 sps:$4 sm:$0xff]   ;;  %v5156_v41 = vld [vmem:[#allocation18 + $0x1e4] ss:$16 sps:$4 sm:$0xff]   ;;  %v5191_v7 = vld [vmem:[#allocation13 + $0x88] sm:$0xff]  }
  0xb4   :  { %668 = vmatpush1.bf16.msra.mxu1 %v5124_v10  ;;  %v5158_v42 = vld [vmem:[#allocation18 + $0x1e0] ss:$16 sps:$4 sm:$0xff]   ;;  %v5193_v9 = vld [vmem:[#allocation13 + $0x98] sm:$0xff]  }
  0xb5   :  { %669 = vmatprep.subr.bf16.mxu1 %v5125_v11  ;;  %4751 = vmatpush3.bf16.msra.mxu0 %v5163_v23  ;;  %v5174_v47 = vld [vmem:[#allocation13] sm:$0xff]   ;;  %v5164_v48 = vld [vmem:[#allocation16 + $0x10] sm:$0xff]   ;;  %v5195_v11 = vld [vmem:[#allocation13 + $0xa8] sm:$0xff]  }
  0xb6   :  { %4752 = vmatprep.subr.bf16.mxu0 %v5956_v0  ;;  %v5168_v50 = vld [vmem:[#allocation16 + $0x20] sm:$0xff]   ;;  %v5172_v52 = vld [vmem:[#allocation16 + $0x30] sm:$0xff]   ;;  %v5201_v17 = vld [vmem:[#allocation13 + $0xd8] sm:$0xff]  }
  0xb7   :  { %v5176_v55 = vld [vmem:[#allocation13 + $0x10] sm:$0xff]   ;;  %v5178_v57 = vld [vmem:[#allocation13 + $0x20] sm:$0xff]   ;;  %v5207_v23 = vld [vmem:[#allocation13 + $0x108] sm:$0xff]  }
  0xb8   :  { %670 = vmatpush1.bf16.msra.mxu1 %v5127_v12  ;;  %v5180_v59 = vld [vmem:[#allocation13 + $0x30] sm:$0xff]   ;;  %v5182_v61 = vld [vmem:[#allocation13 + $0x40] sm:$0xff]   ;;  %v5221_v43 = vld [vmem:[#allocation13 + $0x178] sm:$0xff]  }
  0xb9   :  { %671 = vmatprep.subr.bf16.mxu1 %v5128_v13  ;;  %4753 = vmatpush3.bf16.msra.mxu0 %v5165_v26  ;;  %v5184_v63 = vld [vmem:[#allocation13 + $0x50] sm:$0xff]   ;;  %v5186_v2 = vld [vmem:[#allocation13 + $0x60] sm:$0xff]   ;;  %v5197_v13 = vld [vmem:[#allocation13 + $0xb8] sm:$0xff]  }
  0xba   :  { %4754 = vmatprep.subr.bf16.mxu0 %v5956_v0  ;;  %v5188_v4 = vld [vmem:[#allocation13 + $0x70] sm:$0xff]   ;;  %v5190_v6 = vld [vmem:[#allocation13 + $0x80] sm:$0xff]  }
  0xbb   :  { %v5192_v8 = vld [vmem:[#allocation13 + $0x90] sm:$0xff]   ;;  %v5194_v10 = vld [vmem:[#allocation13 + $0xa0] sm:$0xff]  }
  0xbc   :  { %672 = vmatpush1.bf16.msra.mxu1 %v5130_v15  ;;  %v5196_v12 = vld [vmem:[#allocation13 + $0xb0] sm:$0xff]   ;;  %v5198_v14 = vld [vmem:[#allocation13 + $0xc0] sm:$0xff]   ;;  %v5199_v15 = vld [vmem:[#allocation13 + $0xc8] sm:$0xff]  }
  0xbd   :  { %673 = vmatprep.subr.bf16.mxu1 %v5131_v18  ;;  %4755 = vmatpush3.bf16.msra.mxu0 %v5167_v29  ;;  %v5200_v16 = vld [vmem:[#allocation13 + $0xd0] sm:$0xff]   ;;  %v5202_v18 = vld [vmem:[#allocation13 + $0xe0] sm:$0xff]   ;;  %v5213_v29 = vld [vmem:[#allocation13 + $0x138] sm:$0xff]  }
  0xbe   :  { %4756 = vmatprep.subr.bf16.mxu0 %v5956_v0  ;;  %v5204_v20 = vld [vmem:[#allocation13 + $0xf0] sm:$0xff]   ;;  %v5210_v26 = vld [vmem:[#allocation13 + $0x120] sm:$0xff]  }
  0xc0   :  { %674 = vmatpush1.bf16.msra.mxu1 %v5133_v21  ;;  %v5205_v21 = vld [vmem:[#allocation13 + $0xf8] sm:$0xff]  }
  0xc1   :  { %675 = vmatprep.subr.bf16.mxu1 %v5134_v22  ;;  %4757 = vmatpush3.bf16.msra.mxu0 %v5169_v32  ;;  %v5206_v22 = vld [vmem:[#allocation13 + $0x100] sm:$0xff]   ;;  %v5216_v32 = vld [vmem:[#allocation13 + $0x150] sm:$0xff]  }
  0xc2   :  { %4758 = vmatprep.subr.bf16.mxu0 %v5956_v0 }
  0xc4   :  { %676 = vmatpush1.bf16.msra.mxu1 %v5136_v24  ;;  %v5208_v24 = vld [vmem:[#allocation13 + $0x110] sm:$0xff]  }
  0xc5   :  { %677 = vmatprep.subr.bf16.mxu1 %v5137_v25  ;;  %4759 = vmatpush3.bf16.msra.mxu0 %v5171_v35  ;;  %v5209_v25 = vld [vmem:[#allocation13 + $0x118] sm:$0xff]  }
  0xc8   :  { %678 = vmatpush1.bf16.msra.mxu1 %v5139_v27  ;;  %4761 = vmatmul.mubr.bf16.vlgmr.msra.gmra.mrb[0].mxu0 %v167_v19  ;;  %v5211_v27 = vld [vmem:[#allocation13 + $0x128] sm:$0xff]  }
  0xc9   :  { %679 = vmatprep.subr.bf16.mxu1 %v5140_v28  ;;  %732 = vmatprep.mubr.bf16.mxu0 %v167_v19  ;;  %v5203_v19 = vld [vmem:[#allocation13 + $0xe8] sm:$0xff]   ;;  %v5212_v28 = vld [vmem:[#allocation13 + $0x130] sm:$0xff]  }
  0xcc   :  { %680 = vmatpush1.bf16.msra.mxu1 %v5142_v30  ;;  %v5214_v30 = vld [vmem:[#allocation13 + $0x140] sm:$0xff]  }
  0xcd   :  { %681 = vmatprep.subr.bf16.mxu1 %v5143_v31  ;;  %v5215_v31 = vld [vmem:[#allocation13 + $0x148] sm:$0xff]  }
  0xd0   :  { %682 = vmatpush1.bf16.msra.mxu1 %v5145_v33  ;;  %v5217_v33 = vld [vmem:[#allocation13 + $0x158] sm:$0xff]  }
  0xd1   :  { %683 = vmatprep.subr.bf16.mxu1 %v5146_v34  ;;  %v5218_v34 = vld [vmem:[#allocation13 + $0x160] sm:$0xff]  }
  0xd4   :  { %684 = vmatpush1.bf16.msra.mxu1 %v5148_v36 }
  0xd5   :  { %685 = vmatprep.subr.bf16.mxu1 %v5149_v37 }
  0xd8   :  { %686 = vmatpush1.bf16.msra.mxu1 %v5151_v38 }
  0xd9   :  { %687 = vmatprep.subr.bf16.mxu1 %v5152_v39  ;;  %v5219_v39 = vld [vmem:[#allocation13 + $0x168] sm:$0xff]  }
  0xdc   :  { %688 = vmatpush1.bf16.msra.mxu1 %v5154_v40  ;;  %v5220_v40 = vld [vmem:[#allocation13 + $0x170] sm:$0xff]  }
  0xdd   :  { %689 = vmatprep.subr.bf16.mxu1 %v5156_v41 }
  0xe0   :  { %690 = vmatpush1.bf16.msra.mxu1 %v5158_v42 }
  0xe1   :  { %4764 = vmatprep.subr.bf16.mxu1 %v5160_v44 }
  0xe3   :  { %692 = vmatmul.mubr.bf16.vlgmr.msra.gmra.mrb[0].mxu1 %v6176_v45 }
  0xe4   :  { %4765 = vmatpush3.bf16.msra.mxu1 %v5160_v44  ;;  %4780 = vmatprep.mubr.bf16.mxu1 %v5174_v47 }
  0xe5   :  { %4766 = vmatprep.subr.bf16.mxu1 %v5162_v46 }
  0xe8   :  { %4767 = vmatpush3.bf16.msra.mxu1 %v5162_v46  ;;  %v5222_v46 = vld [vmem:[#allocation13 + $0x180] sm:$0xff]  }
  0xe9   :  { %4768 = vmatprep.subr.bf16.mxu1 %v5164_v48 }
  0xec   :  { %4769 = vmatpush3.bf16.msra.mxu1 %v5164_v48  ;;  %v5223_v48 = vld [vmem:[#allocation13 + $0x188] sm:$0xff]  }
  0xed   :  { %4770 = vmatprep.subr.bf16.mxu1 %v5166_v49 }
  0xf0   :  { %4771 = vmatpush3.bf16.msra.mxu1 %v5166_v49  ;;  %v5958_v49 = vmov 1966171168  }
  0xf1   :  { %4772 = vmatprep.subr.bf16.mxu1 %v5168_v50 }
  0xf4   :  { %4773 = vmatpush3.bf16.msra.mxu1 %v5168_v50  ;;  %v1874_v50 = vunpack.c.l.s4 %v5958_v49 }
  0xf5   :  { %4774 = vmatprep.subr.bf16.mxu1 %v5170_v51 }
  0xf8   :  { %4775 = vmatpush3.bf16.msra.mxu1 %v5170_v51  ;;  %v1876_v51 = vlaneseq }
  0xf9   :  { %4776 = vmatprep.subr.bf16.mxu1 %v5172_v52 }
  0xfc   :  { %4777 = vmatpush3.bf16.msra.mxu1 %v5172_v52  ;;  %v5224_v52 = vld [vmem:[#allocation13 + $0x190] sm:$0xff]  }
  0xfd   :  { %4778 = vmatprep.subr.bf16.mxu1 %v5173_v53 }
 0x100   :  { %4779 = vmatpush3.bf16.msra.mxu1 %v5173_v53  ;;  %v1875_v53 = vunpack.c.0.s8 %v1874_v50  ;;  %v5235_v50 = vld [vmem:[#allocation13 + $0x1e8] sm:$0xff]  }
 0x103   :  { %4781 = vmatmul.mubr.bf16.vlgmr.msra.gmra.mrb[4].mxu1 %v5175_v54  ;;  %v6186_v54 = vshrl.u32 %v1876_v51, 7 }
 0x104   :  { %4784 = vmatprep.mubr.bf16.mxu1 %v5176_v55  ;;  %v5225_v55 = vld [vmem:[#allocation13 + $0x198] sm:$0xff]  }
 0x10b   :  { %4785 = vmatmul.mubr.bf16.gmra.mrb[8].mxu1 %v5177_v56  ;;  %v6189_v56 = vsub.s32 %v1875_v53, %v6186_v54 }
 0x10c   :  { %4788 = vmatprep.mubr.bf16.mxu1 %v5178_v57  ;;  %v5226_v57 = vld [vmem:[#allocation13 + $0x1a0] sm:$0xff]  }
 0x113   :  { %4789 = vmatmul.mubr.bf16.gmra.mrb[12].mxu1 %v5179_v58 }
 0x114   :  { %4792 = vmatprep.mubr.bf16.mxu1 %v5180_v59 }
 0x11b   :  { %4793 = vmatmul.mubr.bf16.gmra.mrb[16].mxu1 %v5181_v60  ;;  %v6200_v60 = vsub.s32 0, %v6186_v54 }
 0x11c   :  { %4796 = vmatprep.mubr.bf16.mxu1 %v5182_v61  ;;  %v5227_v61 = vld [vmem:[#allocation13 + $0x1a8] sm:$0xff]  }
 0x123   :  { %4797 = vmatmul.mubr.bf16.gmra.mrb[20].mxu1 %v5183_v62  ;;  %v5228_v62 = vld [vmem:[#allocation13 + $0x1b0] sm:$0xff]  }
 0x124   :  { %4800 = vmatprep.mubr.bf16.mxu1 %v5184_v63 }
 0x12b   :  { %4801 = vmatmul.mubr.bf16.gmra.mrb[24].mxu1 %v5185_v1 }
 0x12c   :  { %4804 = vmatprep.mubr.bf16.mxu1 %v5186_v2 }
 0x133   :  { %4805 = vmatmul.mubr.bf16.gmra.mrb[28].mxu1 %v5187_v3 }
 0x134   :  { %4808 = vmatprep.mubr.bf16.mxu1 %v5188_v4  ;;  %v5229_v4 = vld [vmem:[#allocation13 + $0x1b8] sm:$0xff]  }
 0x13b   :  { %4809 = vmatmul.mubr.bf16.gmra.mrb[32].mxu1 %v5189_v5 }
 0x13c   :  { %4812 = vmatprep.mubr.bf16.mxu1 %v5190_v6 }
 0x143   :  { %4813 = vmatmul.mubr.bf16.gmra.mrb[36].mxu1 %v5191_v7  ;;  %v5230_v7 = vld [vmem:[#allocation13 + $0x1c0] sm:$0xff]  }
 0x144   :  { %4816 = vmatprep.mubr.bf16.mxu1 %v5192_v8 }
 0x14b   :  { %4817 = vmatmul.mubr.bf16.gmra.mrb[40].mxu1 %v5193_v9 }
 0x14c   :  { %4820 = vmatprep.mubr.bf16.mxu1 %v5194_v10 }
 0x153   :  { %4821 = vmatmul.mubr.bf16.gmra.mrb[44].mxu1 %v5195_v11 }
 0x154   :  { %4824 = vmatprep.mubr.bf16.mxu1 %v5196_v12 }
 0x15b   :  { %4825 = vmatmul.mubr.bf16.gmra.mrb[48].mxu1 %v5197_v13 }
 0x15c   :  { %4828 = vmatprep.mubr.bf16.mxu1 %v5198_v14  ;;  %v5231_v14 = vld [vmem:[#allocation13 + $0x1c8] sm:$0xff]  }
 0x163   :  { %4829 = vmatmul.mubr.bf16.gmra.mrb[52].mxu1 %v5199_v15 }
 0x164   :  { %4832 = vmatprep.mubr.bf16.mxu1 %v5200_v16 }
 0x16b   :  { %4833 = vmatmul.mubr.bf16.gmra.mrb[56].mxu1 %v5201_v17  ;;  %v5232_v17 = vld [vmem:[#allocation13 + $0x1d0] sm:$0xff]  }
 0x16c   :  { %4836 = vmatprep.mubr.bf16.mxu1 %v5202_v18 }
 0x173   :  { %4837 = vmatmul.mubr.bf16.gmra.mrb[60].mxu1 %v5203_v19 }
 0x174   :  { %4840 = vmatprep.mubr.bf16.mxu1 %v5204_v20  ;;  %v6216_v20 = vld [vmem:[%s7197_s6] ss:$0 sm:$0xff] }
 0x17b   :  { %4841 = vmatmul.mubr.bf16.gmra.mrb[64].mxu1 %v5205_v21 }
 0x17c   :  { %4844 = vmatprep.mubr.bf16.mxu1 %v5206_v22 }
 0x183   :  { %4845 = vmatmul.mubr.bf16.gmra.mrb[68].mxu1 %v5207_v23 }
 0x184   :  { %4848 = vmatprep.mubr.bf16.mxu1 %v5208_v24 }
 0x18b   :  { %4849 = vmatmul.mubr.bf16.gmra.mrb[72].mxu1 %v5209_v25 }
 0x18c   :  { %4852 = vmatprep.mubr.bf16.mxu1 %v5210_v26 }
 0x193   :  { %4853 = vmatmul.mubr.bf16.gmra.mrb[76].mxu1 %v5211_v27 }
 0x194   :  { %4856 = vmatprep.mubr.bf16.mxu1 %v5212_v28  ;;  %v5233_v28 = vld [vmem:[#allocation13 + $0x1d8] sm:$0xff]  }
 0x19b   :  { %4857 = vmatmul.mubr.bf16.gmra.mrb[80].mxu1 %v5213_v29  ;;  %v6179_v35 = vpop.f32.mrb[0].mxu0 }
 0x19c   :  { %4860 = vmatprep.mubr.bf16.mxu1 %v5214_v30  ;;  %v4762_v36 = vpop.f32.mrb[1].mxu0  ;;  %v6193_v58 = vrot.slane %v6179_v35, %v6189_v56 }
 0x19d   :  { %v269_v37 = vpop.f32.mrb[2].mxu0 }
 0x19e   :  { %v4763_v38 = vpop.f32.mrb[3].mxu0  ;;  %v6197_v59 = vrot.slane %v6193_v58, %v6189_v56 }
 0x1a0   :  { %v6204_v63 = vrot.slane %v6197_v59, %v6200_v60 }
 0x1a3   :  { %4861 = vmatmul.mubr.bf16.gmra.mrb[84].mxu1 %v5215_v31 }
 0x1a4   :  { %4864 = vmatprep.mubr.bf16.mxu1 %v5216_v32  ;;  %v5234_v32 = vld [vmem:[#allocation13 + $0x1e0] sm:$0xff]  }
 0x1ab   :  { %4865 = vmatmul.mubr.bf16.gmra.mrb[88].mxu1 %v5217_v33 }
 0x1ac   :  { %4868 = vmatprep.mubr.bf16.mxu1 %v5218_v34 }
 0x1b3   :  { %4869 = vmatmul.mubr.bf16.gmra.mrb[92].mxu1 %v5219_v39 }
 0x1b4   :  { %4872 = vmatprep.mubr.bf16.mxu1 %v5220_v40 }
 0x1b6   :  { %v6181_v41 = vpop.f32.mrb[0].mxu1 }
 0x1b7   :  { %v6183_v42 = vpop.f32.mrb[1].mxu1 }
 0x1b8   :  { %v697_v44 = vpop.f32.mrb[2].mxu1 }
 0x1b9   :  { %v698_v47 = vpop.f32.mrb[3].mxu1 }
 0x1bb   :  { %4873 = vmatmul.mubr.bf16.gmra.mrb[96].mxu1 %v5221_v43  ;;  %v1887_v43 = vcombine.high %v6193_v58, %v6193_v58 }
 0x1bc   :  { %4876 = vmatprep.mubr.bf16.mxu1 %v5222_v46 }
 0x1bd   :  { %v6233_v58 = vrot.slane %v1887_v43, %v6189_v56 }
 0x1c3   :  { %4877 = vmatmul.mubr.bf16.gmra.mrb[100].mxu1 %v5223_v48 }
 0x1c4   :  { %4880 = vmatprep.mubr.bf16.mxu1 %v5224_v52 }
 0x1cb   :  { %4881 = vmatmul.mubr.bf16.gmra.mrb[104].mxu1 %v5225_v55 }
 0x1cc   :  { %4884 = vmatprep.mubr.bf16.mxu1 %v5226_v57  ;;  %v5236_v57 = vld [vmem:[#allocation13 + $0x1f0] sm:$0xff]  }
 0x1d3   :  { %4885 = vmatmul.mubr.bf16.gmra.mrb[108].mxu1 %v5227_v61 }
 0x1d4   :  { %4888 = vmatprep.mubr.bf16.mxu1 %v5228_v62 }
 0x1d6   :  { %v4782_v1 = vpop.f32.mrb[4].mxu1 }
 0x1d7   :  { %v1963_v2 = vadd.f32 %v4782_v1, %v6204_v63  ;;  %v1359_v3 = vpop.f32.mrb[5].mxu1 }
 0x1d8   :  { %v1961_v5 = vadd.f32 %v6204_v63, %v1359_v3  ;;  %v4783_v6 = vpop.f32.mrb[6].mxu1 }
 0x1d9   :  { %5342 = vtanh.f32 %v1963_v2  ;;  %v1964_v8 = vadd.f32 %v4783_v6, %v6204_v63  ;;  %v1362_v9 = vpop.f32.mrb[7].mxu1 }
 0x1da   :  { %v1962_v10 = vadd.f32 %v6204_v63, %v1362_v9  ;;  %5344 = vtanh.f32 %v1961_v5 }
 0x1db   :  { %4889 = vmatmul.mubr.bf16.gmra.mrb[112].mxu1 %v5229_v4  ;;  %5346 = vtanh.f32 %v1964_v8  ;;  %v6242_v8 = vrot.slane %v6233_v58, %v6200_v60 }
 0x1dc   :  { %4892 = vmatprep.mubr.bf16.mxu1 %v5230_v7 }
 0x1de   :  { %v4786_v11 = vpop.f32.mrb[8].mxu1 }
 0x1df   :  { %v1967_v12 = vadd.f32 %v4786_v11, %v6204_v63  ;;  %v1375_v13 = vpop.f32.mrb[9].mxu1 }
 0x1e0   :  { %v1965_v15 = vadd.f32 %v6204_v63, %v1375_v13  ;;  %v4787_v16 = vpop.f32.mrb[10].mxu1 }
 0x1e1   :  { %v1968_v18 = vadd.f32 %v4787_v16, %v6204_v63  ;;  %v1378_v19 = vpop.f32.mrb[11].mxu1 }
 0x1e2   :  { %5348 = vtanh.f32 %v1965_v15  ;;  %v1966_v21 = vadd.f32 %v6204_v63, %v1378_v19 }
 0x1e3   :  { %v5343_v22 = vpop.eup %5342  ;;  %5350 = vtanh.f32 %v1962_v10  ;;  %4893 = vmatmul.mubr.bf16.gmra.mrb[116].mxu1 %v5231_v14 }
 0x1e4   :  { %5352 = vtanh.f32 %v1966_v21  ;;  %v2226_v23 = vmul.f32 %v5343_v22, %v6216_v20  ;;  %4896 = vmatprep.mubr.bf16.mxu1 %v5232_v17  ;;  %v5345_v24 = vpop.eup %5344 }
 0x1e5   :  { %5354 = vtanh.f32 %v1967_v12  ;;  %v2224_v31 = vmul.f32 %v5345_v24, %v6216_v20  ;;  %v5347_v33 = vpop.eup %5346  ;;  %v5237_v12 = vld [vmem:[#allocation13 + $0x1f8] sm:$0xff]  }
 0x1e6   :  { %v4790_v25 = vpop.f32.mrb[12].mxu1  ;;  %2356 = vadd.xlane.f32.xlu0 %v2226_v23  ;;  %v2227_v39 = vmul.f32 %v5347_v33, %v6216_v20 }
 0x1e7   :  { %v1971_v26 = vadd.f32 %v4790_v25, %v6204_v63  ;;  %v1391_v27 = vpop.f32.mrb[13].mxu1 }
 0x1e8   :  { %v1969_v29 = vadd.f32 %v6204_v63, %v1391_v27  ;;  %v4791_v30 = vpop.f32.mrb[14].mxu1 }
 0x1e9   :  { %5356 = vtanh.f32 %v1971_v26  ;;  %v1972_v34 = vadd.f32 %v4791_v30, %v6204_v63  ;;  %v1394_v36 = vpop.f32.mrb[15].mxu1 }
 0x1ea   :  { %v1970_v37 = vadd.f32 %v6204_v63, %v1394_v36  ;;  %2352 = vadd.xlane.f32.xlu0 %v2224_v31  ;;  %5358 = vtanh.f32 %v1968_v18 }
 0x1eb   :  { %4897 = vmatmul.mubr.bf16.gmra.mrb[120].mxu1 %v5233_v28  ;;  %5360 = vtanh.f32 %v1969_v29 }
 0x1ec   :  { %v5349_v38 = vpop.eup %5348  ;;  %4900 = vmatprep.mubr.bf16.mxu1 %v5234_v32  ;;  %5362 = vtanh.f32 %v1972_v34 }
 0x1ed   :  { %v5351_v40 = vpop.eup %5350  ;;  %v2228_v44 = vmul.f32 %v5349_v38, %v6216_v20  ;;  %5364 = vtanh.f32 %v1970_v37 }
 0x1ee   :  { %v5353_v46 = vpop.eup %5352  ;;  %v4794_v47 = vpop.f32.mrb[16].mxu1  ;;  %2358 = vadd.xlane.f32.xlu0 %v2227_v39  ;;  %v2225_v55 = vmul.f32 %v5351_v40, %v6216_v20 }
 0x1ef   :  { %v1975_v48 = vadd.f32 %v4794_v47, %v6204_v63  ;;  %v1407_v49 = vpop.f32.mrb[17].mxu1  ;;  %2360 = vadd.xlane.f32.xlu1 %v2228_v44  ;;  %v5355_v61 = vpop.eup %5354  ;;  %v2229_v2 = vmul.f32 %v5353_v46, %v6216_v20 }
 0x1f0   :  { %v1973_v52 = vadd.f32 %v6204_v63, %v1407_v49  ;;  %v4795_v53 = vpop.f32.mrb[18].mxu1  ;;  %v2230_v5 = vmul.f32 %v5355_v61, %v6216_v20 }
 0x1f1   :  { %v1976_v62 = vadd.f32 %v4795_v53, %v6204_v63  ;;  %v1410_v1 = vpop.f32.mrb[19].mxu1  ;;  %5366 = vtanh.f32 %v1975_v48 }
 0x1f2   :  { %v1974_v3 = vadd.f32 %v6204_v63, %v1410_v1  ;;  %2354 = vadd.xlane.f32.xlu0 %v2225_v55  ;;  %5368 = vtanh.f32 %v1973_v52 }
 0x1f3   :  { %v5357_v4 = vpop.eup %5356  ;;  %4901 = vmatmul.mubr.bf16.gmra.mrb[124].mxu1 %v5235_v50  ;;  %2362 = vadd.xlane.f32.xlu1 %v2229_v2  ;;  %5370 = vtanh.f32 %v1976_v62 }
 0x1f4   :  { %v2234_v6 = vmul.f32 %v5357_v4, %v6216_v20  ;;  %4904 = vmatprep.mubr.bf16.mxu1 %v5236_v57  ;;  %v5359_v7 = vpop.eup %5358  ;;  %v1917_v4 = vcombine.high %v6197_v59, %v6197_v59 }
 0x1f5   :  { %v5361_v9 = vpop.eup %5360  ;;  %v2231_v15 = vmul.f32 %v5359_v7, %v6216_v20 }
 0x1f6   :  { %v4798_v10 = vpop.f32.mrb[20].mxu1  ;;  %2364 = vadd.xlane.f32.xlu0 %v2230_v5  ;;  %v2232_v18 = vmul.f32 %v5361_v9, %v6216_v20  ;;  %v5363_v19 = vpop.eup %5362  ;;  %v6278_v59 = vrot.slane %v1917_v4, %v6200_v60 }
 0x1f7   :  { %v1979_v63 = vadd.f32 %v4798_v10, %v6242_v8  ;;  %v1423_v11 = vpop.f32.mrb[21].mxu1  ;;  %2372 = vadd.xlane.f32.xlu1 %v2234_v6  ;;  %v2235_v22 = vmul.f32 %v5363_v19, %v6216_v20  ;;  %v5365_v23 = vpop.eup %5364 }
 0x1f8   :  { %v1977_v13 = vadd.f32 %v6242_v8, %v1423_v11  ;;  %v4799_v14 = vpop.f32.mrb[22].mxu1  ;;  %v2233_v31 = vmul.f32 %v5365_v23, %v6216_v20 }
 0x1f9   :  { %v1980_v16 = vadd.f32 %v4799_v14, %v6242_v8  ;;  %v1426_v17 = vpop.f32.mrb[23].mxu1 }
 0x1fa   :  { %v1978_v21 = vadd.f32 %v6242_v8, %v1426_v17  ;;  %2366 = vadd.xlane.f32.xlu0 %v2231_v15 }
 0x1fb   :  { %4905 = vmatmul.mubr.bf16.gmra.mrb[128].mxu1 %v5237_v12  ;;  %2368 = vadd.xlane.f32.xlu1 %v2232_v18  ;;  %v5367_v32 = vpop.eup %5366 }
 0x1fc   :  { %v2238_v34 = vmul.f32 %v5367_v32, %v6216_v20  ;;  %v5369_v36 = vpop.eup %5368 }
 0x1fd   :  { %v2236_v47 = vmul.f32 %v5369_v36, %v6216_v20  ;;  %v5371_v48 = vpop.eup %5370 }
 0x1fe   :  { %v4802_v24 = vpop.f32.mrb[24].mxu1  ;;  %v2239_v53 = vmul.f32 %v5371_v48, %v6216_v20 }
 0x1ff   :  { %v6252_v25 = vadd.f32 %v4802_v24, %v6242_v8  ;;  %v1439_v26 = vpop.f32.mrb[25].mxu1  ;;  %2374 = vadd.xlane.f32.xlu1 %v2235_v22 }
 0x200   :  { %v1981_v27 = vadd.f32 %v6242_v8, %v1439_v26  ;;  %v4803_v28 = vpop.f32.mrb[26].mxu1 }
 0x201   :  { %v6256_v29 = vadd.f32 %v4803_v28, %v6242_v8  ;;  %v1442_v30 = vpop.f32.mrb[27].mxu1 }
 0x202   :  { %5372 = vtanh.f32 %v1981_v27  ;;  %v1982_v33 = vadd.f32 %v6242_v8, %v1442_v30 }
 0x203   :  { %5374 = vtanh.f32 %v1974_v3  ;;  %2370 = vadd.xlane.f32.xlu1 %v2233_v31 }
 0x204   :  { %5376 = vtanh.f32 %v1982_v33 }
 0x205   :  { %5378 = vtanh.f32 %v1979_v63 }
 0x206   :  { %v4806_v37 = vpop.f32.mrb[28].mxu1 }
 0x207   :  { %v1987_v38 = vadd.f32 %v4806_v37, %v6242_v8  ;;  %v1455_v39 = vpop.f32.mrb[29].mxu1  ;;  %2380 = vadd.xlane.f32.xlu1 %v2238_v34 }
 0x208   :  { %v1985_v40 = vadd.f32 %v6242_v8, %v1455_v39  ;;  %v4807_v43 = vpop.f32.mrb[30].mxu1 }
 0x209   :  { %5380 = vtanh.f32 %v1987_v38  ;;  %v1988_v44 = vadd.f32 %v4807_v43, %v6242_v8  ;;  %v1458_v46 = vpop.f32.mrb[31].mxu1 }
 0x20a   :  { %v1986_v49 = vadd.f32 %v6242_v8, %v1458_v46  ;;  %5382 = vtanh.f32 %v1977_v13 }
 0x20b   :  { %2376 = vadd.xlane.f32.xlu1 %v2236_v47  ;;  %5384 = vtanh.f32 %v1985_v40 }
 0x20c   :  { %v5373_v50 = vpop.eup %5372  ;;  %5386 = vtanh.f32 %v1980_v16 }
 0x20d   :  { %v5375_v52 = vpop.eup %5374  ;;  %v2244_v55 = vmul.f32 %v5373_v50, %v6216_v20  ;;  %5388 = vtanh.f32 %v1988_v44 }
 0x20e   :  { %v5377_v57 = vpop.eup %5376  ;;  %v4810_v61 = vpop.f32.mrb[32].mxu1  ;;  %v2237_v7 = vmul.f32 %v5375_v52, %v6216_v20  ;;  %5390 = vtanh.f32 %v1978_v21 }
 0x20f   :  { %v1991_v62 = vadd.f32 %v4810_v61, %v6242_v8  ;;  %v1471_v1 = vpop.f32.mrb[33].mxu1  ;;  %2382 = vadd.xlane.f32.xlu1 %v2239_v53  ;;  %2392 = vadd.xlane.f32.xlu0 %v2244_v55  ;;  %v2245_v9 = vmul.f32 %v5377_v57, %v6216_v20  ;;  %v5379_v10 = vpop.eup %5378  ;;  %5392 = vtanh.f32 %v1986_v49 }
 0x210   :  { %v1989_v2 = vadd.f32 %v6242_v8, %v1471_v1  ;;  %v4811_v3 = vpop.f32.mrb[34].mxu1  ;;  %v2242_v14 = vmul.f32 %v5379_v10, %v6216_v20  ;;  %5394 = vtanh.f32 %v6252_v25 }
 0x211   :  { %v1992_v5 = vadd.f32 %v4811_v3, %v6242_v8  ;;  %v1474_v6 = vpop.f32.mrb[35].mxu1  ;;  %5396 = vtanh.f32 %v1991_v62 }
 0x212   :  { %v1990_v63 = vadd.f32 %v6242_v8, %v1474_v6  ;;  %5398 = vtanh.f32 %v6256_v29 }
 0x213   :  { %v5381_v11 = vpop.eup %5380  ;;  %2378 = vadd.xlane.f32.xlu1 %v2237_v7  ;;  %2394 = vadd.xlane.f32.xlu0 %v2245_v9  ;;  %5400 = vtanh.f32 %v1989_v2 }
 0x214   :  { %v2250_v12 = vmul.f32 %v5381_v11, %v6216_v20  ;;  %v5383_v13 = vpop.eup %5382  ;;  %5402 = vtanh.f32 %v1992_v5 }
 0x215   :  { %v5385_v15 = vpop.eup %5384  ;;  %v2240_v26 = vmul.f32 %v5383_v13, %v6216_v20 }
 0x216   :  { %v4814_v16 = vpop.f32.mrb[36].mxu1  ;;  %v5387_v21 = vpop.eup %5386  ;;  %v2248_v24 = vmul.f32 %v5385_v15, %v6216_v20 }
 0x217   :  { %v1995_v17 = vadd.f32 %v4814_v16, %v6278_v59  ;;  %v1487_v8 = vpop.f32.mrb[37].mxu1  ;;  %2404 = vadd.xlane.f32.xlu0 %v2250_v12  ;;  %2388 = vadd.xlane.f32.xlu1 %v2242_v14  ;;  %v5389_v27 = vpop.eup %5388  ;;  %v2243_v31 = vmul.f32 %v5387_v21, %v6216_v20 }
 0x218   :  { %v1993_v18 = vadd.f32 %v6278_v59, %v1487_v8  ;;  %v4815_v19 = vpop.f32.mrb[38].mxu1  ;;  %v5391_v28 = vpop.eup %5390  ;;  %v2251_v30 = vmul.f32 %v5389_v27, %v6216_v20  ;;  %v1919_v8 = vcombine.high %v6233_v58, %v6233_v58 }
 0x219   :  { %v1996_v22 = vadd.f32 %v4815_v19, %v6278_v59  ;;  %v1490_v23 = vpop.f32.mrb[39].mxu1  ;;  %v5393_v32 = vpop.eup %5392  ;;  %v2241_v44 = vmul.f32 %v5391_v28, %v6216_v20 }
 0x21a   :  { %v1994_v25 = vadd.f32 %v6278_v59, %v1490_v23  ;;  %v5395_v38 = vpop.eup %5394  ;;  %v2249_v43 = vmul.f32 %v5393_v32, %v6216_v20  ;;  %v6320_v27 = vrot.slane %v1919_v8, %v6200_v60 }
 0x21b   :  { %2400 = vadd.xlane.f32.xlu0 %v2248_v24  ;;  %2384 = vadd.xlane.f32.xlu1 %v2240_v26  ;;  %5404 = vtanh.f32 %v1996_v22  ;;  %v5397_v46 = vpop.eup %5396  ;;  %v2246_v50 = vmul.f32 %v5395_v38, %v6216_v20 }
 0x21c   :  { %5406 = vtanh.f32 %v1990_v63  ;;  %v5399_v48 = vpop.eup %5398  ;;  %v2254_v49 = vmul.f32 %v5397_v46, %v6216_v20 }
 0x21d   :  { %5408 = vtanh.f32 %v1994_v25  ;;  %v5401_v52 = vpop.eup %5400  ;;  %v2247_v5 = vmul.f32 %v5399_v48, %v6216_v20 }
 0x21e   :  { %v4818_v33 = vpop.f32.mrb[40].mxu1  ;;  %5410 = vtanh.f32 %v1995_v17  ;;  %v5403_v1 = vpop.eup %5402  ;;  %v2252_v4 = vmul.f32 %v5401_v52, %v6216_v20 }
 0x21f   :  { %v1999_v34 = vadd.f32 %v4818_v33, %v6278_v59  ;;  %v1503_v36 = vpop.f32.mrb[41].mxu1  ;;  %2406 = vadd.xlane.f32.xlu0 %v2251_v30  ;;  %2390 = vadd.xlane.f32.xlu1 %v2243_v31  ;;  %v2255_v10 = vmul.f32 %v5403_v1, %v6216_v20 }
 0x220   :  { %v1997_v37 = vadd.f32 %v6278_v59, %v1503_v36  ;;  %v4819_v29 = vpop.f32.mrb[42].mxu1 }
 0x221   :  { %v2000_v39 = vadd.f32 %v4819_v29, %v6278_v59  ;;  %v1506_v40 = vpop.f32.mrb[43].mxu1 }
 0x222   :  { %v1998_v47 = vadd.f32 %v6278_v59, %v1506_v40  ;;  %5412 = vtanh.f32 %v1997_v37 }
 0x223   :  { %2402 = vadd.xlane.f32.xlu0 %v2249_v43  ;;  %2386 = vadd.xlane.f32.xlu1 %v2241_v44  ;;  %5414 = vtanh.f32 %v1993_v18 }
 0x224   :  { %5416 = vtanh.f32 %v2000_v39 }
 0x225   :  { %v5405_v6 = vpop.eup %5404  ;;  %5418 = vtanh.f32 %v1999_v34 }
 0x226   :  { %v4822_v53 = vpop.f32.mrb[44].mxu1  ;;  %v5407_v9 = vpop.eup %5406  ;;  %v2259_v63 = vmul.f32 %v5405_v6, %v6216_v20 }
 0x227   :  { %v2003_v55 = vadd.f32 %v4822_v53, %v6278_v59  ;;  %v1519_v57 = vpop.f32.mrb[45].mxu1  ;;  %2412 = vadd.xlane.f32.xlu0 %v2254_v49  ;;  %2396 = vadd.xlane.f32.xlu1 %v2246_v50  ;;  %v5409_v11 = vpop.eup %5408  ;;  %v2253_v21 = vmul.f32 %v5407_v9, %v6216_v20 }
 0x228   :  { %v2001_v61 = vadd.f32 %v6278_v59, %v1519_v57  ;;  %v4823_v62 = vpop.f32.mrb[46].mxu1  ;;  %v5411_v17 = vpop.eup %5410  ;;  %v2257_v22 = vmul.f32 %v5409_v11, %v6216_v20 }
 0x229   :  { %v2004_v2 = vadd.f32 %v4823_v62, %v6278_v59  ;;  %v1522_v3 = vpop.f32.mrb[47].mxu1  ;;  %5420 = vtanh.f32 %v2003_v55  ;;  %v2258_v58 = vmul.f32 %v5411_v17, %v6216_v20 }
 0x22a   :  { %v2002_v7 = vadd.f32 %v6278_v59, %v1522_v3  ;;  %5422 = vtanh.f32 %v1998_v47 }
 0x22b   :  { %2408 = vadd.xlane.f32.xlu0 %v2252_v4  ;;  %2398 = vadd.xlane.f32.xlu1 %v2247_v5  ;;  %5424 = vtanh.f32 %v2001_v61 }
 0x22c   :  { %v5413_v23 = vpop.eup %5412  ;;  %5426 = vtanh.f32 %v2004_v2 }
 0x22d   :  { %v5415_v26 = vpop.eup %5414  ;;  %v2260_v25 = vmul.f32 %v5413_v23, %v6216_v20 }
 0x22e   :  { %v4826_v12 = vpop.f32.mrb[48].mxu1  ;;  %v5417_v28 = vpop.eup %5416  ;;  %v2256_v29 = vmul.f32 %v5415_v26, %v6216_v20 }
 0x22f   :  { %v2007_v13 = vadd.f32 %v4826_v12, %v6278_v59  ;;  %v1535_v14 = vpop.f32.mrb[49].mxu1  ;;  %2414 = vadd.xlane.f32.xlu0 %v2255_v10  ;;  %2422 = vadd.xlane.f32.xlu1 %v2259_v63  ;;  %v5419_v34 = vpop.eup %5418  ;;  %v2263_v38 = vmul.f32 %v5417_v28, %v6216_v20 }
 0x230   :  { %v2005_v15 = vadd.f32 %v6278_v59, %v1535_v14  ;;  %v4827_v16 = vpop.f32.mrb[50].mxu1  ;;  %v2262_v44 = vmul.f32 %v5419_v34, %v6216_v20  ;;  %v1872_v14 = vcombine.high %v6179_v35, %v6179_v35 }
 0x231   :  { %v6312_v18 = vadd.f32 %v4827_v16, %v6278_v59  ;;  %v1538_v19 = vpop.f32.mrb[51].mxu1 }
 0x232   :  { %v6317_v24 = vadd.f32 %v6278_v59, %v1538_v19 }
 0x233   :  { %2410 = vadd.xlane.f32.xlu0 %v2253_v21  ;;  %2418 = vadd.xlane.f32.xlu1 %v2257_v22  ;;  %v5421_v39 = vpop.eup %5420  ;;  %v6353_v22 = vrot.slane %v1872_v14, %v6189_v56 }
 0x234   :  { %v5423_v43 = vpop.eup %5422  ;;  %v2266_v46 = vmul.f32 %v5421_v39, %v6216_v20 }
 0x235   :  { %v5425_v47 = vpop.eup %5424  ;;  %v2261_v61 = vmul.f32 %v5423_v43, %v6216_v20 }
 0x236   :  { %v4830_v30 = vpop.f32.mrb[52].mxu1  ;;  %v2264_v62 = vmul.f32 %v5425_v47, %v6216_v20  ;;  %v5427_v1 = vpop.eup %5426 }
 0x237   :  { %v2011_v31 = vadd.f32 %v4830_v30, %v6320_v27  ;;  %v1551_v32 = vpop.f32.mrb[53].mxu1  ;;  %2420 = vadd.xlane.f32.xlu0 %v2258_v58  ;;  %2424 = vadd.xlane.f32.xlu1 %v2260_v25  ;;  %v2267_v6 = vmul.f32 %v5427_v1, %v6216_v20 }
 0x238   :  { %v6326_v59 = vadd.f32 %v6320_v27, %v1551_v32  ;;  %v4831_v33 = vpop.f32.mrb[54].mxu1  ;;  %v6362_v32 = vrot.slane %v6353_v22, %v6189_v56 }
 0x239   :  { %5428 = vtanh.f32 %v2011_v31  ;;  %v2012_v36 = vadd.f32 %v4831_v33, %v6320_v27  ;;  %v1554_v37 = vpop.f32.mrb[55].mxu1 }
 0x23a   :  { %v2010_v40 = vadd.f32 %v6320_v27, %v1554_v37  ;;  %5430 = vtanh.f32 %v2002_v7  ;;  %v6370_v39 = vrot.slane %v6362_v32, %v6200_v60 }
 0x23b   :  { %2416 = vadd.xlane.f32.xlu0 %v2256_v29  ;;  %2430 = vadd.xlane.f32.xlu1 %v2263_v38  ;;  %5432 = vtanh.f32 %v2012_v36 }
 0x23c   :  { %5434 = vtanh.f32 %v2007_v13 }
 0x23d   :  { %5436 = vtanh.f32 %v2010_v40 }
 0x23e   :  { %v4834_v48 = vpop.f32.mrb[56].mxu1  ;;  %5438 = vtanh.f32 %v2005_v15 }
 0x23f   :  { %v2015_v49 = vadd.f32 %v4834_v48, %v6320_v27  ;;  %v1567_v50 = vpop.f32.mrb[57].mxu1  ;;  %2428 = vadd.xlane.f32.xlu0 %v2262_v44  ;;  %2436 = vadd.xlane.f32.xlu1 %v2266_v46 }
 0x240   :  { %v2013_v52 = vadd.f32 %v6320_v27, %v1567_v50  ;;  %v4835_v53 = vpop.f32.mrb[58].mxu1 }
 0x241   :  { %v2016_v55 = vadd.f32 %v4835_v53, %v6320_v27  ;;  %v1570_v57 = vpop.f32.mrb[59].mxu1  ;;  %5440 = vtanh.f32 %v2015_v49 }
 0x242   :  { %v2014_v2 = vadd.f32 %v6320_v27, %v1570_v57  ;;  %5442 = vtanh.f32 %v6312_v18 }
 0x243   :  { %v5429_v3 = vpop.eup %5428  ;;  %2426 = vadd.xlane.f32.xlu0 %v2261_v61  ;;  %2432 = vadd.xlane.f32.xlu1 %v2264_v62  ;;  %5444 = vtanh.f32 %v2016_v55 }
 0x244   :  { %v2274_v4 = vmul.f32 %v5429_v3, %v6216_v20  ;;  %v5431_v5 = vpop.eup %5430  ;;  %5446 = vtanh.f32 %v6317_v24 }
 0x245   :  { %v5433_v7 = vpop.eup %5432  ;;  %v2265_v17 = vmul.f32 %v5431_v5, %v6216_v20 }
 0x246   :  { %v4838_v9 = vpop.f32.mrb[60].mxu1  ;;  %v5435_v13 = vpop.eup %5434  ;;  %v2275_v8 = vmul.f32 %v5433_v7, %v6216_v20 }
 0x247   :  { %v2019_v10 = vadd.f32 %v4838_v9, %v6320_v27  ;;  %v1583_v63 = vpop.f32.mrb[61].mxu1  ;;  %2438 = vadd.xlane.f32.xlu1 %v2267_v6  ;;  %2452 = vadd.xlane.f32.xlu0 %v2274_v4  ;;  %v5437_v18 = vpop.eup %5436  ;;  %v2270_v35 = vmul.f32 %v5435_v13, %v6216_v20 }
 0x248   :  { %v2017_v11 = vadd.f32 %v6320_v27, %v1583_v63  ;;  %v4839_v12 = vpop.f32.mrb[62].mxu1  ;;  %v5439_v21 = vpop.eup %5438  ;;  %v2273_v23 = vmul.f32 %v5437_v18, %v6216_v20 }
 0x249   :  { %v2020_v15 = vadd.f32 %v4839_v12, %v6320_v27  ;;  %v1586_v16 = vpop.f32.mrb[63].mxu1  ;;  %5448 = vtanh.f32 %v2019_v10  ;;  %v2268_v36 = vmul.f32 %v5439_v21, %v6216_v20 }
 0x24a   :  { %v2018_v19 = vadd.f32 %v6320_v27, %v1586_v16  ;;  %5450 = vtanh.f32 %v6326_v59 }
 0x24b   :  { %2434 = vadd.xlane.f32.xlu1 %v2265_v17  ;;  %2454 = vadd.xlane.f32.xlu0 %v2275_v8  ;;  %v5441_v26 = vpop.eup %5440  ;;  %5452 = vtanh.f32 %v2017_v11 }
 0x24c   :  { %v5443_v31 = vpop.eup %5442  ;;  %v2278_v59 = vmul.f32 %v5441_v26, %v6216_v20  ;;  %5454 = vtanh.f32 %v2013_v52 }
 0x24d   :  { %v5445_v37 = vpop.eup %5444  ;;  %5456 = vtanh.f32 %v2020_v15  ;;  %v2271_v40 = vmul.f32 %v5443_v31, %v6216_v20 }
 0x24e   :  { %v4842_v58 = vpop.f32.mrb[64].mxu1  ;;  %v5447_v38 = vpop.eup %5446  ;;  %v2279_v43 = vmul.f32 %v5445_v37, %v6216_v20  ;;  %5458 = vtanh.f32 %v2014_v2 }
 0x24f   :  { %v2023_v25 = vadd.f32 %v4842_v58, %v6320_v27  ;;  %v1599_v28 = vpop.f32.mrb[65].mxu1  ;;  %2444 = vadd.xlane.f32.xlu1 %v2270_v35  ;;  %2450 = vadd.xlane.f32.xlu0 %v2273_v23  ;;  %5460 = vtanh.f32 %v2018_v19  ;;  %v2269_v55 = vmul.f32 %v5447_v38, %v6216_v20 }
 0x250   :  { %v2021_v24 = vadd.f32 %v6320_v27, %v1599_v28  ;;  %v4843_v30 = vpop.f32.mrb[66].mxu1 }
 0x251   :  { %v2024_v33 = vadd.f32 %v4843_v30, %v6320_v27  ;;  %v1602_v34 = vpop.f32.mrb[67].mxu1  ;;  %5462 = vtanh.f32 %v2023_v25 }
 0x252   :  { %v2022_v29 = vadd.f32 %v6320_v27, %v1602_v34 }
 0x253   :  { %2440 = vadd.xlane.f32.xlu1 %v2268_v36  ;;  %2460 = vadd.xlane.f32.xlu0 %v2278_v59  ;;  %v5449_v44 = vpop.eup %5448  ;;  %5464 = vtanh.f32 %v2024_v33  ;;  %v1888_v59 = vcombine.high %v6353_v22, %v6353_v22 }
 0x254   :  { %v5451_v50 = vpop.eup %5450  ;;  %v2282_v57 = vmul.f32 %v5449_v44, %v6216_v20  ;;  %5466 = vtanh.f32 %v2021_v24 }
 0x255   :  { %v5453_v61 = vpop.eup %5452  ;;  %v2272_v3 = vmul.f32 %v5451_v50, %v6216_v20  ;;  %v6409_v22 = vrot.slane %v1888_v59, %v6189_v56 }
 0x256   :  { %v4846_v46 = vpop.f32.mrb[68].mxu1  ;;  %v5455_v1 = vpop.eup %5454  ;;  %v2280_v2 = vmul.f32 %v5453_v61, %v6216_v20 }
 0x257   :  { %v2027_v47 = vadd.f32 %v4846_v46, %v6370_v39  ;;  %v1615_v48 = vpop.f32.mrb[69].mxu1  ;;  %2446 = vadd.xlane.f32.xlu1 %v2271_v40  ;;  %2462 = vadd.xlane.f32.xlu0 %v2279_v43  ;;  %v5457_v4 = vpop.eup %5456  ;;  %v2276_v14 = vmul.f32 %v5455_v1, %v6216_v20  ;;  %v6424_v1 = vrot.slane %v6409_v22, %v6200_v60 }
 0x258   :  { %v2025_v27 = vadd.f32 %v6370_v39, %v1615_v48  ;;  %v4847_v49 = vpop.f32.mrb[70].mxu1  ;;  %v5459_v63 = vpop.eup %5458  ;;  %v2283_v13 = vmul.f32 %v5457_v4, %v6216_v20 }
 0x259   :  { %v2028_v52 = vadd.f32 %v4847_v49, %v6370_v39  ;;  %v1618_v53 = vpop.f32.mrb[71].mxu1  ;;  %5468 = vtanh.f32 %v2027_v47  ;;  %v5461_v15 = vpop.eup %5460  ;;  %v2277_v18 = vmul.f32 %v5459_v63, %v6216_v20 }
 0x25a   :  { %v2026_v62 = vadd.f32 %v6370_v39, %v1618_v53  ;;  %5470 = vtanh.f32 %v2022_v29  ;;  %v2281_v8 = vmul.f32 %v5461_v15, %v6216_v20 }
 0x25b   :  { %2442 = vadd.xlane.f32.xlu1 %v2269_v55  ;;  %2468 = vadd.xlane.f32.xlu0 %v2282_v57  ;;  %5472 = vtanh.f32 %v2025_v27  ;;  %v5463_v17 = vpop.eup %5462  ;;  %v6418_v57 = vand.u32 127, %v1876_v51 }
 0x25c   :  { %5474 = vtanh.f32 %v2028_v52  ;;  %v2286_v30 = vmul.f32 %v5463_v17, %v6216_v20 }
 0x25d   :  { %v5465_v19 = vpop.eup %5464  ;;  %v2753_v51 = vadd.s32 4294967280, %v6418_v57 }
 0x25e   :  { %v4850_v5 = vpop.f32.mrb[72].mxu1  ;;  %v5467_v25 = vpop.eup %5466  ;;  %v2287_v31 = vmul.f32 %v5465_v19, %v6216_v20 }
 0x25f   :  { %v2031_v6 = vadd.f32 %v4850_v5, %v6370_v39  ;;  %v1631_v7 = vpop.f32.mrb[73].mxu1  ;;  %2464 = vadd.xlane.f32.xlu0 %v2280_v2  ;;  %2448 = vadd.xlane.f32.xlu1 %v2272_v3  ;;  %v2284_v37 = vmul.f32 %v5467_v25, %v6216_v20 }
 0x260   :  { %v2029_v9 = vadd.f32 %v6370_v39, %v1631_v7  ;;  %v4851_v10 = vpop.f32.mrb[74].mxu1 }
 0x261   :  { %v2032_v11 = vadd.f32 %v4851_v10, %v6370_v39  ;;  %v1634_v12 = vpop.f32.mrb[75].mxu1  ;;  %5476 = vtanh.f32 %v2031_v6 }
 0x262   :  { %v2030_v16 = vadd.f32 %v6370_v39, %v1634_v12  ;;  %5478 = vtanh.f32 %v2026_v62  ;;  %v2746_v12 = vadd.s32 4294967288, %v6418_v57 }
 0x263   :  { %2470 = vadd.xlane.f32.xlu0 %v2283_v13  ;;  %2456 = vadd.xlane.f32.xlu1 %v2276_v14  ;;  %v5469_v33 = vpop.eup %5468  ;;  %5480 = vtanh.f32 %v2032_v11  ;;  %v2767_v11 = vadd.s32 4294967264, %v6418_v57 }
 0x264   :  { %v5471_v36 = vpop.eup %5470  ;;  %v2290_v29 = vmul.f32 %v5469_v33, %v6216_v20  ;;  %5482 = vtanh.f32 %v2029_v9  ;;  %v2760_v9 = vadd.s32 4294967272, %v6418_v57 }
 0x265   :  { %v5473_v38 = vpop.eup %5472  ;;  %5484 = vtanh.f32 %v2030_v16  ;;  %v2285_v50 = vmul.f32 %v5471_v36, %v6216_v20  ;;  %v6460_v25 = vsub.s32 %v2767_v11, %v6186_v54 }
 0x266   :  { %v4854_v21 = vpop.f32.mrb[76].mxu1  ;;  %v5475_v48 = vpop.eup %5474  ;;  %v2288_v52 = vmul.f32 %v5473_v38, %v6216_v20 }
 0x267   :  { %v2035_v35 = vadd.f32 %v4854_v21, %v6370_v39  ;;  %v1647_v23 = vpop.f32.mrb[77].mxu1  ;;  %2466 = vadd.xlane.f32.xlu0 %v2281_v8  ;;  %2458 = vadd.xlane.f32.xlu1 %v2277_v18  ;;  %v2291_v2 = vmul.f32 %v5475_v48, %v6216_v20  ;;  %v2774_v8 = vadd.s32 4294967256, %v6418_v57  ;;  %v2781_v21 = vadd.s32 4294967248, %v6418_v57 }
 0x268   :  { %v2033_v26 = vadd.f32 %v6370_v39, %v1647_v23  ;;  %v4855_v58 = vpop.f32.mrb[78].mxu1  ;;  %v6454_v23 = vsub.s32 %v6418_v57, %v6186_v54 }
 0x269   :  { %v6393_v28 = vadd.f32 %v4855_v58, %v6370_v39  ;;  %v1650_v24 = vpop.f32.mrb[79].mxu1  ;;  %5486 = vtanh.f32 %v2035_v35  ;;  %v6450_v35 = vsub.s32 %v2753_v51, %v6186_v54  ;;  %v6457_v58 = vsub.s32 %v2760_v9, %v6186_v54 }
 0x26a   :  { %v6398_v34 = vadd.f32 %v6370_v39, %v1650_v24  ;;  %v6468_v36 = vsub.s32 %v2774_v8, %v6186_v54 }
 0x26b   :  { %2476 = vadd.xlane.f32.xlu0 %v2286_v30  ;;  %2478 = vadd.xlane.f32.xlu1 %v2287_v31  ;;  %v5477_v53 = vpop.eup %5476 }
 0x26c   :  { %v5479_v62 = vpop.eup %5478  ;;  %v2294_v3 = vmul.f32 %v5477_v53, %v6216_v20 }
 0x26d   :  { %v2289_v16 = vmul.f32 %v5479_v62, %v6216_v20 }
 0x26e   :  { %v4858_v40 = vpop.f32.mrb[80].mxu1 }
 0x26f   :  { %v2039_v43 = vadd.f32 %v4858_v40, %v6370_v39  ;;  %v1663_v44 = vpop.f32.mrb[81].mxu1  ;;  %2472 = vadd.xlane.f32.xlu0 %v2284_v37  ;;  %2484 = vadd.xlane.f32.xlu1 %v2290_v29  ;;  %v6471_v29 = vsub.s32 %v2781_v21, %v6186_v54 }
 0x270   :  { %v6406_v46 = vadd.f32 %v6370_v39, %v1663_v44  ;;  %v4859_v47 = vpop.f32.mrb[82].mxu1  ;;  %v2795_v44 = vadd.s32 4294967232, %v6418_v57 }
 0x271   :  { %v2040_v27 = vadd.f32 %v4859_v47, %v6370_v39  ;;  %v1666_v49 = vpop.f32.mrb[83].mxu1  ;;  %5488 = vtanh.f32 %v2039_v43 }
 0x272   :  { %v6415_v55 = vadd.f32 %v6370_v39, %v1666_v49  ;;  %v5481_v39 = vpop.eup %5480  ;;  %5490 = vtanh.f32 %v2033_v26 }
 0x273   :  { %v6420_v61 = vpop.xlane.xlu0 %2356  ;;  %2474 = vadd.xlane.f32.xlu0 %v2285_v50  ;;  %2480 = vadd.xlane.f32.xlu1 %v2288_v52  ;;  %5492 = vtanh.f32 %v2040_v27  ;;  %v5483_v13 = vpop.eup %5482  ;;  %v2295_v17 = vmul.f32 %v5481_v39, %v6216_v20 }
 0x274   :  { %v5485_v18 = vpop.eup %5484  ;;  %5494 = vtanh.f32 %v6393_v28  ;;  %v6463_v28 = vsub.s32 %v2746_v12, %v6186_v54  ;;  %v2292_v31 = vmul.f32 %v5483_v13, %v6216_v20  ;;  %v2757_v47 = vrot.slane %v6420_v61, %v6450_v35 }
 0x275   :  { %v5487_v30 = vpop.eup %5486  ;;  %v2293_v33 = vmul.f32 %v5485_v18, %v6216_v20  ;;  %v2788_v20 = vadd.s32 4294967240, %v6418_v57 }
 0x276   :  { %v4862_v4 = vpop.f32.mrb[84].mxu1 }
 0x277   :  { %v6430_v5 = vadd.f32 %v4862_v4, %v6424_v1  ;;  %v1679_v6 = vpop.f32.mrb[85].mxu1  ;;  %v6432_v7 = vpop.xlane.xlu0 %2352  ;;  %2486 = vadd.xlane.f32.xlu0 %v2291_v2  ;;  %2492 = vadd.xlane.f32.xlu1 %v2294_v3  ;;  %v6487_v2 = vld [vmem:[%s7197_s6] ss:$0 sm:$0xff] }
 0x278   :  { %v2041_v10 = vadd.f32 %v6424_v1, %v1679_v6  ;;  %v4863_v63 = vpop.f32.mrb[86].mxu1  ;;  %v2745_v48 = vrot.slane %v6432_v7, %v6454_v23  ;;  %v2298_v3 = vmul.f32 %v6487_v2, %v5487_v30 }
 0x279   :  { %v6439_v14 = vadd.f32 %v4863_v63, %v6424_v1  ;;  %v1682_v15 = vpop.f32.mrb[87].mxu1  ;;  %v6498_v63 = vsub.s32 %v2788_v20, %v6186_v54 }
 0x27a   :  { %v6445_v19 = vadd.f32 %v6424_v1, %v1682_v15  ;;  %5496 = vtanh.f32 %v2041_v10  ;;  %v6505_v15 = vsub.s32 %v2795_v44, %v6186_v54 }
 0x27b   :  { %v2359_v26 = vpop.xlane.xlu0 %2358  ;;  %2482 = vadd.xlane.f32.xlu0 %v2289_v16  ;;  %2494 = vadd.xlane.f32.xlu1 %v2295_v17  ;;  %v5489_v59 = vpop.eup %5488  ;;  %5498 = vtanh.f32 %v6398_v34 }
 0x27c   :  { %v2361_v24 = vpop.xlane.xlu1 %2360  ;;  %v5491_v52 = vpop.eup %5490  ;;  %v2302_v61 = vmul.f32 %v6487_v2, %v5489_v59  ;;  %v2764_v4 = vrot.slane %v2359_v26, %v6457_v58  ;;  %v2802_v59 = vadd.s32 4294967224, %v6418_v57 }
 0x27d   :  { %v5493_v39 = vpop.eup %5492  ;;  %v2771_v7 = vrot.slane %v2361_v24, %v6460_v25  ;;  %v2296_v18 = vmul.f32 %v6487_v2, %v5491_v52 }
 0x27e   :  { %v4866_v37 = vpop.f32.mrb[88].mxu1  ;;  %v2303_v8 = vmul.f32 %v6487_v2, %v5493_v39 }
 0x27f   :  { %v2047_v38 = vadd.f32 %v4866_v37, %v6424_v1  ;;  %v1695_v40 = vpop.f32.mrb[89].mxu1  ;;  %v2355_v43 = vpop.xlane.xlu0 %2354  ;;  %2488 = vadd.xlane.f32.xlu0 %v2292_v31  ;;  %2490 = vadd.xlane.f32.xlu1 %v2293_v33 }
 0x280   :  { %v2045_v27 = vadd.f32 %v6424_v1, %v1695_v40  ;;  %v2750_v34 = vrot.slane %v2355_v43, %v6463_v28  ;;  %v4867_v49 = vpop.f32.mrb[90].mxu1  ;;  %v2363_v50 = vpop.xlane.xlu1 %2362 }
 0x281   :  { %5500 = vtanh.f32 %v2047_v38  ;;  %v2048_v53 = vadd.f32 %v4867_v49, %v6424_v1  ;;  %v1698_v62 = vpop.f32.mrb[91].mxu1  ;;  %v2778_v12 = vrot.slane %v2363_v50, %v6468_v36  ;;  %v2809_v49 = vadd.s32 4294967216, %v6418_v57 }
 0x282   :  { %v2752_v51 = vsel %vm2751_vm1, %v2750_v34, %v2745_v48  ;;  %v2046_v6 = vadd.f32 %v6424_v1, %v1698_v62  ;;  %5502 = vtanh.f32 %v6406_v46  ;;  %v5495_v46 = vpop.eup %5494 }
 0x283   :  { %v2759_v9 = vsel %vm2758_vm2, %v2757_v47, %v2752_v51  ;;  %v2365_v10 = vpop.xlane.xlu0 %2364  ;;  %2508 = vadd.xlane.f32.xlu0 %v2302_v61  ;;  %2500 = vadd.xlane.f32.xlu1 %v2298_v3  ;;  %5504 = vtanh.f32 %v2045_v27  ;;  %v2299_v20 = vmul.f32 %v6487_v2, %v5495_v46  ;;  %v2816_v61 = vadd.s32 4294967208, %v6418_v57 }
 0x284   :  { %v2766_v11 = vsel %vm2765_vm3, %v2764_v4, %v2759_v9  ;;  %v6502_v13 = vpop.xlane.xlu1 %2372  ;;  %v2785_v17 = vrot.slane %v2365_v10, %v6471_v29  ;;  %v5497_v21 = vpop.eup %5496  ;;  %5506 = vtanh.f32 %v6415_v55  ;;  %v6538_v10 = vsub.s32 %v2809_v49, %v6186_v54 }
 0x285   :  { %v2773_v16 = vsel %vm2772_vm4, %v2771_v7, %v2766_v11  ;;  %5508 = vtanh.f32 %v2048_v53  ;;  %v5499_v44 = vpop.eup %5498  ;;  %v2304_v34 = vmul.f32 %v6487_v2, %v5497_v21  ;;  %v6533_v7 = vsub.s32 %v2802_v59, %v6186_v54 }
 0x286   :  { %v2780_v26 = vsel %vm2779_vm5, %v2778_v12, %v2773_v16  ;;  %v4870_v24 = vpop.f32.mrb[92].mxu1  ;;  %5510 = vtanh.f32 %v6430_v5  ;;  %v2297_v51 = vmul.f32 %v6487_v2, %v5499_v44  ;;  %v1918_v5 = vcombine.high %v6362_v32, %v6362_v32 }
 0x287   :  { %v2051_v30 = vadd.f32 %v4870_v24, %v6424_v1  ;;  %v1711_v31 = vpop.f32.mrb[93].mxu1  ;;  %v2367_v33 = vpop.xlane.xlu0 %2366  ;;  %2510 = vadd.xlane.f32.xlu0 %v2303_v8  ;;  %2496 = vadd.xlane.f32.xlu1 %v2296_v18  ;;  %v2787_v55 = vsel %vm2786_vm6, %v2785_v17, %v2780_v26  ;;  %5512 = vtanh.f32 %v2046_v6  ;;  %v6542_v6 = vsub.s32 %v2816_v61, %v6186_v54 }
 0x288   :  { %v2049_v37 = vadd.f32 %v6424_v1, %v1711_v31  ;;  %v2792_v38 = vrot.slane %v2367_v33, %v6498_v63  ;;  %v4871_v40 = vpop.f32.mrb[94].mxu1  ;;  %v2369_v43 = vpop.xlane.xlu1 %2368  ;;  %5514 = vtanh.f32 %v6439_v14  ;;  %v2823_v8 = vadd.s32 4294967200, %v6418_v57 }
 0x289   :  { %v2052_v47 = vadd.f32 %v4871_v40, %v6424_v1  ;;  %v2799_v48 = vrot.slane %v2369_v43, %v6505_v15  ;;  %v1714_v27 = vpop.f32.mrb[95].mxu1  ;;  %5516 = vtanh.f32 %v2051_v30  ;;  %v2813_v33 = vrot.slane %v6502_v13, %v6538_v10 }
 0x28a   :  { %v2794_v50 = vsel %vm2793_vm7, %v2792_v38, %v2787_v55  ;;  %v6525_v52 = vadd.f32 %v6424_v1, %v1714_v27  ;;  %5518 = vtanh.f32 %v6445_v19  ;;  %v6562_v43 = vrot.slane %v1918_v5, %v6200_v60 }
 0x28b   :  { %v5501_v53 = vpop.eup %5500  ;;  %v2801_v62 = vsel %vm2800_vm8, %v2799_v48, %v2794_v50  ;;  %2502 = vadd.xlane.f32.xlu1 %v2299_v20  ;;  %2512 = vadd.xlane.f32.xlu0 %v2304_v34  ;;  %5520 = vtanh.f32 %v2049_v37  ;;  %v6570_v19 = vsub.s32 %v2823_v8, %v6186_v54  ;;  %v2830_v61 = vadd.s32 4294967192, %v6418_v57 }
 0x28c   :  { %v2375_v3 = vpop.xlane.xlu1 %2374  ;;  %v2310_v39 = vmul.f32 %v6487_v2, %v5501_v53  ;;  %v5503_v4 = vpop.eup %5502  ;;  %5522 = vtanh.f32 %v2052_v47 }
 0x28d   :  { %v5505_v9 = vpop.eup %5504  ;;  %v2300_v24 = vmul.f32 %v6487_v2, %v5503_v4  ;;  %v2820_v38 = vrot.slane %v2375_v3, %v6542_v6 }
 0x28e   :  { %v4874_v11 = vpop.f32.mrb[96].mxu1  ;;  %v5507_v18 = vpop.eup %5506  ;;  %v2308_v31 = vmul.f32 %v6487_v2, %v5505_v9 }
 0x28f   :  { %v2055_v12 = vadd.f32 %v4874_v11, %v6424_v1  ;;  %v1727_v46 = vpop.f32.mrb[97].mxu1  ;;  %2498 = vadd.xlane.f32.xlu1 %v2297_v51  ;;  %2524 = vadd.xlane.f32.xlu0 %v2310_v39  ;;  %v5509_v30 = vpop.eup %5508  ;;  %v2837_v11 = vadd.s32 4294967184, %v6418_v57 }
 0x290   :  { %v6546_v16 = vadd.f32 %v6424_v1, %v1727_v46  ;;  %v4875_v32 = vpop.f32.mrb[98].mxu1  ;;  %v2371_v17 = vpop.xlane.xlu1 %2370  ;;  %v2311_v55 = vmul.f32 %v6487_v2, %v5509_v30 }
 0x291   :  { %v6550_v14 = vadd.f32 %v4875_v32, %v6424_v1  ;;  %v2806_v21 = vrot.slane %v2371_v17, %v6533_v7  ;;  %v1730_v26 = vpop.f32.mrb[99].mxu1  ;;  %v5511_v13 = vpop.eup %5510  ;;  %5524 = vtanh.f32 %v2055_v12  ;;  %v2844_v32 = vadd.s32 4294967176, %v6418_v57 }
 0x292   :  { %v2054_v59 = vadd.f32 %v6424_v1, %v1730_v26  ;;  %v2301_v1 = vmul.f32 %v6487_v2, %v5507_v18  ;;  %v5513_v27 = vpop.eup %5512  ;;  %v2306_v51 = vmul.f32 %v6487_v2, %v5511_v13  ;;  %5526 = vtanh.f32 %v6525_v52 }
 0x293   :  { %v2808_v40 = vsel %vm2807_vm9, %v2806_v21, %v2801_v62  ;;  %2504 = vadd.xlane.f32.xlu1 %v2300_v24  ;;  %2520 = vadd.xlane.f32.xlu0 %v2308_v31  ;;  %v5515_v3 = vpop.eup %5514  ;;  %v2309_v9 = vmul.f32 %v6487_v2, %v5513_v27  ;;  %v6594_v24 = vsub.s32 %v2830_v61, %v6186_v54 }
 0x294   :  { %v2815_v20 = vsel %vm2814_vm10, %v2813_v33, %v2808_v40  ;;  %v6565_v44 = vpop.xlane.xlu1 %2380  ;;  %v5517_v5 = vpop.eup %5516  ;;  %5528 = vtanh.f32 %v2054_v59  ;;  %v2307_v21 = vmul.f32 %v6487_v2, %v5515_v3  ;;  %v6597_v52 = vsub.s32 %v2837_v11, %v6186_v54 }
 0x295   :  { %v2822_v48 = vsel %vm2821_vm11, %v2820_v38, %v2815_v20  ;;  %v5519_v18 = vpop.eup %5518  ;;  %v2314_v26 = vmul.f32 %v6487_v2, %v5517_v5  ;;  %5530 = vtanh.f32 %v6546_v16  ;;  %v6601_v33 = vsub.s32 %v2844_v32, %v6186_v54 }
 0x296   :  { %v4878_v34 = vpop.f32.mrb[100].mxu1  ;;  %v5521_v31 = vpop.eup %5520 }
 0x297   :  { %v6574_v49 = vadd.f32 %v4878_v34, %v6562_v43  ;;  %v1743_v37 = vpop.f32.mrb[101].mxu1  ;;  %2506 = vadd.xlane.f32.xlu1 %v2301_v1  ;;  %2526 = vadd.xlane.f32.xlu0 %v2311_v55  ;;  %v5523_v1 = vpop.eup %5522  ;;  %v2305_v34 = vmul.f32 %v6487_v2, %v5519_v18 }
 0x298   :  { %v6577_v50 = vadd.f32 %v6562_v43, %v1743_v37  ;;  %v4879_v53 = vpop.f32.mrb[102].mxu1  ;;  %v2377_v62 = vpop.xlane.xlu1 %2376  ;;  %v2312_v37 = vmul.f32 %v6487_v2, %v5521_v31 }
 0x299   :  { %v2060_v39 = vadd.f32 %v4879_v53, %v6562_v43  ;;  %v2827_v47 = vrot.slane %v2377_v62, %v6570_v19  ;;  %v1746_v4 = vpop.f32.mrb[103].mxu1  ;;  %v2841_v62 = vrot.slane %v6565_v44, %v6597_v52 }
 0x29a   :  { %v2058_v12 = vadd.f32 %v6562_v43, %v1746_v4 }
 0x29b   :  { %v2829_v46 = vsel %vm7209_vm12, %v2827_v47, %v2822_v48  ;;  %2516 = vadd.xlane.f32.xlu1 %v2306_v51  ;;  %2522 = vadd.xlane.f32.xlu0 %v2309_v9  ;;  %5532 = vtanh.f32 %v2060_v39  ;;  %v5525_v53 = vpop.eup %5524 }
 0x29c   :  { %v2383_v17 = vpop.xlane.xlu1 %2382  ;;  %v6589_v8 = vpop.xlane.xlu0 %2392  ;;  %5534 = vtanh.f32 %v6550_v14  ;;  %v2318_v5 = vmul.f32 %v6487_v2, %v5525_v53  ;;  %v2315_v14 = vmul.f32 %v6487_v2, %v5523_v1 }
 0x29d   :  { %v2848_v3 = vrot.slane %v2383_v17, %v6601_v33  ;;  %5536 = vtanh.f32 %v2058_v12  ;;  %v5527_v51 = vpop.eup %5526 }
 0x29e   :  { %v4882_v30 = vpop.f32.mrb[104].mxu1  ;;  %v5529_v11 = vpop.eup %5528  ;;  %5538 = vtanh.f32 %v6574_v49 }
 0x29f   :  { %v2063_v59 = vadd.f32 %v4882_v30, %v6562_v43  ;;  %v1759_v38 = vpop.f32.mrb[105].mxu1  ;;  %2518 = vadd.xlane.f32.xlu1 %v2307_v21  ;;  %2532 = vadd.xlane.f32.xlu0 %v2314_v26  ;;  %v5531_v26 = vpop.eup %5530  ;;  %v2317_v49 = vmul.f32 %v6487_v2, %v5529_v11 }
 0x2a0   :  { %v2061_v40 = vadd.f32 %v6562_v43, %v1759_v38  ;;  %v4883_v20 = vpop.f32.mrb[106].mxu1  ;;  %v2379_v13 = vpop.xlane.xlu1 %2378 }
 0x2a1   :  { %v2064_v55 = vadd.f32 %v4883_v20, %v6562_v43  ;;  %v2834_v16 = vrot.slane %v2379_v13, %v6594_v24  ;;  %v6607_v48 = vpop.xlane.xlu0 %2394  ;;  %v1762_v27 = vpop.f32.mrb[107].mxu1  ;;  %5540 = vtanh.f32 %v2063_v59  ;;  %v2313_v20 = vmul.f32 %v6487_v2, %v5527_v51 }
 0x2a2   :  { %v6614_v61 = vadd.f32 %v6562_v43, %v1762_v27  ;;  %5542 = vtanh.f32 %v6577_v50 }
 0x2a3   :  { %v2836_v39 = vsel %vm2835_vm13, %v2834_v16, %v2829_v46  ;;  %2514 = vadd.xlane.f32.xlu1 %v2305_v34  ;;  %2528 = vadd.xlane.f32.xlu0 %v2312_v37  ;;  %5544 = vtanh.f32 %v2061_v40  ;;  %v2316_v37 = vmul.f32 %v6487_v2, %v5531_v26 }
 0x2a4   :  { %v2843_v47 = vsel %vm2842_vm14, %v2841_v62, %v2836_v39  ;;  %v6620_v4 = vpop.xlane.xlu1 %2388  ;;  %5546 = vtanh.f32 %v2064_v55 }
 0x2a5   :  { %v6623_v44 = vsel %vm2849_vm15, %v2848_v3, %v2843_v47  ;;  %v6625_v9 = vpop.xlane.xlu0 %2404  ;;  %v5533_v13 = vpop.eup %5532  ;;  %v1920_v3 = vcombine.high %v6409_v22, %v6409_v22  ;;  %v2863_v55 = vrot.slane %v6620_v4, %v6450_v35  ;;  %v2878_v4 = vrot.slane %v6607_v48, %v6468_v36 }
 0x2a6   :  { %v4886_v32 = vpop.f32.mrb[108].mxu1  ;;  %v5535_v16 = vpop.eup %5534  ;;  %v2323_v34 = vmul.f32 %v6487_v2, %v5533_v13 }
 0x2a7   :  { %v6631_v12 = vadd.f32 %v4886_v32, %v6562_v43  ;;  %v1775_v46 = vpop.f32.mrb[109].mxu1  ;;  %2540 = vadd.xlane.f32.xlu1 %v2318_v5  ;;  %2534 = vadd.xlane.f32.xlu0 %v2315_v14  ;;  %v5537_v53 = vpop.eup %5536  ;;  %v2319_v5 = vmul.f32 %v6487_v2, %v5535_v16  ;;  %v2873_v16 = vrot.slane %v6589_v8, %v6460_v25 }
 0x2a8   :  { %v6634_v17 = vadd.f32 %v6562_v43, %v1775_v46  ;;  %v4887_v18 = vpop.f32.mrb[110].mxu1  ;;  %v2385_v21 = vpop.xlane.xlu1 %2384  ;;  %v2321_v26 = vmul.f32 %v6487_v2, %v5537_v53 }
 0x2a9   :  { %v6637_v31 = vadd.f32 %v4887_v18, %v6562_v43  ;;  %v6639_v30 = vpop.xlane.xlu0 %2400  ;;  %v1778_v38 = vpop.f32.mrb[111].mxu1  ;;  %v2854_v11 = vrot.slane %v2385_v21, %v6454_v23 }
 0x2aa   :  { %v6644_v1 = vadd.f32 %v6562_v43, %v1778_v38  ;;  %v5539_v14 = vpop.eup %5538 }
 0x2ab   :  { %2538 = vadd.xlane.f32.xlu1 %v2317_v49  ;;  %2530 = vadd.xlane.f32.xlu0 %v2313_v20  ;;  %v5541_v38 = vpop.eup %5540  ;;  %v6668_v20 = vrot.slane %v1920_v3, %v6200_v60  ;;  %v2322_v3 = vmul.f32 %v6487_v2, %v5539_v14 }
 0x2ac   :  { %v2391_v59 = vpop.xlane.xlu1 %2390 }
 0x2ad   :  { %v6647_v27 = vpop.xlane.xlu0 %2406  ;;  %v2868_v21 = vrot.slane %v2391_v59, %v6457_v58 }
 0x2ae   :  { %v4890_v62 = vpop.f32.mrb[112].mxu1 }
 0x2af   :  { %v6654_v39 = vadd.f32 %v4890_v62, %v6562_v43  ;;  %v1791_v50 = vpop.f32.mrb[113].mxu1  ;;  %2550 = vadd.xlane.f32.xlu1 %v2323_v34  ;;  %2536 = vadd.xlane.f32.xlu0 %v2316_v37  ;;  %v5543_v37 = vpop.eup %5542  ;;  %v2326_v62 = vmul.f32 %v6487_v2, %v5541_v38 }
 0x2b0   :  { %v2069_v40 = vadd.f32 %v6562_v43, %v1791_v50  ;;  %v4891_v47 = vpop.f32.mrb[114].mxu1  ;;  %v2387_v51 = vpop.xlane.xlu1 %2386 }
 0x2b1   :  { %v6660_v32 = vadd.f32 %v4891_v47, %v6562_v43  ;;  %v2403_v22 = vpop.xlane.xlu0 %2402  ;;  %v2858_v46 = vrot.slane %v2387_v51, %v6463_v28  ;;  %v1794_v18 = vpop.f32.mrb[115].mxu1 }
 0x2b2   :  { %5548 = vtanh.f32 %v2069_v40  ;;  %v2070_v49 = vadd.f32 %v6562_v43, %v1794_v18  ;;  %v5545_v50 = vpop.eup %5544  ;;  %v2320_v18 = vmul.f32 %v6487_v2, %v5543_v37  ;;  %v2903_v37 = vrot.slane %v6625_v9, %v6538_v10 }
 0x2b3   :  { %5550 = vtanh.f32 %v6614_v61  ;;  %v2859_v13 = vsel %vm2751_vm1, %v2858_v46, %v2854_v11  ;;  %2546 = vadd.xlane.f32.xlu1 %v2321_v26  ;;  %2542 = vadd.xlane.f32.xlu0 %v2319_v5 }
 0x2b4   :  { %v2864_v34 = vsel %vm2758_vm2, %v2863_v55, %v2859_v13  ;;  %5552 = vtanh.f32 %v2070_v49  ;;  %v2397_v43 = vpop.xlane.xlu1 %2396  ;;  %v5547_v13 = vpop.eup %5546 }
 0x2b5   :  { %v2869_v53 = vsel %vm2765_vm3, %v2868_v21, %v2864_v34  ;;  %v6679_v61 = vpop.xlane.xlu0 %2412  ;;  %v2883_v59 = vrot.slane %v2397_v43, %v6471_v29  ;;  %5554 = vtanh.f32 %v6631_v12  ;;  %v2324_v21 = vmul.f32 %v6487_v2, %v5545_v50 }
 0x2b6   :  { %v2874_v8 = vsel %vm2772_vm4, %v2873_v16, %v2869_v53  ;;  %v4894_v40 = vpop.f32.mrb[116].mxu1  ;;  %v2893_v12 = vrot.slane %v6639_v30, %v6505_v15 }
 0x2b7   :  { %v2879_v48 = vsel %vm2779_vm5, %v2878_v4, %v2874_v8  ;;  %v2075_v47 = vadd.f32 %v4894_v40, %v6668_v20  ;;  %v1807_v51 = vpop.f32.mrb[117].mxu1  ;;  %2556 = vadd.xlane.f32.xlu1 %v2326_v62  ;;  %2548 = vadd.xlane.f32.xlu0 %v2322_v3  ;;  %v2898_v4 = vrot.slane %v2403_v22, %v6533_v7 }
 0x2b8   :  { %v2884_v5 = vsel %vm2786_vm6, %v2883_v59, %v2879_v48  ;;  %v6690_v11 = vadd.f32 %v6668_v20, %v1807_v51  ;;  %v4895_v46 = vpop.f32.mrb[118].mxu1  ;;  %v2399_v14 = vpop.xlane.xlu1 %2398  ;;  %v2908_v62 = vrot.slane %v6647_v27, %v6542_v6  ;;  %v2327_v3 = vmul.f32 %v6487_v2, %v5547_v13 }
 0x2b9   :  { %5556 = vtanh.f32 %v2075_v47  ;;  %v2076_v26 = vadd.f32 %v4895_v46, %v6668_v20  ;;  %v2409_v38 = vpop.xlane.xlu0 %2408  ;;  %v2888_v55 = vrot.slane %v2399_v14, %v6498_v63  ;;  %v1810_v49 = vpop.f32.mrb[119].mxu1 }
 0x2ba   :  { %v2074_v16 = vadd.f32 %v6668_v20, %v1810_v49  ;;  %5558 = vtanh.f32 %v6634_v17  ;;  %v2913_v40 = vrot.slane %v2409_v38, %v6570_v19 }
 0x2bb   :  { %v2889_v34 = vsel %vm2793_vm7, %v2888_v55, %v2884_v5  ;;  %2552 = vadd.xlane.f32.xlu1 %v2324_v21  ;;  %2544 = vadd.xlane.f32.xlu0 %v2320_v18  ;;  %5560 = vtanh.f32 %v2076_v26 }
 0x2bc   :  { %v5549_v43 = vpop.eup %5548  ;;  %v2894_v53 = vsel %vm2800_vm8, %v2893_v12, %v2889_v34  ;;  %v6705_v59 = vpop.xlane.xlu1 %2422  ;;  %5562 = vtanh.f32 %v6637_v31 }
 0x2bd   :  { %v5551_v30 = vpop.eup %5550  ;;  %v2899_v17 = vsel %vm2807_vm9, %v2898_v4, %v2894_v53  ;;  %v2415_v22 = vpop.xlane.xlu0 %2414  ;;  %v2332_v50 = vmul.f32 %v6487_v2, %v5549_v43  ;;  %5564 = vtanh.f32 %v2074_v16  ;;  %v2923_v4 = vrot.slane %v6679_v61, %v6597_v52 }
 0x2be   :  { %v5553_v8 = vpop.eup %5552  ;;  %v4898_v9 = vpop.f32.mrb[120].mxu1  ;;  %v2904_v48 = vsel %vm2814_vm10, %v2903_v37, %v2899_v17  ;;  %v2325_v31 = vmul.f32 %v6487_v2, %v5551_v30  ;;  %5566 = vtanh.f32 %v6644_v1  ;;  %v2928_v34 = vrot.slane %v2415_v22, %v6601_v33 }
 0x2bf   :  { %v2079_v47 = vadd.f32 %v4898_v9, %v6668_v20  ;;  %v1823_v51 = vpop.f32.mrb[121].mxu1  ;;  %2558 = vadd.xlane.f32.xlu1 %v2327_v3  ;;  %2568 = vadd.xlane.f32.xlu0 %v2332_v50  ;;  %v2909_v27 = vsel %vm2821_vm11, %v2908_v62, %v2904_v48  ;;  %v2333_v49 = vmul.f32 %v6487_v2, %v5553_v8  ;;  %v5555_v21 = vpop.eup %5554 }
 0x2c0   :  { %v2077_v5 = vadd.f32 %v6668_v20, %v1823_v51  ;;  %v4899_v46 = vpop.f32.mrb[122].mxu1  ;;  %v2914_v14 = vsel %vm7209_vm12, %v2913_v40, %v2909_v27  ;;  %v2419_v18 = vpop.xlane.xlu1 %2418  ;;  %v2330_v1 = vmul.f32 %v6487_v2, %v5555_v21 }
 0x2c1   :  { %v2080_v26 = vadd.f32 %v4899_v46, %v6668_v20  ;;  %v2411_v38 = vpop.xlane.xlu0 %2410  ;;  %v1826_v55 = vpop.f32.mrb[123].mxu1  ;;  %5568 = vtanh.f32 %v2079_v47 }
 0x2c2   :  { %v2918_v13 = vrot.slane %v2411_v38, %v6594_v24  ;;  %v2078_v12 = vadd.f32 %v6668_v20, %v1826_v55  ;;  %5570 = vtanh.f32 %v6654_v39  ;;  %v2937_v55 = vrot.slane %v2419_v18, %v6463_v28 }
 0x2c3   :  { %v5557_v16 = vpop.eup %5556  ;;  %2554 = vadd.xlane.f32.xlu1 %v2325_v31  ;;  %2570 = vadd.xlane.f32.xlu0 %v2333_v49  ;;  %5572 = vtanh.f32 %v2077_v5 }
 0x2c4   :  { %v2919_v43 = vsel %vm2835_vm13, %v2918_v13, %v2914_v14  ;;  %v6729_v37 = vpop.xlane.xlu1 %2424  ;;  %v2338_v53 = vmul.f32 %v6487_v2, %v5557_v16  ;;  %v5559_v30 = vpop.eup %5558  ;;  %5574 = vtanh.f32 %v6690_v11  ;;  %v2947_v11 = vrot.slane %v6705_v59, %v6457_v58 }
 0x2c5   :  { %v2924_v62 = vsel %vm2842_vm14, %v2923_v4, %v2919_v43  ;;  %v2421_v17 = vpop.xlane.xlu0 %2420  ;;  %v5561_v3 = vpop.eup %5560  ;;  %5576 = vtanh.f32 %v2080_v26  ;;  %v2952_v59 = vrot.slane %v6729_v37, %v6460_v25 }
 0x2c6   :  { %v2929_v61 = vsel %vm2849_vm15, %v2928_v34, %v2924_v62  ;;  %v4902_v50 = vpop.f32.mrb[124].mxu1  ;;  %v5563_v51 = vpop.eup %5562  ;;  %v2339_v14 = vmul.f32 %v6487_v2, %v5561_v3  ;;  %v2942_v49 = vrot.slane %v2421_v17, %v6450_v35  ;;  %5578 = vtanh.f32 %v6660_v32 }
 0x2c7   :  { %v6738_v22 = vsel %vm7207_vm0, %v2929_v61, %v6623_v44  ;;  %v2083_v8 = vadd.f32 %v4902_v50, %v6668_v20  ;;  %v1839_v40 = vpop.f32.mrb[125].mxu1  ;;  %2564 = vadd.xlane.f32.xlu1 %v2330_v1  ;;  %2580 = vadd.xlane.f32.xlu0 %v2338_v53  ;;  %v2328_v44 = vmul.f32 %v6487_v2, %v5559_v30  ;;  %v5565_v38 = vpop.eup %5564  ;;  %5580 = vtanh.f32 %v2078_v12 }
 0x2c8   :  { %v6742_v9 = vadd.f32 %v6668_v20, %v1839_v40  ;;  %v4903_v48 = vpop.f32.mrb[126].mxu1  ;;  %v6744_v47 = vpop.xlane.xlu1 %2430  ;;  %v2331_v34 = vmul.f32 %v6487_v2, %v5563_v51  ;;  %v2337_v43 = vmul.f32 %v6487_v2, %v5565_v38  ;;  %vm7208_vm0 = vcmask 1042434  }
 0x2c9   :  { %v2084_v27 = vadd.f32 %v4903_v48, %v6668_v20  ;;  %v2417_v39 = vpop.xlane.xlu0 %2416  ;;  %v1842_v46 = vpop.f32.mrb[127].mxu1  ;;  %5582 = vtanh.f32 %v2083_v8  ;;  %v2967_v37 = vrot.slane %v6744_v47, %v6498_v63 }
 0x2ca   :  { %v2933_v5 = vrot.slane %v2417_v39, %v6454_v23  ;;  %v6752_v31 = vadd.f32 %v6668_v20, %v1842_v46  ;;  %v5567_v16 = vpop.eup %5566 }
 0x2cb   :  { %2560 = vadd.xlane.f32.xlu1 %v2328_v44  ;;  %2582 = vadd.xlane.f32.xlu0 %v2339_v14  ;;  %v5569_v53 = vpop.eup %5568  ;;  %v2329_v51 = vmul.f32 %v6487_v2, %v5567_v16  ;;  %5584 = vtanh.f32 %v2084_v27 }
 0x2cc   :  { %v2938_v21 = vsel %vm2751_vm1, %v2937_v55, %v2933_v5  ;;  %v6757_v13 = vpop.xlane.xlu1 %2436  ;;  %v5571_v50 = vpop.eup %5570  ;;  %v2342_v39 = vmul.f32 %v6487_v2, %v5569_v53  ;;  %5586 = vtanh.f32 %v6742_v9 }
 0x2cd   :  { %v2943_v4 = vsel %vm2758_vm2, %v2942_v49, %v2938_v21  ;;  %v2429_v18 = vpop.xlane.xlu0 %2428  ;;  %v5573_v46 = vpop.eup %5572  ;;  %v2334_v8 = vmul.f32 %v6487_v2, %v5571_v50 }
 0x2ce   :  { %v4906_v30 = vpop.f32.mrb[128].mxu1  ;;  %v2948_v3 = vsel %vm2765_vm3, %v2947_v11, %v2943_v4  ;;  %v2962_v14 = vrot.slane %v2429_v18, %v6471_v29  ;;  %v5575_v49 = vpop.eup %5574  ;;  %v2340_v4 = vmul.f32 %v6487_v2, %v5573_v46 }
 0x2cf   :  { %v6766_v26 = vadd.f32 %v4906_v30, %v6668_v20  ;;  %v1855_v62 = vpop.f32.mrb[129].mxu1  ;;  %2566 = vadd.xlane.f32.xlu1 %v2331_v34  ;;  %2578 = vadd.xlane.f32.xlu0 %v2337_v43  ;;  %v2953_v38 = vsel %vm2772_vm4, %v2952_v59, %v2948_v3  ;;  %v5577_v18 = vpop.eup %5576  ;;  %v2982_v3 = vrot.slane %v6757_v13, %v6538_v10 }
 0x2d0   :  { %v2085_v17 = vadd.f32 %v6668_v20, %v1855_v62  ;;  %v4907_v1 = vpop.f32.mrb[130].mxu1  ;;  %v2433_v61 = vpop.xlane.xlu1 %2432  ;;  %v2343_v30 = vmul.f32 %v6487_v2, %v5577_v18  ;;  %v2336_v62 = vmul.f32 %v6487_v2, %v5575_v49 }
 0x2d1   :  { %v2088_v40 = vadd.f32 %v4907_v1, %v6668_v20  ;;  %v2427_v32 = vpop.xlane.xlu0 %2426  ;;  %v1858_v48 = vpop.f32.mrb[131].mxu1  ;;  %v2972_v16 = vrot.slane %v2433_v61, %v6505_v15 }
 0x2d2   :  { %v2957_v12 = vrot.slane %v2427_v32, %v6468_v36  ;;  %v2086_v44 = vadd.f32 %v6668_v20, %v1858_v48  ;;  %5588 = vtanh.f32 %v2085_v17  ;;  %v5579_v43 = vpop.eup %5578 }
 0x2d3   :  { %2562 = vadd.xlane.f32.xlu1 %v2329_v51  ;;  %2588 = vadd.xlane.f32.xlu0 %v2342_v39  ;;  %v5581_v1 = vpop.eup %5580  ;;  %5590 = vtanh.f32 %v6752_v31  ;;  %v2335_v51 = vmul.f32 %v6487_v2, %v5579_v43 }
 0x2d4   :  { %v2958_v55 = vsel %vm2779_vm5, %v2957_v12, %v2953_v38  ;;  %v2439_v5 = vpop.xlane.xlu1 %2438  ;;  %5592 = vtanh.f32 %v2088_v40  ;;  %v5583_v59 = vpop.eup %5582  ;;  %v2341_v48 = vmul.f32 %v6487_v2, %v5581_v1 }
 0x2d5   :  { %v2963_v21 = vsel %vm2786_vm6, %v2962_v14, %v2958_v55  ;;  %v6784_v20 = vpop.xlane.xlu0 %2452  ;;  %v2987_v9 = vrot.slane %v2439_v5, %v6542_v6  ;;  %v5585_v39 = vpop.eup %5584  ;;  %5594 = vtanh.f32 %v2086_v44  ;;  %v2346_v14 = vmul.f32 %v6487_v2, %v5583_v59 }
 0x2d6   :  { %v2968_v27 = vsel %vm2793_vm7, %v2967_v37, %v2963_v21  ;;  %v5587_v46 = vpop.eup %5586  ;;  %v2347_v38 = vmul.f32 %v6487_v2, %v5585_v39  ;;  %5596 = vtanh.f32 %v6766_v26 }
 0x2d7   :  { %v2973_v47 = vsel %vm2800_vm8, %v2972_v16, %v2968_v27  ;;  %2572 = vadd.xlane.f32.xlu1 %v2334_v8  ;;  %2584 = vadd.xlane.f32.xlu0 %v2340_v4  ;;  %v2344_v44 = vmul.f32 %v6487_v2, %v5587_v46 }
 0x2d8   :  { %v2435_v34 = vpop.xlane.xlu1 %2434 }
 0x2d9   :  { %v2977_v53 = vrot.slane %v2435_v34, %v6533_v7  ;;  %v6792_v11 = vpop.xlane.xlu0 %2454 }
 0x2db   :  { %v2978_v17 = vsel %vm2807_vm9, %v2977_v53, %v2973_v47  ;;  %2590 = vadd.xlane.f32.xlu0 %v2343_v30  ;;  %2576 = vadd.xlane.f32.xlu1 %v2336_v62 }
 0x2dc   :  { %v2983_v61 = vsel %vm2814_vm10, %v2982_v3, %v2978_v17  ;;  %v2445_v50 = vpop.xlane.xlu1 %2444  ;;  %v5589_v37 = vpop.eup %5588 }
 0x2dd   :  { %v2451_v32 = vpop.xlane.xlu0 %2450  ;;  %v2988_v13 = vsel %vm2821_vm11, %v2987_v9, %v2983_v61  ;;  %v5591_v49 = vpop.eup %5590  ;;  %v2348_v16 = vmul.f32 %v6487_v2, %v5589_v37  ;;  %v3002_v26 = vrot.slane %v2445_v50, %v6597_v52 }
 0x2de   :  { %v5593_v8 = vpop.eup %5592  ;;  %v2345_v47 = vmul.f32 %v6487_v2, %v5591_v49  ;;  %v3016_v3 = vrot.slane %v2451_v32, %v6463_v28 }
 0x2df   :  { %2586 = vadd.xlane.f32.xlu0 %v2341_v48  ;;  %2574 = vadd.xlane.f32.xlu1 %v2335_v51  ;;  %v2351_v34 = vmul.f32 %v6487_v2, %v5593_v8  ;;  %v5595_v43 = vpop.eup %5594  ;;  %v3021_v48 = vrot.slane %v6784_v20, %v6450_v35 }
 0x2e0   :  { %v2441_v31 = vpop.xlane.xlu1 %2440  ;;  %v2349_v59 = vmul.f32 %v6487_v2, %v5595_v43  ;;  %v5597_v50 = vpop.eup %5596 }
 0x2e1   :  { %v2992_v12 = vrot.slane %v2441_v31, %v6570_v19  ;;  %v2461_v40 = vpop.xlane.xlu0 %2460 }
 0x2e3   :  { %v2993_v55 = vsel %vm7209_vm12, %v2992_v12, %v2988_v13  ;;  %2596 = vadd.xlane.f32.xlu0 %v2346_v14  ;;  %2598 = vadd.xlane.f32.xlu1 %v2347_v38  ;;  %v3026_v13 = vrot.slane %v6792_v11, %v6457_v58  ;;  %v2350_v38 = vmul.f32 %v6487_v2, %v5597_v50 }
 0x2e4   :  { %v2447_v5 = vpop.xlane.xlu1 %2446 }
 0x2e5   :  { %v2463_v21 = vpop.xlane.xlu0 %2462  ;;  %v3007_v53 = vrot.slane %v2447_v5, %v6601_v33 }
 0x2e6   :  { %v3046_v5 = vrot.slane %v2463_v21, %v6498_v63 }
 0x2e7   :  { %2592 = vadd.xlane.f32.xlu0 %v2344_v44  ;;  %2600 = vadd.xlane.f32.xlu1 %v2348_v16 }
 0x2e8   :  { %v2443_v4 = vpop.xlane.xlu1 %2442 }
 0x2e9   :  { %v2997_v18 = vrot.slane %v2443_v4, %v6594_v24  ;;  %v2469_v27 = vpop.xlane.xlu0 %2468 }
 0x2eb   :  { %v2998_v30 = vsel %vm2835_vm13, %v2997_v18, %v2993_v55  ;;  %2594 = vadd.xlane.f32.xlu0 %v2345_v47  ;;  %2606 = vadd.xlane.f32.xlu1 %v2351_v34  ;;  %v3041_v55 = vrot.slane %v2461_v40, %v6471_v29  ;;  %v3061_v47 = vrot.slane %v2469_v27, %v6538_v10 }
 0x2ec   :  { %v3003_v62 = vsel %vm2842_vm14, %v3002_v26, %v2998_v30  ;;  %v2449_v1 = vpop.xlane.xlu1 %2448 }
 0x2ed   :  { %v3008_v9 = vsel %vm2849_vm15, %v3007_v53, %v3003_v62  ;;  %v2465_v17 = vpop.xlane.xlu0 %2464  ;;  %v3012_v61 = vrot.slane %v2449_v1, %v6454_v23 }
 0x2ee   :  { %v3407_v51 = vsel %vm7208_vm0, %v3008_v9, %v6738_v22  ;;  %v3051_v44 = vrot.slane %v2465_v17, %v6505_v15  ;;  %vm7210_vm0 = vcmask 1043459  }
 0x2ef   :  { %v3017_v39 = vsel %vm2751_vm1, %v3016_v3, %v3012_v61  ;;  %2602 = vadd.xlane.f32.xlu0 %v2349_v59 }
 0x2f0   :  { %v3022_v32 = vsel %vm2758_vm2, %v3021_v48, %v3017_v39  ;;  %v2457_v31 = vpop.xlane.xlu1 %2456 }
 0x2f1   :  { %v2471_v46 = vpop.xlane.xlu0 %2470  ;;  %v3027_v12 = vsel %vm2765_vm3, %v3026_v13, %v3022_v32  ;;  %v3031_v14 = vrot.slane %v2457_v31, %v6460_v25 }
 0x2f2   :  { %v3066_v40 = vrot.slane %v2471_v46, %v6542_v6 }
 0x2f3   :  { %v3032_v20 = vsel %vm2772_vm4, %v3031_v14, %v3027_v12  ;;  %2604 = vadd.xlane.f32.xlu0 %v2350_v38  ;;  %v5959_v12 = vmov -inf  }
 0x2f4   :  { %v2459_v22 = vpop.xlane.xlu1 %2458 }
 0x2f5   :  { %v2467_v37 = vpop.xlane.xlu0 %2466  ;;  %v3036_v11 = vrot.slane %v2459_v22, %v6468_v36 }
 0x2f6   :  { %v3056_v2 = vrot.slane %v2467_v37, %v6533_v7 }
 0x2f7   :  { %v3037_v49 = vsel %vm2779_vm5, %v3036_v11, %v3032_v20 }
 0x2f8   :  { %v3042_v16 = vsel %vm2786_vm6, %v3041_v55, %v3037_v49  ;;  %v2479_v8 = vpop.xlane.xlu1 %2478 }
 0x2f9   :  { %v3047_v4 = vsel %vm2793_vm7, %v3046_v5, %v3042_v16  ;;  %v2477_v18 = vpop.xlane.xlu0 %2476  ;;  %v3086_v61 = vrot.slane %v2479_v8, %v6601_v33 }
 0x2fa   :  { %v3052_v34 = vsel %vm2800_vm8, %v3051_v44, %v3047_v4  ;;  %v3081_v17 = vrot.slane %v2477_v18, %v6597_v52 }
 0x2fb   :  { %v3057_v21 = vsel %vm2807_vm9, %v3056_v2, %v3052_v34 }
 0x2fc   :  { %v3062_v43 = vsel %vm2814_vm10, %v3061_v47, %v3057_v21  ;;  %v2485_v26 = vpop.xlane.xlu1 %2484 }
 0x2fd   :  { %v2473_v53 = vpop.xlane.xlu0 %2472  ;;  %v3067_v30 = vsel %vm2821_vm11, %v3066_v40, %v3062_v43  ;;  %v3100_v20 = vrot.slane %v2485_v26, %v6450_v35 }
 0x2fe   :  { %v3071_v62 = vrot.slane %v2473_v53, %v6570_v19 }
 0x300   :  { %v3072_v1 = vsel %vm7209_vm12, %v3071_v62, %v3067_v30  ;;  %v2481_v3 = vpop.xlane.xlu1 %2480  ;;  %vm7211_vm12 = vcmask 7168  }
 0x301   :  { %v2475_v9 = vpop.xlane.xlu0 %2474  ;;  %746 = vst.msk [vmem:[#allocation4] sm:$0xff] %vm7211_vm12, %v5959_v12  ;;  %747 = vst.msk [vmem:[#allocation5] sm:$0xff] %vm7211_vm12, %v5956_v0  ;;  %v3091_v14 = vrot.slane %v2481_v3, %v6454_v23  ;;  %vm7212_vm12 = vcmask 1044484  }
 0x302   :  { %v3076_v27 = vrot.slane %v2475_v9, %v6594_v24 }
 0x304   :  { %v3077_v59 = vsel %vm2835_vm13, %v3076_v27, %v3072_v1  ;;  %v2493_v50 = vpop.xlane.xlu1 %2492 }
 0x305   :  { %v3082_v48 = vsel %vm2842_vm14, %v3081_v17, %v3077_v59  ;;  %v2487_v13 = vpop.xlane.xlu0 %2486  ;;  %v3120_v16 = vrot.slane %v2493_v50, %v6471_v29 }
 0x306   :  { %v3087_v39 = vsel %vm2849_vm15, %v3086_v61, %v3082_v48  ;;  %v3105_v22 = vrot.slane %v2487_v13, %v6457_v58 }
 0x307   :  { %v3409_v32 = vsel %vm7210_vm0, %v3087_v39, %v3407_v51  ;;  %vm7213_vm0 = vcmask 851712  }
 0x308   :  { %v2495_v31 = vpop.xlane.xlu1 %2494 }
 0x309   :  { %v2483_v46 = vpop.xlane.xlu0 %2482  ;;  %v3125_v4 = vrot.slane %v2495_v31, %v6498_v63 }
 0x30a   :  { %v3095_v38 = vrot.slane %v2483_v46, %v6463_v28 }
 0x30c   :  { %v3096_v37 = vsel %vm2751_vm1, %v3095_v38, %v3091_v14  ;;  %v2491_v51 = vpop.xlane.xlu1 %2490 }
 0x30d   :  { %v3101_v11 = vsel %vm2758_vm2, %v3100_v20, %v3096_v37  ;;  %v2489_v55 = vpop.xlane.xlu0 %2488  ;;  %v3115_v5 = vrot.slane %v2491_v51, %v6468_v36 }
 0x30e   :  { %v3106_v49 = vsel %vm2765_vm3, %v3105_v22, %v3101_v11  ;;  %v3110_v44 = vrot.slane %v2489_v55, %v6460_v25 }
 0x310   :  { %v3111_v8 = vsel %vm2772_vm4, %v3110_v44, %v3106_v49  ;;  %v2501_v2 = vpop.xlane.xlu1 %2500 }
 0x311   :  { %v3116_v18 = vsel %vm2779_vm5, %v3115_v5, %v3111_v8  ;;  %v2509_v47 = vpop.xlane.xlu0 %2508  ;;  %v3140_v27 = vrot.slane %v2501_v2, %v6538_v10 }
 0x312   :  { %v3121_v34 = vsel %vm2786_vm6, %v3120_v16, %v3116_v18  ;;  %v3160_v38 = vrot.slane %v2509_v47, %v6597_v52 }
 0x313   :  { %v3126_v40 = vsel %vm2793_vm7, %v3125_v4, %v3121_v34 }
 0x314   :  { %v2497_v21 = vpop.xlane.xlu1 %2496 }
 0x315   :  { %v2511_v43 = vpop.xlane.xlu0 %2510  ;;  %v3130_v26 = vrot.slane %v2497_v21, %v6505_v15 }
 0x316   :  { %v3165_v20 = vrot.slane %v2511_v43, %v6601_v33 }
 0x317   :  { %v3131_v53 = vsel %vm2800_vm8, %v3130_v26, %v3126_v40 }
 0x318   :  { %v2503_v30 = vpop.xlane.xlu1 %2502 }
 0x319   :  { %v2513_v62 = vpop.xlane.xlu0 %2512  ;;  %v3145_v17 = vrot.slane %v2503_v30, %v6542_v6 }
 0x31a   :  { %v3170_v8 = vrot.slane %v2513_v62, %v6454_v23 }
 0x31c   :  { %v2499_v1 = vpop.xlane.xlu1 %2498 }
 0x31d   :  { %v3135_v3 = vrot.slane %v2499_v1, %v6533_v7  ;;  %v2525_v9 = vpop.xlane.xlu0 %2524 }
 0x31e   :  { %v3199_v30 = vrot.slane %v2525_v9, %v6471_v29 }
 0x31f   :  { %v3136_v61 = vsel %vm2807_vm9, %v3135_v3, %v3131_v53 }
 0x320   :  { %v3141_v59 = vsel %vm2814_vm10, %v3140_v27, %v3136_v61  ;;  %v2505_v50 = vpop.xlane.xlu1 %2504 }
 0x321   :  { %v3146_v48 = vsel %vm2821_vm11, %v3145_v17, %v3141_v59  ;;  %v3150_v13 = vrot.slane %v2505_v50, %v6570_v19  ;;  %v2521_v39 = vpop.xlane.xlu0 %2520 }
 0x322   :  { %v3189_v40 = vrot.slane %v2521_v39, %v6460_v25 }
 0x323   :  { %v3151_v31 = vsel %vm7213_vm0, %v3150_v13, %v3146_v48 }
 0x324   :  { %v2507_v46 = vpop.xlane.xlu1 %2506 }
 0x325   :  { %v3155_v12 = vrot.slane %v2507_v46, %v6594_v24  ;;  %v2527_v14 = vpop.xlane.xlu0 %2526 }
 0x326   :  { %v3204_v1 = vrot.slane %v2527_v14, %v6498_v63 }
 0x327   :  { %v3156_v22 = vsel %vm2835_vm13, %v3155_v12, %v3151_v31 }
 0x328   :  { %v3161_v37 = vsel %vm2842_vm14, %v3160_v38, %v3156_v22  ;;  %v2517_v51 = vpop.xlane.xlu1 %2516 }
 0x329   :  { %v3166_v11 = vsel %vm2849_vm15, %v3165_v20, %v3161_v37  ;;  %v2523_v55 = vpop.xlane.xlu0 %2522  ;;  %v3179_v18 = vrot.slane %v2517_v51, %v6450_v35 }
 0x32a   :  { %v3411_v5 = vsel %vm7212_vm12, %v3166_v11, %v3409_v32  ;;  %v3194_v32 = vrot.slane %v2523_v55, %v6468_v36  ;;  %vm3412_vm12 = vcmask 1045509  }
 0x32c   :  { %v2519_v49 = vpop.xlane.xlu1 %2518 }
 0x32d   :  { %v2533_v44 = vpop.xlane.xlu0 %2532  ;;  %v3184_v47 = vrot.slane %v2519_v49, %v6457_v58 }
 0x32e   :  { %v3219_v9 = vrot.slane %v2533_v44, %v6538_v10 }
 0x330   :  { %v2515_v16 = vpop.xlane.xlu1 %2514 }
 0x331   :  { %v3174_v2 = vrot.slane %v2515_v16, %v6463_v28  ;;  %v2529_v4 = vpop.xlane.xlu0 %2528 }
 0x332   :  { %v3209_v17 = vrot.slane %v2529_v4, %v6505_v15 }
 0x333   :  { %v3175_v34 = vsel %vm2751_vm1, %v3174_v2, %v3170_v8 }
 0x334   :  { %v3180_v21 = vsel %vm2758_vm2, %v3179_v18, %v3175_v34  ;;  %v2541_v43 = vpop.xlane.xlu1 %2540 }
 0x335   :  { %v3185_v26 = vsel %vm2765_vm3, %v3184_v47, %v3180_v21  ;;  %v2535_v53 = vpop.xlane.xlu0 %2534  ;;  %v3239_v37 = vrot.slane %v2541_v43, %v6597_v52 }
 0x336   :  { %v3190_v62 = vsel %vm2772_vm4, %v3189_v40, %v3185_v26  ;;  %v3224_v39 = vrot.slane %v2535_v53, %v6542_v6 }
 0x337   :  { %v3195_v3 = vsel %vm2779_vm5, %v3194_v32, %v3190_v62 }
 0x338   :  { %v3200_v27 = vsel %vm2786_vm6, %v3199_v30, %v3195_v3  ;;  %v2539_v61 = vpop.xlane.xlu1 %2538 }
 0x339   :  { %v3205_v59 = vsel %vm2793_vm7, %v3204_v1, %v3200_v27  ;;  %v2531_v50 = vpop.xlane.xlu0 %2530  ;;  %v3234_v22 = vrot.slane %v2539_v61, %v6594_v24 }
 0x33a   :  { %v3210_v48 = vsel %vm2800_vm8, %v3209_v17, %v3205_v59  ;;  %v3214_v13 = vrot.slane %v2531_v50, %v6533_v7 }
 0x33c   :  { %v3215_v31 = vsel %vm2807_vm9, %v3214_v13, %v3210_v48  ;;  %v2551_v46 = vpop.xlane.xlu1 %2550 }
 0x33d   :  { %v3220_v12 = vsel %vm2814_vm10, %v3219_v9, %v3215_v31  ;;  %v2537_v14 = vpop.xlane.xlu0 %2536  ;;  %v3263_v13 = vrot.slane %v2551_v46, %v6457_v58 }
 0x33e   :  { %v3225_v38 = vsel %vm2821_vm11, %v3224_v39, %v3220_v12  ;;  %v3229_v20 = vrot.slane %v2537_v14, %v6570_v19 }
 0x340   :  { %v3230_v51 = vsel %vm7213_vm0, %v3229_v20, %v3225_v38  ;;  %v2547_v11 = vpop.xlane.xlu1 %2546 }
 0x341   :  { %v3235_v55 = vsel %vm2835_vm13, %v3234_v22, %v3230_v51  ;;  %v2543_v49 = vpop.xlane.xlu0 %2542  ;;  %v3253_v17 = vrot.slane %v2547_v11, %v6463_v28 }
 0x342   :  { %v3240_v44 = vsel %vm2842_vm14, %v3239_v37, %v3235_v55  ;;  %v3244_v16 = vrot.slane %v2543_v49, %v6601_v33 }
 0x344   :  { %v3245_v8 = vsel %vm2849_vm15, %v3244_v16, %v3240_v44  ;;  %v2557_v2 = vpop.xlane.xlu1 %2556 }
 0x345   :  { %v2549_v4 = vpop.xlane.xlu0 %2548  ;;  %v6925_v18 = vsel %vm3412_vm12, %v3245_v8, %v3411_v5  ;;  %v3278_v55 = vrot.slane %v2557_v2, %v6471_v29 }
 0x346   :  { %v3258_v59 = vrot.slane %v2549_v4, %v6450_v35 }
 0x348   :  { %v2553_v47 = vpop.xlane.xlu1 %2552 }
 0x349   :  { %v2545_v34 = vpop.xlane.xlu0 %2544  ;;  %v3268_v14 = vrot.slane %v2553_v47, %v6460_v25 }
 0x34a   :  { %v3249_v1 = vrot.slane %v2545_v34, %v6454_v23 }
 0x34c   :  { %v2559_v40 = vpop.xlane.xlu1 %2558  ;;  %v3254_v5 = vsel %vm2751_vm1, %v3253_v17, %v3249_v1 }
 0x34d   :  { %v6927_v21 = vpop.xlane.xlu0 %2568  ;;  %v3259_v48 = vsel %vm2758_vm2, %v3258_v59, %v3254_v5  ;;  %v3283_v47 = vrot.slane %v2559_v40, %v6498_v63 }
 0x34e   :  { %v3264_v31 = vsel %vm2765_vm3, %v3263_v13, %v3259_v48 }
 0x34f   :  { %v3269_v20 = vsel %vm2772_vm4, %v3268_v14, %v3264_v31 }
 0x350   :  { %v2555_v43 = vpop.xlane.xlu1 %2554 }
 0x351   :  { %v6929_v32 = vpop.xlane.xlu0 %2570  ;;  %v3273_v12 = vrot.slane %v2555_v43, %v6468_v36 }
 0x353   :  { %v3274_v11 = vsel %vm2779_vm5, %v3273_v12, %v3269_v20 }
 0x354   :  { %v2565_v26 = vpop.xlane.xlu1 %2564  ;;  %v3279_v8 = vsel %vm2786_vm6, %v3278_v55, %v3274_v11 }
 0x355   :  { %v2581_v53 = vpop.xlane.xlu0 %2580  ;;  %v3284_v43 = vsel %vm2793_vm7, %v3283_v47, %v3279_v8  ;;  %v3298_v40 = vrot.slane %v2565_v26, %v6538_v10  ;;  %v3308_v26 = vrot.slane %v6927_v21, %v6570_v19 }
 0x356   :  { %v3337_v46 = vrot.slane %v2581_v53, %v6450_v35 }
 0x358   :  { %v2561_v30 = vpop.xlane.xlu1 %2560 }
 0x359   :  { %v2583_v62 = vpop.xlane.xlu0 %2582  ;;  %v3288_v4 = vrot.slane %v2561_v30, %v6505_v15 }
 0x35a   :  { %v3342_v44 = vrot.slane %v2583_v62, %v6457_v58 }
 0x35b   :  { %v3289_v53 = vsel %vm2800_vm8, %v3288_v4, %v3284_v43  ;;  %v5247_v43 = vld [vmem:[#allocation18 + $0x68] ss:$16 sps:$4 sm:$0xff]  }
 0x35c   :  { %v2567_v3 = vpop.xlane.xlu1 %2566 }
 0x35d   :  { %v2579_v27 = vpop.xlane.xlu0 %2578  ;;  %v3303_v59 = vrot.slane %v2567_v3, %v6542_v6 }
 0x35e   :  { %v3332_v22 = vrot.slane %v2579_v27, %v6463_v28 }
 0x360   :  { %v2563_v61 = vpop.xlane.xlu1 %2562 }
 0x361   :  { %v2589_v50 = vpop.xlane.xlu0 %2588 }
 0x364   :  { %v6937_v9 = vpop.xlane.xlu1 %2572 }
 0x365   :  { %v2585_v39 = vpop.xlane.xlu0 %2584  ;;  %v3318_v21 = vrot.slane %v6937_v9, %v6597_v52 }
 0x366   :  { %v3347_v2 = vrot.slane %v2585_v39, %v6460_v25  ;;  %v3357_v25 = vrot.slane %v2589_v50, %v6471_v29 }
 0x368   :  { %v2577_v38 = vpop.xlane.xlu1 %2576 }
 0x369   :  { %v2591_v37 = vpop.xlane.xlu0 %2590  ;;  %v3328_v51 = vrot.slane %v2577_v38, %v6454_v23  ;;  %v3293_v23 = vrot.slane %v2563_v61, %v6533_v7 }
 0x36a   :  { %v3362_v39 = vrot.slane %v2591_v37, %v6498_v63 }
 0x36b   :  { %v3333_v49 = vsel %vm2751_vm1, %v3332_v22, %v3328_v51  ;;  %v3294_v30 = vsel %vm2807_vm9, %v3293_v23, %v3289_v53  ;;  %vm7214_vm1 = vmmov %vm7213_vm0  ;;  %v5243_v23 = vld [vmem:[#allocation18 + $0x2c] ss:$16 sps:$4 sm:$0xff]   ;;  %v5250_v53 = vld [vmem:[#allocation18 + $0x88] ss:$16 sps:$4 sm:$0xff]  }
 0x36c   :  { %v3338_v16 = vsel %vm2758_vm2, %v3337_v46, %v3333_v49  ;;  %v2575_v35 = vpop.xlane.xlu1 %2574  ;;  %v3299_v5 = vsel %vm2814_vm10, %v3298_v40, %v3294_v30  ;;  %vm7215_vm2 = vmmov %vm7213_vm0  ;;  %v5258_v30 = vld [vmem:[#allocation18 + $0xcc] ss:$16 sps:$4 sm:$0xff]   ;;  %v5256_v40 = vld [vmem:[#allocation18 + $0xc8] ss:$16 sps:$4 sm:$0xff]  }
 0x36d   :  { %v2587_v28 = vpop.xlane.xlu0 %2586  ;;  %v3343_v34 = vsel %vm2765_vm3, %v3342_v44, %v3338_v16  ;;  %v3304_v13 = vsel %vm2821_vm11, %v3303_v59, %v3299_v5  ;;  %v3323_v51 = vrot.slane %v2575_v35, %v6601_v33  ;;  %vm3414_vm3 = vcmask 1046534   ;;  %v5244_v35 = vld [vmem:[#allocation18 + $0x48] ss:$16 sps:$4 sm:$0xff]   ;;  %v5264_v5 = vld [vmem:[#allocation18 + $0x10c] ss:$16 sps:$4 sm:$0xff]  }
 0x36e   :  { %v3352_v58 = vrot.slane %v2587_v28, %v6468_v36  ;;  %v3348_v62 = vsel %vm2772_vm4, %v3347_v2, %v3343_v34  ;;  %v3309_v50 = vsel %vm7214_vm1, %v3308_v26, %v3304_v13  ;;  %vm3416_vm4 = vcmask 1047559   ;;  %v5241_v34 = vld [vmem:[#allocation18 + $0x28] ss:$16 sps:$4 sm:$0xff]   ;;  %v5249_v2 = vld [vmem:[#allocation18 + $0x6c] ss:$16 sps:$4 sm:$0xff]  }
 0x36f   :  { %v5265_v59 = vld [vmem:[#allocation18 + $0x128] ss:$16 sps:$4 sm:$0xff]   ;;  %v5273_v13 = vld [vmem:[#allocation18 + $0x16c] ss:$16 sps:$4 sm:$0xff]  }
 0x370   :  { %v3353_v27 = vsel %vm2779_vm5, %v3352_v58, %v3348_v62  ;;  %v2599_v17 = vpop.xlane.xlu1 %2598  ;;  %vm2613_vm5 = vcmp.lt.s32.totalorder %v6418_v57, 8  ;;  %v5240_v57 = vld [vmem:[#allocation18 + $0xc] ss:$16 sps:$4 sm:$0xff]  }
 0x371   :  { %v2597_v1 = vpop.xlane.xlu0 %2596  ;;  %v3358_v36 = vsel %vm2786_vm6, %v3357_v25, %v3353_v27  ;;  %v3382_v63 = vrot.slane %v2599_v17, %v6542_v6  ;;  %700 = vmatprep.subr.bf16.mxu0 %v5240_v57  ;;  %v5252_v58 = vld [vmem:[#allocation18 + $0x8c] ss:$16 sps:$4 sm:$0xff]   ;;  %v5259_v17 = vld [vmem:[#allocation18 + $0xe8] ss:$16 sps:$4 sm:$0xff]   ;;  %vm7216_vm6 = vmmov 0  }
 0x372   :  { %v3363_v12 = vsel %vm2793_vm7, %v3362_v39, %v3358_v36  ;;  %v3377_v3 = vrot.slane %v2597_v1, %v6538_v10  ;;  %v5255_v62 = vld [vmem:[#allocation18 + $0xac] ss:$16 sps:$4 sm:$0xff]   ;;  %v5253_v1 = vld [vmem:[#allocation18 + $0xa8] ss:$16 sps:$4 sm:$0xff]   ;;  %vm7217_vm7 = vcmask 7168  }
 0x373   :  { %v5261_v27 = vld [vmem:[#allocation18 + $0xec] ss:$16 sps:$4 sm:$0xff]   ;;  %v5262_v25 = vld [vmem:[#allocation18 + $0x108] ss:$16 sps:$4 sm:$0xff]  }
 0x374   :  { %v2601_v14 = vpop.xlane.xlu1 %2600  ;;  %v5270_v36 = vld [vmem:[#allocation18 + $0x14c] ss:$16 sps:$4 sm:$0xff]   ;;  %v5271_v39 = vld [vmem:[#allocation18 + $0x168] ss:$16 sps:$4 sm:$0xff]  }
 0x375   :  { %v2593_v61 = vpop.xlane.xlu0 %2592  ;;  %v3387_v10 = vrot.slane %v2601_v14, %v6570_v19  ;;  %v5276_v26 = vld [vmem:[#allocation18 + $0x18c] ss:$16 sps:$4 sm:$0xff]   ;;  %v5277_v14 = vld [vmem:[#allocation18 + $0x1a8] ss:$16 sps:$4 sm:$0xff]  }
 0x376   :  { %v3367_v48 = vrot.slane %v2593_v61, %v6505_v15  ;;  %v3313_v15 = vrot.slane %v6929_v32, %v6594_v24  ;;  %v5267_v61 = vld [vmem:[#allocation18 + $0x12c] ss:$16 sps:$4 sm:$0xff]  }
 0x378   :  { %v3368_v38 = vsel %vm2800_vm8, %v3367_v48, %v3363_v12  ;;  %v2607_v46 = vpop.xlane.xlu1 %2606  ;;  %v5268_v48 = vld [vmem:[#allocation18 + $0x148] ss:$16 sps:$4 sm:$0xff]   ;;  %v5279_v12 = vld [vmem:[#allocation18 + $0x1ac] ss:$16 sps:$4 sm:$0xff]   ;;  %vm7218_vm8 = vmmov %vm7217_vm7 }
 0x379   :  { %v2595_v31 = vpop.xlane.xlu0 %2594  ;;  %v3402_v16 = vrot.slane %v2607_v46, %v6601_v33  ;;  %v5238_v33 = vld [vmem:[#allocation18 + $0x8] ss:$16 sps:$4 sm:$0xff]  }
 0x37a   :  { %v3372_v29 = vrot.slane %v2595_v31, %v6533_v7  ;;  %v3314_v7 = vsel %vm2835_vm13, %v3313_v15, %v3309_v50  ;;  %701 = vmatpush1.bf16.msra.mxu0 %v5238_v33  ;;  %v5274_v31 = vld [vmem:[#allocation18 + $0x188] ss:$16 sps:$4 sm:$0xff]   ;;  %v5623_v15 = vld [vmem:[#allocation13] sm:$0xff]   ;;  %v5633_v33 = vld [vmem:[#allocation13 + $0x50] sm:$0xff]  }
 0x37b   :  { %v3319_v55 = vsel %vm2842_vm14, %v3318_v21, %v3314_v7  ;;  %702 = vmatprep.subr.bf16.mxu0 %v5243_v23  ;;  %v5280_v50 = vld [vmem:[#allocation18 + $0x1c8] ss:$16 sps:$4 sm:$0xff]  }
 0x37c   :  { %v3373_v20 = vsel %vm2807_vm9, %v3372_v29, %v3368_v38  ;;  %v3324_v9 = vsel %vm2849_vm15, %v3323_v51, %v3319_v55  ;;  %v5282_v29 = vld [vmem:[#allocation18 + $0x1cc] ss:$16 sps:$4 sm:$0xff]   ;;  %v5283_v38 = vld [vmem:[#allocation18 + $0x1e8] ss:$16 sps:$4 sm:$0xff]   ;;  %vm7219_vm9 = vcmask 1041409  }
 0x37d   :  { %v3378_v22 = vsel %vm2814_vm10, %v3377_v3, %v3373_v20  ;;  %v2603_v37 = vpop.xlane.xlu0 %2602  ;;  %v3415_v4 = vsel %vm3414_vm3, %v3324_v9, %v6925_v18  ;;  %v5246_v18 = vld [vmem:[#allocation18 + $0x4c] ss:$16 sps:$4 sm:$0xff]   ;;  %v5625_v20 = vld [vmem:[#allocation13 + $0x10] sm:$0xff]   ;;  %vm7220_vm10 = vcmask 1042434  }
 0x37e   :  { %v3383_v11 = vsel %vm2821_vm11, %v3382_v63, %v3378_v22  ;;  %v3392_v32 = vrot.slane %v2603_v37, %v6594_v24  ;;  %703 = vmatpush1.bf16.msra.mxu0 %v5241_v34  ;;  %v5285_v3 = vld [vmem:[#allocation18 + $0x1ec] ss:$16 sps:$4 sm:$0xff]   ;;  %v5629_v37 = vld [vmem:[#allocation13 + $0x30] sm:$0xff]   ;;  %v5635_v34 = vld [vmem:[#allocation13 + $0x60] sm:$0xff]   ;;  %vm7221_vm11 = vcmask 1043459  }
 0x37f   :  { %v3388_v6 = vsel %vm7215_vm2, %v3387_v10, %v3383_v11  ;;  %704 = vmatprep.subr.bf16.mxu0 %v5246_v18  ;;  %v5624_v63 = vld [vmem:[#allocation13 + $0x8] sm:$0xff]   ;;  %v5626_v21 = vld [vmem:[#allocation13 + $0x18] sm:$0xff]  }
 0x380   :  { %v3393_v8 = vsel %vm2835_vm13, %v3392_v32, %v3388_v6  ;;  %v5628_v22 = vld [vmem:[#allocation13 + $0x28] sm:$0xff]   ;;  %v5630_v7 = vld [vmem:[#allocation13 + $0x38] sm:$0xff]   ;;  %vm7222_vm13 = vcmask 1044484  }
 0x381   :  { %v2605_v49 = vpop.xlane.xlu0 %2604  ;;  %v3424_v51 = vld [vmem:[#allocation4] sm:$0xff]  ;;  %v5636_v18 = vld [vmem:[#allocation13 + $0x68] sm:$0xff]  }
 0x382   :  { %v3397_v44 = vrot.slane %v2605_v49, %v6597_v52  ;;  %v5960_v52 = vmov 0   ;;  %705 = vmatpush1.bf16.msra.mxu0 %v5244_v35  ;;  %v5634_v23 = vld [vmem:[#allocation13 + $0x58] sm:$0xff]  }
 0x383   :  { %5108 = vset.pattern.permute.xlu1 %v5960_v52  ;;  %5109 = vset.pattern.permute.xlu0 %v5960_v52 }
 0x384   :  { %v3398_v19 = vsel %vm2842_vm14, %v3397_v44, %v3393_v8  ;;  %4135 = vmatprep.mubr.bf16.mxu1 %v5960_v52  ;;  %706 = vmatprep.subr.bf16.mxu0 %v5249_v2  ;;  %v5637_v2 = vld [vmem:[#allocation13 + $0x70] sm:$0xff]  }
 0x385   :  { %v3403_v24 = vsel %vm2849_vm15, %v3402_v16, %v3398_v19 }
 0x386   :  { %v3417_v28 = vsel %vm3416_vm4, %v3403_v24, %v3415_v4  ;;  %707 = vmatpush1.bf16.msra.mxu0 %v5247_v43  ;;  %v5631_v4 = vld [vmem:[#allocation13 + $0x40] sm:$0xff]  }
 0x387   :  { %v7002_v47 = vsel %vm2613_vm5, %v3417_v28, -1e+30  ;;  %708 = vmatprep.subr.bf16.mxu0 %v5252_v58  ;;  %v5632_v28 = vld [vmem:[#allocation13 + $0x48] sm:$0xff]   ;;  %v5638_v58 = vld [vmem:[#allocation13 + $0x78] sm:$0xff]  }
 0x388   :  { %3425 = vmax.xlane.f32.xlu0 %v7002_v47 }
 0x38a   :  { %709 = vmatpush1.bf16.msra.mxu0 %v5250_v53 }
 0x38b   :  { %710 = vmatprep.subr.bf16.mxu0 %v5255_v62  ;;  %v5639_v62 = vld [vmem:[#allocation13 + $0x80] sm:$0xff]  }
 0x38e   :  { %711 = vmatpush1.bf16.msra.mxu0 %v5253_v1  ;;  %v5640_v1 = vld [vmem:[#allocation13 + $0x88] sm:$0xff]  }
 0x38f   :  { %712 = vmatprep.subr.bf16.mxu0 %v5258_v30  ;;  %v5641_v30 = vld [vmem:[#allocation13 + $0x90] sm:$0xff]  }
 0x392   :  { %713 = vmatpush1.bf16.msra.mxu0 %v5256_v40  ;;  %v5642_v40 = vld [vmem:[#allocation13 + $0x98] sm:$0xff]  }
 0x393   :  { %714 = vmatprep.subr.bf16.mxu0 %v5261_v27 }
 0x396   :  { %715 = vmatpush1.bf16.msra.mxu0 %v5259_v17  ;;  %v5643_v17 = vld [vmem:[#allocation13 + $0xa0] sm:$0xff]  }
 0x397   :  { %716 = vmatprep.subr.bf16.mxu0 %v5264_v5 }
 0x39a   :  { %717 = vmatpush1.bf16.msra.mxu0 %v5262_v25 }
 0x39b   :  { %718 = vmatprep.subr.bf16.mxu0 %v5267_v61 }
 0x39e   :  { %719 = vmatpush1.bf16.msra.mxu0 %v5265_v59 }
 0x39f   :  { %720 = vmatprep.subr.bf16.mxu0 %v5270_v36  ;;  %v5644_v36 = vld [vmem:[#allocation13 + $0xa8] sm:$0xff]  }
 0x3a2   :  { %721 = vmatpush1.bf16.msra.mxu0 %v5268_v48 }
 0x3a3   :  { %722 = vmatprep.subr.bf16.mxu0 %v5273_v13  ;;  %v5645_v13 = vld [vmem:[#allocation13 + $0xb0] sm:$0xff]  }
 0x3a6   :  { %723 = vmatpush1.bf16.msra.mxu0 %v5271_v39 }
 0x3a7   :  { %724 = vmatprep.subr.bf16.mxu0 %v5276_v26  ;;  %v5286_v26 = vld [vmem:[#allocation19] ss:$16 sps:$4 sm:$0xff]  }
 0x3aa   :  { %725 = vmatpush1.bf16.msra.mxu0 %v5274_v31  ;;  %v5288_v31 = vld [vmem:[#allocation19 + $0x4] ss:$16 sps:$4 sm:$0xff]  }
 0x3ab   :  { %726 = vmatprep.subr.bf16.mxu0 %v5279_v12  ;;  %4103 = vmatprep.subr.bf16.mxu1 %v5288_v31  ;;  %v5646_v12 = vld [vmem:[#allocation13 + $0xb8] sm:$0xff]   ;;  %v5676_v31 = vld [vmem:[#allocation13 + $0x1a8] sm:$0xff]  }
 0x3ac   :  { %4104 = vmatpush1.bf16.msra.mxu1 %v5286_v26  ;;  %v5675_v26 = vld [vmem:[#allocation13 + $0x1a0] sm:$0xff]  }
 0x3ae   :  { %727 = vmatpush1.bf16.msra.mxu0 %v5277_v14 }
 0x3af   :  { %728 = vmatprep.subr.bf16.mxu0 %v5282_v29  ;;  %v5648_v29 = vld [vmem:[#allocation13 + $0xc8] sm:$0xff]  }
 0x3b2   :  { %729 = vmatpush1.bf16.msra.mxu0 %v5280_v50  ;;  %v5649_v50 = vld [vmem:[#allocation13 + $0xd0] sm:$0xff]  }
 0x3b3   :  { %730 = vmatprep.subr.bf16.mxu0 %v5285_v3  ;;  %v5650_v3 = vld [vmem:[#allocation13 + $0xd8] sm:$0xff]  }
 0x3b6   :  { %731 = vmatpush1.bf16.msra.mxu0 %v5283_v38  ;;  %v5651_v38 = vld [vmem:[#allocation13 + $0xe0] sm:$0xff]  }
 0x3b7   :  { %4908 = vmatprep.subr.bf16.mxu0 %v5956_v0 }
 0x3b9   :  { %733 = vmatmul.mubr.bf16.vlgmr.msra.gmra.mrb[4].mxu0 %v6176_v45  ;;  %v5627_v45 = vld [vmem:[#allocation13 + $0x20] sm:$0xff]  }
 0x3ba   :  { %4909 = vmatpush3.bf16.msra.mxu0 %v5623_v15  ;;  %4924 = vmatprep.mubr.msk.bf16.mxu0 %vm7216_vm6, %v5956_v0  ;;  %v5652_v15 = vld [vmem:[#allocation13 + $0xe8] sm:$0xff]  }
 0x3bb   :  { %4910 = vmatprep.subr.bf16.mxu0 %v5956_v0 }
 0x3be   :  { %4911 = vmatpush3.bf16.msra.mxu0 %v5624_v63 }
 0x3bf   :  { %4912 = vmatprep.subr.bf16.mxu0 %v5956_v0 }
 0x3c2   :  { %4913 = vmatpush3.bf16.msra.mxu0 %v5625_v20  ;;  %v5653_v20 = vld [vmem:[#allocation13 + $0xf0] sm:$0xff]  }
 0x3c3   :  { %4914 = vmatprep.subr.bf16.mxu0 %v5956_v0 }
 0x3c6   :  { %4915 = vmatpush3.bf16.msra.mxu0 %v5626_v21 }
 0x3c7   :  { %4916 = vmatprep.subr.bf16.mxu0 %v5956_v0 }
 0x3ca   :  { %4917 = vmatpush3.bf16.msra.mxu0 %v5627_v45  ;;  %v5289_v45 = vld [vmem:[#allocation19 + $0x20] ss:$16 sps:$4 sm:$0xff]  }
 0x3cb   :  { %4918 = vmatprep.subr.bf16.mxu0 %v5956_v0 }
 0x3ce   :  { %4919 = vmatpush3.bf16.msra.mxu0 %v5628_v22  ;;  %v5291_v22 = vld [vmem:[#allocation19 + $0x24] ss:$16 sps:$4 sm:$0xff]  }
 0x3cf   :  { %4920 = vmatprep.subr.bf16.mxu0 %v5956_v0  ;;  %4105 = vmatprep.subr.bf16.mxu1 %v5291_v22 }
 0x3d0   :  { %4106 = vmatpush1.bf16.msra.mxu1 %v5289_v45 }
 0x3d2   :  { %4921 = vmatpush3.bf16.msra.mxu0 %v5629_v37  ;;  %v5654_v37 = vld [vmem:[#allocation13 + $0xf8] sm:$0xff]  }
 0x3d3   :  { %4922 = vmatprep.subr.bf16.mxu0 %v5956_v0 }
 0x3d6   :  { %4923 = vmatpush3.bf16.msra.mxu0 %v5630_v7 }
 0x3d7   :  { %4928 = vmatprep.subr.bf16.mxu0 %v5956_v0 }
 0x415   :  { %v3426_v10 = vpop.xlane.xlu0 %3425 }
 0x416   :  { %v3427_v11 = vmax.f32 %v3424_v51, %v3426_v10  ;;  %v5656_v10 = vld [vmem:[#allocation13 + $0x108] sm:$0xff]  }
 0x418   :  { %v3428_v32 = vsub.f32 %v3424_v51, %v3427_v11  ;;  %3880 = vst.msk [vmem:[#allocation4] sm:$0xff] %vm7217_vm7, %v3427_v11  ;;  %3433 = vperm.xlu1 %5108, %v3427_v11   ;;  %v5655_v51 = vld [vmem:[#allocation13 + $0x100] sm:$0xff]   ;;  %v5657_v11 = vld [vmem:[#allocation13 + $0x110] sm:$0xff]  }
 0x41a   :  { %v3429_v19 = vmul.f32 1.442695, %v3428_v32  ;;  %v5658_v32 = vld [vmem:[#allocation13 + $0x118] sm:$0xff]  }
 0x48c   :  { %v7053_v27 = vpop.f32.mrb[4].mxu0 }
 0x48d   :  { %v7055_v5 = vpop.f32.mrb[5].mxu0 }
 0x48e   :  { %v738_v61 = vpop.f32.mrb[6].mxu0 }
 0x48f   :  { %v739_v59 = vpop.f32.mrb[7].mxu0 }
 0x490   :  { %v5671_v59 = vld [vmem:[#allocation13 + $0x180] sm:$0xff]  }
 0x497   :  { %v3434_v46 = vpop.permute.xlu1 %3433 }
 0x498   :  { %v3436_v6 = vsub.f32 %v7002_v47, %v3434_v46  ;;  %v5659_v46 = vld [vmem:[#allocation13 + $0x120] sm:$0xff]  }
 0x49a   :  { %v3437_v55 = vmul.f32 1.442695, %v3436_v6  ;;  %v5660_v6 = vld [vmem:[#allocation13 + $0x128] sm:$0xff]  }
 0x49c   :  { %5598 = vpow2.f32 %v3437_v55 }
 0x49d   :  { %5600 = vpow2.f32 %v3429_v19  ;;  %v5662_v19 = vld [vmem:[#allocation13 + $0x138] sm:$0xff]  }
 0x4a6   :  { %v5599_v49 = vpop.eup %5598 }
 0x4a7   :  { %v3446_v9 = vpack.c.bf16 %v5599_v49, %v5599_v49  ;;  %3441 = vadd.xlane.f32.xlu0 %v5599_v49  ;;  %v7037_v57 = vpop.eup %5600  ;;  %v5292_v49 = vld [vmem:[#allocation19 + $0x40] ss:$16 sps:$4 sm:$0xff]  }
 0x4a9   :  { %v7023_v44 = vrot.slane %v3446_v9, %v6189_v56  ;;  %v5294_v9 = vld [vmem:[#allocation19 + $0x44] ss:$16 sps:$4 sm:$0xff]  }
 0x4aa   :  { %4107 = vmatprep.subr.bf16.mxu1 %v5294_v9 }
 0x4ab   :  { %v7027_v16 = vrot.slane %v7023_v44, %v6189_v56  ;;  %v3455_v25 = vcombine.high %v7023_v44, %v7023_v44  ;;  %v5661_v44 = vld [vmem:[#allocation13 + $0x130] sm:$0xff]   ;;  %4108 = vmatpush1.bf16.msra.mxu1 %v5292_v49 }
 0x4ad   :  { %v4534_v8 = vpack.i.b16 %v7027_v16, %v7027_v16  ;;  %v3473_v35 = vunpack.i.h.s16 %v7027_v16  ;;  %v7062_v48 = vrot.slane %v3455_v25, %v6189_v56  ;;  %v5647_v56 = vld [vmem:[#allocation13 + $0xc0] sm:$0xff]   ;;  %v3470_v55 = vcombine.high %v7027_v16, %v7027_v16  ;;  %v5670_v25 = vld [vmem:[#allocation13 + $0x178] sm:$0xff]  }
 0x4af   :  { %v3484_v24 = vrot.slane %v4534_v8, %v6200_v60  ;;  %v3526_v43 = vpack.i.b16 %v3473_v35, %v3473_v35  ;;  %v4535_v39 = vpack.i.b16 %v7062_v48, %v7062_v48  ;;  %v3475_v63 = vunpack.i.h.s16 %v7062_v48 }
 0x4b0   :  { %v4536_v8 = vpack.i.b16 %v3470_v55, %v3470_v55 }
 0x4b1   :  { %4925 = vmatmul.mubr.bf16.vlgmr.msra.gmra.mrb[8].mxu0 %v3484_v24  ;;  %v3530_v53 = vrot.slane %v3526_v43, %v6200_v60  ;;  %v3576_v14 = vrot.slane %v4535_v39, %v6200_v60  ;;  %v3618_v21 = vpack.i.b16 %v3475_v63, %v3475_v63  ;;  %v5668_v43 = vld [vmem:[#allocation13 + $0x168] sm:$0xff]   ;;  %v5674_v39 = vld [vmem:[#allocation13 + $0x198] sm:$0xff]   ;;  %v5681_v63 = vld [vmem:[#allocation13 + $0x1d0] sm:$0xff]  }
 0x4b2   :  { %4929 = vmatpush3.bf16.msra.mxu0 %v5631_v4  ;;  %4944 = vmatprep.mubr.msk.bf16.mxu0 %vm7216_vm6, %v5956_v0  ;;  %v3668_v24 = vrot.slane %v4536_v8, %v6200_v60  ;;  %v3439_v4 = vld [vmem:[#allocation5] sm:$0xff] }
 0x4b3   :  { %4930 = vmatprep.subr.bf16.mxu0 %v5956_v0  ;;  %v3622_v7 = vrot.slane %v3618_v21, %v6200_v60  ;;  %v3440_v16 = vmul.f32 %v7037_v57, %v3439_v4  ;;  %v5683_v21 = vld [vmem:[#allocation13 + $0x1e0] sm:$0xff]  }
 0x4b6   :  { %4931 = vmatpush3.bf16.msra.mxu0 %v5632_v28  ;;  %v5663_v28 = vld [vmem:[#allocation13 + $0x140] sm:$0xff]  }
 0x4b7   :  { %4932 = vmatprep.subr.bf16.mxu0 %v5956_v0 }
 0x4ba   :  { %4933 = vmatpush3.bf16.msra.mxu0 %v5633_v33 }
 0x4bb   :  { %4934 = vmatprep.subr.bf16.mxu0 %v5956_v0 }
 0x4bd   :  { %3851 = vperm.xlu0 %5109, %v7037_v57   ;;  %v5667_v57 = vld [vmem:[#allocation13 + $0x160] sm:$0xff]  }
 0x4be   :  { %4935 = vmatpush3.bf16.msra.mxu0 %v5634_v23 }
 0x4bf   :  { %4936 = vmatprep.subr.bf16.mxu0 %v5956_v0 }
 0x4c2   :  { %4937 = vmatpush3.bf16.msra.mxu0 %v5635_v34  ;;  %v5664_v34 = vld [vmem:[#allocation13 + $0x148] sm:$0xff]  }
 0x4c3   :  { %4938 = vmatprep.subr.bf16.mxu0 %v5956_v0 }
 0x4c6   :  { %4939 = vmatpush3.bf16.msra.mxu0 %v5636_v18  ;;  %v5665_v18 = vld [vmem:[#allocation13 + $0x150] sm:$0xff]  }
 0x4c7   :  { %4940 = vmatprep.subr.bf16.mxu0 %v5956_v0 }
 0x4ca   :  { %4941 = vmatpush3.bf16.msra.mxu0 %v5637_v2  ;;  %v5666_v2 = vld [vmem:[#allocation13 + $0x158] sm:$0xff]  }
 0x4cb   :  { %4942 = vmatprep.subr.bf16.mxu0 %v5956_v0 }
 0x4ce   :  { %4943 = vmatpush3.bf16.msra.mxu0 %v5638_v58  ;;  %v3477_v58 = vunpack.i.h.s16 %v3470_v55  ;;  %v5686_v55 = vld [vmem:[#allocation13 + $0x1f8] sm:$0xff]  }
 0x4cf   :  { %4948 = vmatprep.subr.bf16.mxu0 %v5956_v0 }
 0x4d1   :  { %4945 = vmatmul.mubr.bf16.vlgmr.msra.gmra.mrb[12].mxu0 %v3530_v53 }
 0x4d2   :  { %4949 = vmatpush3.bf16.msra.mxu0 %v5639_v62  ;;  %4964 = vmatprep.mubr.msk.bf16.mxu0 %vm7216_vm6, %v5956_v0  ;;  %v5295_v62 = vld [vmem:[#allocation19 + $0x60] ss:$16 sps:$4 sm:$0xff]  }
 0x4d3   :  { %4950 = vmatprep.subr.bf16.mxu0 %v5956_v0 }
 0x4d6   :  { %4951 = vmatpush3.bf16.msra.mxu0 %v5640_v1  ;;  %v5297_v1 = vld [vmem:[#allocation19 + $0x64] ss:$16 sps:$4 sm:$0xff]  }
 0x4d7   :  { %4952 = vmatprep.subr.bf16.mxu0 %v5956_v0  ;;  %4109 = vmatprep.subr.bf16.mxu1 %v5297_v1  ;;  %v5313_v1 = vld [vmem:[#allocation19 + $0x28] ss:$16 sps:$4 sm:$0xff]  }
 0x4d8   :  { %4110 = vmatpush1.bf16.msra.mxu1 %v5295_v62  ;;  %v5315_v62 = vld [vmem:[#allocation19 + $0x2c] ss:$16 sps:$4 sm:$0xff]  }
 0x4da   :  { %4953 = vmatpush3.bf16.msra.mxu0 %v5641_v30  ;;  %v5669_v30 = vld [vmem:[#allocation13 + $0x170] sm:$0xff]  }
 0x4db   :  { %4954 = vmatprep.subr.bf16.mxu0 %v5956_v0 }
 0x4de   :  { %4955 = vmatpush3.bf16.msra.mxu0 %v5642_v40  ;;  %v3710_v40 = vpack.i.b16 %v3477_v58, %v3477_v58  ;;  %v5312_v58 = vld [vmem:[#allocation19 + $0xc] ss:$16 sps:$4 sm:$0xff]  }
 0x4df   :  { %4956 = vmatprep.subr.bf16.mxu0 %v5956_v0 }
 0x4e0   :  { %v3714_v61 = vrot.slane %v3710_v40, %v6200_v60 }
 0x4e2   :  { %4957 = vmatpush3.bf16.msra.mxu0 %v5643_v17  ;;  %v3888_v17 = vld [vmem:[#allocation4] sm:$0xff] }
 0x4e3   :  { %4958 = vmatprep.subr.bf16.mxu0 %v5956_v0 }
 0x4e6   :  { %4959 = vmatpush3.bf16.msra.mxu0 %v5644_v36  ;;  %v5672_v36 = vld [vmem:[#allocation13 + $0x188] sm:$0xff]  }
 0x4e7   :  { %4960 = vmatprep.subr.bf16.mxu0 %v5956_v0 }
 0x4ea   :  { %4961 = vmatpush3.bf16.msra.mxu0 %v5645_v13  ;;  %v5673_v13 = vld [vmem:[#allocation13 + $0x190] sm:$0xff]  }
 0x4eb   :  { %4962 = vmatprep.subr.bf16.mxu0 %v5956_v0 }
 0x4ee   :  { %4963 = vmatpush3.bf16.msra.mxu0 %v5646_v12  ;;  %v3471_v12 = vcombine.high %v7062_v48, %v7062_v48  ;;  %v5680_v48 = vld [vmem:[#allocation13 + $0x1c8] sm:$0xff]  }
 0x4ef   :  { %4968 = vmatprep.subr.bf16.mxu0 %v5956_v0 }
 0x4f1   :  { %4965 = vmatmul.mubr.bf16.vlgmr.msra.gmra.mrb[16].mxu0 %v3576_v14  ;;  %v5298_v14 = vld [vmem:[#allocation19 + $0x80] ss:$16 sps:$4 sm:$0xff]  }
 0x4f2   :  { %4969 = vmatpush3.bf16.msra.mxu0 %v5647_v56  ;;  %4984 = vmatprep.mubr.msk.bf16.mxu0 %vm7216_vm6, %v5956_v0  ;;  %v5300_v56 = vld [vmem:[#allocation19 + $0x84] ss:$16 sps:$4 sm:$0xff]  }
 0x4f3   :  { %4970 = vmatprep.subr.bf16.mxu0 %v5956_v0  ;;  %4111 = vmatprep.subr.bf16.mxu1 %v5300_v56  ;;  %v5330_v56 = vld [vmem:[#allocation19 + $0xcc] ss:$16 sps:$4 sm:$0xff]  }
 0x4f4   :  { %4112 = vmatpush1.bf16.msra.mxu1 %v5298_v14 }
 0x4f6   :  { %4971 = vmatpush3.bf16.msra.mxu0 %v5648_v29  ;;  %v5677_v29 = vld [vmem:[#allocation13 + $0x1b0] sm:$0xff]  }
 0x4f7   :  { %4972 = vmatprep.subr.bf16.mxu0 %v5956_v0 }
 0x4fa   :  { %4973 = vmatpush3.bf16.msra.mxu0 %v5649_v50  ;;  %v4537_v50 = vpack.i.b16 %v3471_v12, %v3471_v12 }
 0x4fb   :  { %4974 = vmatprep.subr.bf16.mxu0 %v5956_v0 }
 0x4fe   :  { %4975 = vmatpush3.bf16.msra.mxu0 %v5650_v3  ;;  %v5678_v3 = vld [vmem:[#allocation13 + $0x1b8] sm:$0xff]  }
 0x4ff   :  { %4976 = vmatprep.subr.bf16.mxu0 %v5956_v0 }
 0x502   :  { %4977 = vmatpush3.bf16.msra.mxu0 %v5651_v38  ;;  %v3760_v38 = vrot.slane %v4537_v50, %v6200_v60 }
 0x503   :  { %4978 = vmatprep.subr.bf16.mxu0 %v5956_v0 }
 0x506   :  { %4979 = vmatpush3.bf16.msra.mxu0 %v5652_v15  ;;  %v5679_v15 = vld [vmem:[#allocation13 + $0x1c0] sm:$0xff]  }
 0x507   :  { %4980 = vmatprep.subr.bf16.mxu0 %v5956_v0 }
 0x50a   :  { %4981 = vmatpush3.bf16.msra.mxu0 %v5653_v20  ;;  %v5682_v20 = vld [vmem:[#allocation13 + $0x1d8] sm:$0xff]  }
 0x50b   :  { %4982 = vmatprep.subr.bf16.mxu0 %v5956_v0 }
 0x50e   :  { %4983 = vmatpush3.bf16.msra.mxu0 %v5654_v37  ;;  %v5684_v37 = vld [vmem:[#allocation13 + $0x1e8] sm:$0xff]  }
 0x50f   :  { %4988 = vmatprep.subr.bf16.mxu0 %v5956_v0 }
 0x511   :  { %4985 = vmatmul.mubr.bf16.vlgmr.msra.gmra.mrb[20].mxu0 %v3622_v7 }
 0x512   :  { %4989 = vmatpush3.bf16.msra.mxu0 %v5655_v51  ;;  %5004 = vmatprep.mubr.msk.bf16.mxu0 %vm7216_vm6, %v5956_v0 }
 0x513   :  { %4990 = vmatprep.subr.bf16.mxu0 %v5956_v0 }
 0x516   :  { %4991 = vmatpush3.bf16.msra.mxu0 %v5656_v10  ;;  %v3479_v10 = vunpack.i.h.s16 %v3471_v12 }
 0x517   :  { %4992 = vmatprep.subr.bf16.mxu0 %v5956_v0 }
 0x51a   :  { %4993 = vmatpush3.bf16.msra.mxu0 %v5657_v11  ;;  %v5301_v11 = vld [vmem:[#allocation19 + $0xa0] ss:$16 sps:$4 sm:$0xff]  }
 0x51b   :  { %4994 = vmatprep.subr.bf16.mxu0 %v5956_v0 }
 0x51e   :  { %4995 = vmatpush3.bf16.msra.mxu0 %v5658_v32  ;;  %v5303_v32 = vld [vmem:[#allocation19 + $0xa4] ss:$16 sps:$4 sm:$0xff]  }
 0x51f   :  { %4996 = vmatprep.subr.bf16.mxu0 %v5956_v0  ;;  %4113 = vmatprep.subr.bf16.mxu1 %v5303_v32 }
 0x520   :  { %4114 = vmatpush1.bf16.msra.mxu1 %v5301_v11 }
 0x522   :  { %4997 = vmatpush3.bf16.msra.mxu0 %v5659_v46  ;;  %v5685_v46 = vld [vmem:[#allocation13 + $0x1f0] sm:$0xff]  }
 0x523   :  { %4998 = vmatprep.subr.bf16.mxu0 %v5956_v0 }
 0x526   :  { %4999 = vmatpush3.bf16.msra.mxu0 %v5660_v6  ;;  %v3802_v6 = vpack.i.b16 %v3479_v10, %v3479_v10 }
 0x527   :  { %5000 = vmatprep.subr.bf16.mxu0 %v5956_v0 }
 0x528   :  { %v3806_v49 = vrot.slane %v3802_v6, %v6200_v60 }
 0x52a   :  { %5001 = vmatpush3.bf16.msra.mxu0 %v5661_v44 }
 0x52b   :  { %5002 = vmatprep.subr.bf16.mxu0 %v5956_v0 }
 0x52e   :  { %5003 = vmatpush3.bf16.msra.mxu0 %v5662_v19 }
 0x52f   :  { %5008 = vmatprep.subr.bf16.mxu0 %v5956_v0 }
 0x531   :  { %5005 = vmatmul.mubr.bf16.vlgmr.msra.gmra.mrb[24].mxu0 %v3668_v24 }
 0x532   :  { %5009 = vmatpush3.bf16.msra.mxu0 %v5663_v28  ;;  %5024 = vmatprep.mubr.msk.bf16.mxu0 %vm7216_vm6, %v5956_v0  ;;  %v5304_v28 = vld [vmem:[#allocation19 + $0xc0] ss:$16 sps:$4 sm:$0xff]  }
 0x533   :  { %5010 = vmatprep.subr.bf16.mxu0 %v5956_v0 }
 0x534   :  { %v3442_v33 = vpop.xlane.xlu0 %3441 }
 0x535   :  { %v3443_v23 = vadd.f32 %v3442_v33, %v3440_v16  ;;  %v5306_v16 = vld [vmem:[#allocation19 + $0xc4] ss:$16 sps:$4 sm:$0xff]  }
 0x536   :  { %5011 = vmatpush3.bf16.msra.mxu0 %v5664_v34  ;;  %4115 = vmatprep.subr.bf16.mxu1 %v5306_v16 }
 0x537   :  { %3445 = vst.msk [vmem:[#allocation5] sm:$0xff] %vm7218_vm8, %v3443_v23  ;;  %5012 = vmatprep.subr.bf16.mxu0 %v5956_v0  ;;  %4116 = vmatpush1.bf16.msra.mxu1 %v5304_v28 }
 0x53a   :  { %5013 = vmatpush3.bf16.msra.mxu0 %v5665_v18 }
 0x53b   :  { %5014 = vmatprep.subr.bf16.mxu0 %v5956_v0 }
 0x53e   :  { %v3884_v35 = vld [vmem:[#allocation5] sm:$0xff]  ;;  %5015 = vmatpush3.bf16.msra.mxu0 %v5666_v2 }
 0x53f   :  { %5602 = vrcp.f32 %v3884_v35  ;;  %5016 = vmatprep.subr.bf16.mxu0 %v5956_v0 }
 0x542   :  { %5017 = vmatpush3.bf16.msra.mxu0 %v5667_v57  ;;  %v5307_v57 = vld [vmem:[#allocation19 + $0xe0] ss:$16 sps:$4 sm:$0xff]  }
 0x543   :  { %5018 = vmatprep.subr.bf16.mxu0 %v5956_v0 }
 0x546   :  { %5019 = vmatpush3.bf16.msra.mxu0 %v5668_v43  ;;  %v5310_v43 = vld [vmem:[#allocation19 + $0x8] ss:$16 sps:$4 sm:$0xff]  }
 0x547   :  { %5020 = vmatprep.subr.bf16.mxu0 %v5956_v0 }
 0x549   :  { %v5603_v53 = vpop.eup %5602 }
 0x54a   :  { %5021 = vmatpush3.bf16.msra.mxu0 %v5669_v30  ;;  %3899 = vperm.xlu1 %5108, %v5603_v53   ;;  %v5318_v30 = vld [vmem:[#allocation19 + $0x4c] ss:$16 sps:$4 sm:$0xff]  }
 0x54b   :  { %5022 = vmatprep.subr.bf16.mxu0 %v5956_v0 }
 0x54e   :  { %5023 = vmatpush3.bf16.msra.mxu0 %v5670_v25  ;;  %3891 = vperm.xlu1 %5108, %v3888_v17   ;;  %v5316_v25 = vld [vmem:[#allocation19 + $0x48] ss:$16 sps:$4 sm:$0xff]  }
 0x54f   :  { %5028 = vmatprep.subr.bf16.mxu0 %v5956_v0 }
 0x551   :  { %5025 = vmatmul.mubr.bf16.vlgmr.msra.gmra.mrb[28].mxu0 %v3714_v61 }
 0x552   :  { %5029 = vmatpush3.bf16.msra.mxu0 %v5671_v59  ;;  %5044 = vmatprep.mubr.msk.bf16.mxu0 %vm7216_vm6, %v5956_v0  ;;  %v5321_v59 = vld [vmem:[#allocation19 + $0x6c] ss:$16 sps:$4 sm:$0xff]  }
 0x553   :  { %5030 = vmatprep.subr.bf16.mxu0 %v5956_v0 }
 0x556   :  { %5031 = vmatpush3.bf16.msra.mxu0 %v5672_v36  ;;  %v5319_v36 = vld [vmem:[#allocation19 + $0x68] ss:$16 sps:$4 sm:$0xff]  }
 0x557   :  { %5032 = vmatprep.subr.bf16.mxu0 %v5956_v0 }
 0x55a   :  { %5033 = vmatpush3.bf16.msra.mxu0 %v5673_v13  ;;  %v5324_v13 = vld [vmem:[#allocation19 + $0x8c] ss:$16 sps:$4 sm:$0xff]  }
 0x55b   :  { %5034 = vmatprep.subr.bf16.mxu0 %v5956_v0 }
 0x55e   :  { %5035 = vmatpush3.bf16.msra.mxu0 %v5674_v39  ;;  %v5322_v39 = vld [vmem:[#allocation19 + $0x88] ss:$16 sps:$4 sm:$0xff]  }
 0x55f   :  { %5036 = vmatprep.subr.bf16.mxu0 %v5956_v0 }
 0x562   :  { %5037 = vmatpush3.bf16.msra.mxu0 %v5675_v26  ;;  %v5327_v26 = vld [vmem:[#allocation19 + $0xac] ss:$16 sps:$4 sm:$0xff]  }
 0x563   :  { %5038 = vmatprep.subr.bf16.mxu0 %v5956_v0 }
 0x566   :  { %5039 = vmatpush3.bf16.msra.mxu0 %v5676_v31  ;;  %v5325_v31 = vld [vmem:[#allocation19 + $0xa8] ss:$16 sps:$4 sm:$0xff]  }
 0x567   :  { %5040 = vmatprep.subr.bf16.mxu0 %v5956_v0 }
 0x56a   :  { %5041 = vmatpush3.bf16.msra.mxu0 %v5677_v29 }
 0x56b   :  { %5042 = vmatprep.subr.bf16.mxu0 %v5956_v0 }
 0x56e   :  { %5043 = vmatpush3.bf16.msra.mxu0 %v5678_v3  ;;  %v5328_v3 = vld [vmem:[#allocation19 + $0xc8] ss:$16 sps:$4 sm:$0xff]  }
 0x56f   :  { %5048 = vmatprep.subr.bf16.mxu0 %v5956_v0 }
 0x571   :  { %5045 = vmatmul.mubr.bf16.vlgmr.msra.gmra.mrb[32].mxu0 %v3760_v38 }
 0x572   :  { %5049 = vmatpush3.bf16.msra.mxu0 %v5679_v15  ;;  %5064 = vmatprep.mubr.msk.bf16.mxu0 %vm7216_vm6, %v5956_v0 }
 0x573   :  { %5050 = vmatprep.subr.bf16.mxu0 %v5956_v0 }
 0x576   :  { %5051 = vmatpush3.bf16.msra.mxu0 %v5680_v48 }
 0x577   :  { %5052 = vmatprep.subr.bf16.mxu0 %v5956_v0 }
 0x57a   :  { %5053 = vmatpush3.bf16.msra.mxu0 %v5681_v63  ;;  %v5333_v63 = vld [vmem:[#allocation19 + $0xec] ss:$16 sps:$4 sm:$0xff]  }
 0x57b   :  { %5054 = vmatprep.subr.bf16.mxu0 %v5956_v0 }
 0x57e   :  { %5055 = vmatpush3.bf16.msra.mxu0 %v5682_v20  ;;  %v5331_v20 = vld [vmem:[#allocation19 + $0xe8] ss:$16 sps:$4 sm:$0xff]  }
 0x57f   :  { %5056 = vmatprep.subr.bf16.mxu0 %v5956_v0 }
 0x582   :  { %5057 = vmatpush3.bf16.msra.mxu0 %v5683_v21 }
 0x583   :  { %5058 = vmatprep.subr.bf16.mxu0 %v5956_v0 }
 0x584   :  { %v3520_v45 = vpop.f32.mrb[8].mxu0 }
 0x585   :  { %v4926_v22 = vpop.f32.mrb[9].mxu0 }
 0x586   :  { %5059 = vmatpush3.bf16.msra.mxu0 %v5684_v37  ;;  %v3523_v7 = vpop.f32.mrb[10].mxu0 }
 0x587   :  { %v4927_v51 = vpop.f32.mrb[11].mxu0  ;;  %5060 = vmatprep.subr.bf16.mxu0 %v5956_v0 }
 0x58a   :  { %5061 = vmatpush3.bf16.msra.mxu0 %v5685_v46 }
 0x58b   :  { %5062 = vmatprep.subr.bf16.mxu0 %v5956_v0 }
 0x58e   :  { %5063 = vmatpush3.bf16.msra.mxu0 %v5686_v55 }
 0x58f   :  { %4144 = vmatprep.subr.bf16.mxu0 %v5312_v58  ;;  %v5335_v58 = vld [vmem:[#allocation21 + $0x8] sm:$0xff]  }
 0x591   :  { %5065 = vmatmul.mubr.bf16.vlgmr.msra.gmra.mrb[36].mxu0 %v3806_v49 }
 0x592   :  { %4176 = vmatprep.mubr.bf16.mxu0 %v5960_v52  ;;  %v5309_v52 = vld [vmem:[#allocation19 + $0xe4] ss:$16 sps:$4 sm:$0xff]   ;;  %4145 = vmatpush1.bf16.msra.mxu0 %v5310_v43 }
 0x593   :  { %4117 = vmatprep.subr.bf16.mxu1 %v5309_v52  ;;  %4146 = vmatprep.subr.bf16.mxu0 %v5315_v62  ;;  %v5334_v43 = vld [vmem:[#allocation21] sm:$0xff]   ;;  %v5336_v62 = vld [vmem:[#allocation21 + $0x10] sm:$0xff]  }
 0x594   :  { %4118 = vmatpush1.bf16.msra.mxu1 %v5307_v57 }
 0x595   :  { %5068 = vmatprep.subr.bf16.mxu1 %v5956_v0 }
 0x596   :  { %4147 = vmatpush1.bf16.msra.mxu0 %v5313_v1  ;;  %v5337_v1 = vld [vmem:[#allocation21 + $0x18] sm:$0xff]  }
 0x597   :  { %4148 = vmatprep.subr.bf16.mxu0 %v5318_v30  ;;  %v5339_v30 = vld [vmem:[#allocation21 + $0x28] sm:$0xff]  }
 0x59a   :  { %4149 = vmatpush1.bf16.msra.mxu0 %v5316_v25  ;;  %v4189_v25 = vld [vmem:[%s7200_s9] sm:$0xf]  ;;  %s5961_s9 = smov [#allocation23]  }
 0x59b   :  { %4150 = vmatprep.subr.bf16.mxu0 %v5321_v59  ;;  %v4194_v59 = vrot.slane %v4189_v25, %v6200_v60  ;;  %s4371_s14 = sshll.u32 %s5961_s9, 4  ;;  %s4372_s14 = int_to_ptr.vmem [resolvable:$true] %s4371_s14 }
 0x59c   :  { %s5885_s16 = scalar_lea.vmem %s4372_s14, 128  ;;  %p5890_p3 = scmp.lt.s32.totalorder %s4372_s14, %s4372_s14 }
 0x59d   :  { %p5886_p2 = scmp.ne.s32.totalorder %s4372_s14, %s5885_s16  ;;  %p5891_p4 = scmp.lt.s32.totalorder %s5885_s16, %s5885_s16 }
 0x59e   :  { %4151 = vmatpush1.bf16.msra.mxu0 %v5319_v36 }
 0x59f   :  { %4152 = vmatprep.subr.bf16.mxu0 %v5324_v13  ;;  %p5892_p5 = por %p5891_p4, %p5890_p3 }
 0x5a1   :  { %p5893_p6 = pnand %p5892_p5, %p5886_p2 }
 0x5a2   :  { %4153 = vmatpush1.bf16.msra.mxu0 %v5322_v39 }
 0x5a3   :  { %4154 = vmatprep.subr.bf16.mxu0 %v5327_v26 }
 0x5a4   :  { %v3566_v9 = vpop.f32.mrb[12].mxu0 }
 0x5a5   :  { %v3863_v44 = vrot.slane %v3566_v9, 7  ;;  %v4946_v8 = vpop.f32.mrb[13].mxu0 }
 0x5a6   :  { %v3569_v19 = vpop.f32.mrb[14].mxu0  ;;  %4155 = vmatpush1.bf16.msra.mxu0 %v5325_v31 }
 0x5a7   :  { %v3864_v24 = vsel %vm7219_vm9, %v3863_v44, %v3520_v45  ;;  %v4947_v4 = vpop.f32.mrb[15].mxu0  ;;  %4156 = vmatprep.subr.bf16.mxu0 %v5330_v56  ;;  %v4205_v56 = vsub.s32 3, %v6186_v54 }
 0x5a8   :  { %v3852_v4 = vpop.permute.xlu0 %3851 }
 0x5aa   :  { %4157 = vmatpush1.bf16.msra.mxu0 %v5328_v3 }
 0x5ab   :  { %4158 = vmatprep.subr.bf16.mxu0 %v5333_v63 }
 0x5ae   :  { %4159 = vmatpush1.bf16.msra.mxu0 %v5331_v20  ;;  %v4206_v20 = vrot.slane %v4189_v25, %v4205_v56 }
 0x5c4   :  { %v3612_v33 = vpop.f32.mrb[16].mxu0 }
 0x5c5   :  { %v3865_v23 = vrot.slane %v3612_v33, 6  ;;  %v4966_v34 = vpop.f32.mrb[17].mxu0 }
 0x5c6   :  { %v3615_v18 = vpop.f32.mrb[18].mxu0 }
 0x5c7   :  { %v3866_v35 = vsel %vm7220_vm10, %v3865_v23, %v3864_v24  ;;  %v4967_v2 = vpop.f32.mrb[19].mxu0  ;;  %v3854_v23 = vmul.f32 0.0, %v3852_v4 }
 0x5c9   :  { %v7133_v53 = vpop.permute.xlu1 %3899 }
 0x5cd   :  { %v3892_v40 = vpop.permute.xlu1 %3891 }
 0x5ce   :  { %v3894_v17 = vsub.f32 %v7002_v47, %v3892_v40  ;;  %v5340_v40 = vld [vmem:[#allocation21 + $0x30] sm:$0xff]  }
 0x5d0   :  { %v3895_v61 = vmul.f32 1.442695, %v3894_v17  ;;  %v5341_v17 = vld [vmem:[#allocation21 + $0x38] sm:$0xff]  }
 0x5d2   :  { %5604 = vpow2.f32 %v3895_v61  ;;  %v4197_v61 = vsub.s32 1, %v6186_v54 }
 0x5d4   :  { %v4198_v39 = vrot.slane %v4189_v25, %v4197_v61 }
 0x5dc   :  { %v5605_v12 = vpop.eup %5604 }
 0x5dd   :  { %v3902_v47 = vmul.f32 %v5605_v12, %v7133_v53 }
 0x5df   :  { %3903 = vst [vmem:[#allocation23] sm:$0xff] %v3902_v47 }
 0x5e4   :  { %v3658_v14 = vpop.f32.mrb[20].mxu0 }
 0x5e5   :  { %v3867_v29 = vrot.slane %v3658_v14, 5  ;;  %v4986_v50 = vpop.f32.mrb[21].mxu0 }
 0x5e6   :  { %v3661_v38 = vpop.f32.mrb[22].mxu0 }
 0x5e7   :  { %v3868_v15 = vsel %vm7221_vm11, %v3867_v29, %v3866_v35  ;;  %v4987_v48 = vpop.f32.mrb[23].mxu0 }
 0x604   :  { %v3704_v21 = vpop.f32.mrb[24].mxu0 }
 0x605   :  { %v3869_v45 = vrot.slane %v3704_v21, 4  ;;  %v5006_v22 = vpop.f32.mrb[25].mxu0 }
 0x606   :  { %v3707_v37 = vpop.f32.mrb[26].mxu0 }
 0x607   :  { %v3870_v7 = vsel %vm7222_vm13, %v3869_v45, %v3868_v15  ;;  %v5007_v51 = vpop.f32.mrb[27].mxu0 }
 0x624   :  { %v3750_v10 = vpop.f32.mrb[28].mxu0 }
 0x625   :  { %v3871_v11 = vrot.slane %v3750_v10, 3  ;;  %v5026_v32 = vpop.f32.mrb[29].mxu0 }
 0x626   :  { %v3753_v46 = vpop.f32.mrb[30].mxu0 }
 0x627   :  { %v3872_v6 = vsel %vm3412_vm12, %v3871_v11, %v3870_v7  ;;  %v5027_v55 = vpop.f32.mrb[31].mxu0  ;;  %v4234_v11 = vld [vmem:[#allocation12] sm:$0xff] }
 0x644   :  { %v3796_v49 = vpop.f32.mrb[32].mxu0 }
 0x645   :  { %v3873_v9 = vrot.slane %v3796_v49, 2  ;;  %v5046_v44 = vpop.f32.mrb[33].mxu0 }
 0x646   :  { %v3799_v8 = vpop.f32.mrb[34].mxu0 }
 0x647   :  { %v3874_v19 = vsel %vm3414_vm3, %v3873_v9, %v3872_v6  ;;  %v5047_v24 = vpop.f32.mrb[35].mxu0 }
 0x664   :  { %v3842_v28 = vpop.f32.mrb[36].mxu0 }
 0x665   :  { %v3875_v16 = vrot.slane %v3842_v28, 1  ;;  %v5066_v33 = vpop.f32.mrb[37].mxu0 }
 0x666   :  { %v3845_v34 = vpop.f32.mrb[38].mxu0 }
 0x667   :  { %v3876_v18 = vsel %vm3416_vm4, %v3875_v16, %v3874_v19  ;;  %v5067_v35 = vpop.f32.mrb[39].mxu0 }
 0x668   :  { %v3878_v2 = vadd.f32 %v3876_v18, %v3854_v23 }
 0x66a   :  { %v3905_v57 = vmul.f32 %v7133_v53, %v3878_v2  ;;  %v5338_v53 = vld [vmem:[#allocation21 + $0x20] sm:$0xff]  }
 0x66c   :  { %v3910_v52 = vpack.c.bf16 %v3905_v57, %v3905_v57 }
 0x66e   :  { %4136 = vmatmul.mubr.bf16.vlgmr.msra.gmra.mrb[132].mxu1 %v3910_v52  ;;  %4177 = vmatmul.mubr.bf16.vlgmr.msra.gmra.mrb[40].mxu0 %v3910_v52 }
 0x66f   :  { %5084 = vmatprep.mubr.msk.bf16.mxu1 %vm7216_vm6, %v5956_v0  ;;  %5069 = vmatpush3.bf16.msra.mxu1 %v5334_v43 }
 0x670   :  { %5070 = vmatprep.subr.bf16.mxu1 %v5956_v0 }
 0x673   :  { %5071 = vmatpush3.bf16.msra.mxu1 %v5335_v58 }
 0x674   :  { %5072 = vmatprep.subr.bf16.mxu1 %v5956_v0 }
 0x677   :  { %5073 = vmatpush3.bf16.msra.mxu1 %v5336_v62 }
 0x678   :  { %5074 = vmatprep.subr.bf16.mxu1 %v5956_v0 }
 0x67b   :  { %5075 = vmatpush3.bf16.msra.mxu1 %v5337_v1 }
 0x67c   :  { %5076 = vmatprep.subr.bf16.mxu1 %v5956_v0 }
 0x67f   :  { %5077 = vmatpush3.bf16.msra.mxu1 %v5338_v53 }
 0x680   :  { %5078 = vmatprep.subr.bf16.mxu1 %v5956_v0 }
 0x683   :  { %5079 = vmatpush3.bf16.msra.mxu1 %v5339_v30 }
 0x684   :  { %5080 = vmatprep.subr.bf16.mxu1 %v5956_v0 }
 0x687   :  { %5081 = vmatpush3.bf16.msra.mxu1 %v5340_v40 }
 0x688   :  { %5082 = vmatprep.subr.bf16.mxu1 %v5956_v0 }
 0x68b   :  { %5083 = vmatpush3.bf16.msra.mxu1 %v5341_v17 }
 0x741   :  { %v4137_v36 = vpop.f32.mrb[132].mxu1  ;;  %v4178_v13 = vpop.f32.mrb[40].mxu0 }
 0x742   :  { %v4185_v26 = vadd.f32 %v4137_v36, %v6181_v41  ;;  %v4187_v31 = vadd.f32 %v4178_v13, %v7053_v27  ;;  %v4139_v12 = vpop.f32.mrb[133].mxu1  ;;  %v4180_v47 = vpop.f32.mrb[41].mxu0  ;;  %v4201_v41 = vsub.s32 2, %v6186_v54 }
 0x743   :  { %v4186_v0 = vadd.f32 %v4139_v12, %v6183_v42  ;;  %v4188_v14 = vadd.f32 %v4180_v47, %v7055_v5  ;;  %v4141_v29 = vpop.f32.mrb[134].mxu1  ;;  %v4182_v50 = vpop.f32.mrb[42].mxu0 }
 0x744   :  { %v4211_v3 = vadd.f32 %v4194_v59, %v4185_v26  ;;  %v4142_v38 = vpop.f32.mrb[135].mxu1  ;;  %v4183_v60 = vpop.f32.mrb[43].mxu0  ;;  %v4202_v21 = vrot.slane %v4189_v25, %v4201_v41 }
 0x745   :  { %v4212_v15 = vadd.f32 %v4198_v39, %v4186_v0  ;;  %v4214_v27 = vadd.f32 %v4206_v20, %v4188_v14 }
 0x746   :  { %v4570_v48 = vmul.f32 -1.442695, %v4211_v3  ;;  %v4213_v45 = vadd.f32 %v4202_v21, %v4187_v31 }
 0x747   :  { %v4571_v63 = vmul.f32 -1.442695, %v4212_v15  ;;  %v4572_v42 = vmul.f32 -1.442695, %v4214_v27 }
 0x748   :  { %5606 = vpow2.f32 %v4570_v48 }
 0x749   :  { %5608 = vpow2.f32 %v4571_v63 }
 0x74a   :  { %5610 = vpow2.f32 %v4572_v42 }
 0x74b   :  { %5612 = vtanh.f32 %v4213_v45 }
 0x752   :  { %v5607_v5 = vpop.eup %5606 }
 0x753   :  { %v5609_v22 = vpop.eup %5608  ;;  %v4218_v37 = vadd.f32 1.0, %v5607_v5 }
 0x754   :  { %v4224_v7 = vadd.f32 1.0, %v5609_v22  ;;  %v5611_v51 = vpop.eup %5610 }
 0x755   :  { %5614 = vrcp.f32 %v4218_v37  ;;  %v5613_v10 = vpop.eup %5612  ;;  %v4231_v54 = vadd.f32 1.0, %v5611_v51 }
 0x756   :  { %5616 = vrcp.f32 %v4224_v7 }
 0x757   :  { %5618 = vrcp.f32 %v4231_v54 }
 0x75f   :  { %v5615_v32 = vpop.eup %5614 }
 0x760   :  { %v5617_v46 = vpop.eup %5616  ;;  %v4236_v6 = vmul.f32 %v5615_v32, %v5613_v10 }
 0x761   :  { %v4235_v55 = vmul.f32 %v5617_v46, %v4234_v11  ;;  %v5619_v9 = vpop.eup %5618 }
 0x763   :  { %v4237_v49 = vadd.f32 %v4236_v6, %v4235_v55 }
 0x765   :  { %4354 = vst [vmem:[#allocation22 + $0x10] sm:$0xff] %v4237_v49  ;;  %5620 = vtanh.f32 %v4237_v49 }
 0x76f   :  { %v5621_v44 = vpop.eup %5620 }
 0x770   :  { %v4239_v8 = vmul.f32 %v5621_v44, %v5619_v9 }
 0x772   :  { %v4240_v19 = vpack.c.bf16 %v4239_v8, %v4239_v8  ;;  %4353 = vst [vmem:[#allocation22 + $0x8] sm:$0xff] %v4239_v8 }
 0x774   :  { %5085 = vmatmul.mubr.bf16.vlgmr.msra.gmra.mrb[136].mxu1 %v4240_v19 }
 0x775   :  { %5896 = shalt.err (!%p5893_p6)
}
 0x776   :  { %s5897_s17 = scalar_lea.hbm %s7204_s13, 128 }
 0x777   :  { %p5898_p7 = scmp.ne.s32.totalorder %s7204_s13, %s5897_s17  ;;  %p5901_p8 = scmp.lt.u32.totalorder %s5897_s17, %s7204_s13 }
 0x779   :  { %p5903_p9 = pnand %p5901_p8, %p5898_p7 }
 0x77b   :  { %5906 = shalt.err (!%p5903_p9)
}
 0x77c   :  { %4374 = dma.vmem_to_hbm [thread:$0]  %s4372_s14, 128, %s7204_s13, [#allocation24]   ;;  %v4573_v24 = vld [vmem:[%s7202_s11] ss:$0 sm:$0xff] }
 0x77d   :  { %s5962_s25 = smov [#allocation22]  }
 0x77e   :  { %s4361_s27 = sshll.u32 %s5962_s25, 4  ;;  %s4362_s27 = int_to_ptr.vmem [resolvable:$true] %s4361_s27 }
 0x77f   :  { %s5907_s2 = scalar_lea.vmem %s4362_s27, 384  ;;  %p5912_p11 = scmp.lt.s32.totalorder %s4362_s27, %s4362_s27 }
 0x780   :  { %p5908_p10 = scmp.ne.s32.totalorder %s4362_s27, %s5907_s2  ;;  %p5913_p12 = scmp.lt.s32.totalorder %s5907_s2, %s5907_s2 }
 0x782   :  { %p5914_p13 = por %p5913_p12, %p5912_p11 }
 0x784   :  { %p5915_p0 = pnand %p5914_p13, %p5908_p10 }
 0x847   :  { %v4346_v4 = vpop.f32.mrb[136].mxu1 }
 0x848   :  { %v4347_v28 = vadd.f32 %v4573_v24, %v4346_v4  ;;  %v5086_v16 = vpop.f32.mrb[137].mxu1 }
 0x849   :  { %v4349_v33 = vpop.f32.mrb[138].mxu1 }
 0x84a   :  { %4352 = vst [vmem:[#allocation22] sm:$0xff] %v4347_v28  ;;  %v5087_v23 = vpop.f32.mrb[139].mxu1 }
 0x84b   :  { %5918 = shalt.err (!%p5915_p0)
}
 0x84c   :  { %s5919_s11 = scalar_lea.hbm %s7203_s12, 384 }
 0x84d   :  { %p5920_p1 = scmp.ne.s32.totalorder %s7203_s12, %s5919_s11  ;;  %p5923_p2 = scmp.lt.u32.totalorder %s5919_s11, %s7203_s12 }
 0x84f   :  { %p5925_p3 = pnand %p5923_p2, %p5920_p1 }
 0x851   :  { %5928 = shalt.err (!%p5925_p3)
}
 0x852   :  { %4364 = dma.vmem_to_hbm [thread:$0]  %s4362_s27, 384, %s7203_s12, [#allocation9]  }
 0x853   :  { %5939 = dma.done.wait [#allocation9], 384  }
 0x854   :  { %5940 = vsyncadd [#allocation9], 4294966912 }
 0x855   :  { %5941 = dma.done.wait [#allocation24], 128  }
 0x856   :  { %5942 = vsyncadd [#allocation24], 4294967168 }
 0x857   :  { %4381 = vsyncpa [#allocation8], 1 }
 0x858   :  { %4382 = vsyncpa [#allocation11], 1 }
 0x859   :  { %4383 = vsyncpa [#allocation14], 1 }
 0x85a   :  { %4384 = vsyncpa [#allocation17], 1 }
 0x85b   :  { %4385 = vsyncpa [#allocation20], 1 }
 0x85c   :  { %4386 = vsyncpa [#allocation9], 1 }
 0x85d   :  { %4387 = vsyncpa [#allocation24], 1 }

</bundles_post_ra>
